<compile_context>
chip_gen: v7x
topology: tpu7x:2x2x1
jax: 0.10.0
libtpu: 0.0.40
codegen_flags: <defaults>
</compile_context>

<pallas_src>
import functools
import math

import jax
import jax.numpy as jnp
import numpy as np
from jax.experimental import pallas as pl
from jax.experimental.pallas import tpu as pltpu

LEAKY = 0.1
HEAD_OUT = 21      # 3 anchors * (5 + 2 classes)
HEAD_PAD = 128     # lane-dense head output channels (real data in [:21])


# ---------------------------------------------------------------------------
# Constant 0/1 tap-selection matrices:  A[t] @ flat_feature == tap-(i,j) rows
# ---------------------------------------------------------------------------
def _sel_matrices(h_in, w_in, h_out, w_out, stride, pad):
    mats = np.zeros((9, h_out * w_out, h_in * w_in), np.float32)
    for i in range(3):
        for j in range(3):
            t = 3 * i + j
            for oh in range(h_out):
                for ow in range(w_out):
                    r = stride * oh + i - pad
                    c = stride * ow + j - pad
                    if 0 <= r < h_in and 0 <= c < w_in:
                        mats[t, oh * w_out + ow, r * w_in + c] = 1.0
    return mats


# ---------------------------------------------------------------------------
# The fused kernel: whole forward pass for ONE image (grid step = batch index)
# ---------------------------------------------------------------------------
def _yolo_kernel(col1_ref, w1_ref, b1_ref,
                 a2_ref, w2_ref, b2_ref,
                 a3_ref, w3_ref, b3_ref,
                 wsi_ref, bsi_ref,
                 wsot_ref, wsop_ref, wsog_ref, bso_ref,
                 apan_ref, wpan_ref, bpan_ref,
                 whd_ref, bhd_ref,
                 o_ref, *, slope):
    f32, bf16 = jnp.float32, jnp.bfloat16
    leaky = lambda z: jnp.maximum(z, slope * z)        # 1 VALU op, f32

    # ---- backbone b1: single im2col matmul, M=256, K=32 (27 real), N=16 ----
    y1 = jnp.dot(col1_ref[0], w1_ref[...], preferred_element_type=f32)
    y1 = leaky(y1 + b1_ref[...]).astype(bf16)                      # (256, 16)

    # ---- backbone b2: 3x3 s2, taps as (A_t @ y1) @ W_t, f32 accumulate -----
    acc = jnp.broadcast_to(b2_ref[...], (64, 32))
    for t in range(9):
        sel = jnp.dot(a2_ref[t], y1, preferred_element_type=f32)   # (64, 16)
        acc = acc + jnp.dot(sel.astype(bf16), w2_ref[t],
                            preferred_element_type=f32)
    y2 = leaky(acc).astype(bf16)                                   # (64, 32)

    # ---- backbone b3 --------------------------------------------------------
    acc = jnp.broadcast_to(b3_ref[...], (16, 64))
    for t in range(9):
        sel = jnp.dot(a3_ref[t], y2, preferred_element_type=f32)   # (16, 32)
        acc = acc + jnp.dot(sel.astype(bf16), w3_ref[t],
                            preferred_element_type=f32)
    y3 = leaky(acc).astype(bf16)                                   # (16, 64)

    # ---- spp_in 1x1 conv ----------------------------------------------------
    tmid = leaky(jnp.dot(y3, wsi_ref[...], preferred_element_type=f32)
                 + bsi_ref[...])                                   # (16, 32)

    # ---- SPP max pools on the 4x4 map (rows m = oh*4 + ow) ------------------
    # k=9 / k=13 "same" windows cover the whole 4x4 map -> global max
    # (the wrapper asserts the 4x4 spatial size before taking this shortcut).
    g = jnp.max(tmid, axis=0, keepdims=True)                       # (1, 32)
    # k=5: separable max with clipped windows {0..2},{0..3},{0..3},{1..3}
    r0, r1, r2, r3 = tmid[0:4], tmid[4:8], tmid[8:12], tmid[12:16]
    m012 = jnp.maximum(jnp.maximum(r0, r1), r2)
    m123 = jnp.maximum(jnp.maximum(r1, r2), r3)
    mall = jnp.maximum(m012, r3)

    def colpool(b):                                                # (4, 32)
        c0, c1, c2, c3 = b[0:1], b[1:2], b[2:3], b[3:4]
        c012 = jnp.maximum(jnp.maximum(c0, c1), c2)
        c123 = jnp.maximum(jnp.maximum(c1, c2), c3)
        call = jnp.maximum(c012, c3)
        return jnp.concatenate([c012, call, call, c123], axis=0)

    pall = colpool(mall)
    p5 = jnp.concatenate([colpool(m012), pall, pall, colpool(m123)], axis=0)

    # ---- spp_out 1x1 over [t | p5 | p9 | p13]; p9/p13 branches pre-summed ---
    u = jnp.dot(tmid.astype(bf16), wsot_ref[...], preferred_element_type=f32)
    u = u + jnp.dot(p5.astype(bf16), wsop_ref[...], preferred_element_type=f32)
    u = u + jnp.dot(jnp.broadcast_to(g, (16, 32)).astype(bf16), wsog_ref[...],
                    preferred_element_type=f32)
    u = leaky(u + bso_ref[...]).astype(bf16)                       # (16, 64)

    # ---- pan 3x3 s1 conv (selection-matrix taps) ----------------------------
    acc = jnp.broadcast_to(bpan_ref[...], (16, 64))
    for t in range(9):
        sel = jnp.dot(apan_ref[t], u, preferred_element_type=f32)  # (16, 64)
        acc = acc + jnp.dot(sel.astype(bf16), wpan_ref[t],
                            preferred_element_type=f32)
    v = leaky(acc).astype(bf16)                                    # (16, 64)

    # ---- head 1x1 conv (no activation); one aligned (16, 128) store ---------
    o = jnp.dot(v, whd_ref[...], preferred_element_type=f32) + bhd_ref[...]
    o_ref[0] = o


def _fused_forward(col1, pk):
    n = col1.shape[0]

    def const_spec(a):
        nd = a.ndim
        return pl.BlockSpec(a.shape, lambda b, nd=nd: (0,) * nd)

    args = (col1, pk["w1"], pk["b1"], pk["a2"], pk["w2"], pk["b2"],
            pk["a3"], pk["w3"], pk["b3"], pk["wsi"], pk["bsi"],
            pk["wsot"], pk["wsop"], pk["wsog"], pk["bso"],
            pk["apan"], pk["wpan"], pk["bpan"], pk["whd"], pk["bhd"])
    in_specs = [pl.BlockSpec((1,) + col1.shape[1:], lambda b: (b, 0, 0))]
    in_specs += [const_spec(a) for a in args[1:]]

    return pl.pallas_call(
        functools.partial(_yolo_kernel, slope=LEAKY),
        out_shape=jax.ShapeDtypeStruct((n, 16, HEAD_PAD), jnp.float32),
        grid=(n,),
        in_specs=in_specs,
        out_specs=pl.BlockSpec((1, 16, HEAD_PAD), lambda b: (b, 0, 0)),
        compiler_params=pltpu.CompilerParams(
            dimension_semantics=("parallel",)),
    )(*args)


# ---------------------------------------------------------------------------
# Parameters (kaiming for backbone/spp/pan, normal for head) + one-time packing
# ---------------------------------------------------------------------------
def make_params(key, num_classes=2, num_anchors=3):
    ks = jax.random.split(key, 7)
    head_out = num_anchors * (5 + num_classes)

    def kaiming(k, kh, kw, ci, co):
        std = math.sqrt(2.0 / (kh * kw * ci))
        return std * jax.random.normal(k, (kh, kw, ci, co), jnp.float32)

    def normal(k, kh, kw, ci, co, std=0.01):
        return std * jax.random.normal(k, (kh, kw, ci, co), jnp.float32)

    z = lambda c: jnp.zeros((c,), jnp.float32)
    return {
        "b1":      (kaiming(ks[0], 3, 3, 3, 16),        z(16)),
        "b2":      (kaiming(ks[1], 3, 3, 16, 32),       z(32)),
        "b3":      (kaiming(ks[2], 3, 3, 32, 64),       z(64)),
        "spp_in":  (kaiming(ks[3], 1, 1, 64, 32),       z(32)),
        "spp_out": (kaiming(ks[4], 1, 1, 128, 64),      z(64)),
        "pan":     (kaiming(ks[5], 3, 3, 64, 64),       z(64)),
        "head":    (normal(ks[6], 1, 1, 64, head_out),  z(head_out)),
    }


def pack_params(p):
    """One-time weight prep: tap-major bf16 weights, pre-summed SPP branches,
    constant tap-selection matrices, lane-dense head weight."""
    bf = jnp.bfloat16

    def tapw(w):                                   # (3,3,ci,co) -> (9,ci,co)
        kh, kw, ci, co = w.shape
        return w.reshape(kh * kw, ci, co).astype(bf)

    def bias(b, width=None):
        width = b.shape[0] if width is None else width
        return jnp.zeros((1, width), jnp.float32).at[0, :b.shape[0]].set(b)

    w1 = jnp.pad(p["b1"][0].reshape(27, 16), ((0, 5), (0, 0))).astype(bf)
    wso = p["spp_out"][0].reshape(128, 64)
    whd = jnp.pad(p["head"][0].reshape(64, HEAD_OUT),
                  ((0, 0), (0, HEAD_PAD - HEAD_OUT))).astype(bf)

    return {
        "w1": w1, "b1": bias(p["b1"][1]),
        "a2": jnp.asarray(_sel_matrices(16, 16, 8, 8, 2, 1), dtype=bf),
        "w2": tapw(p["b2"][0]), "b2": bias(p["b2"][1]),
        "a3": jnp.asarray(_sel_matrices(8, 8, 4, 4, 2, 1), dtype=bf),
        "w3": tapw(p["b3"][0]), "b3": bias(p["b3"][1]),
        "wsi": p["spp_in"][0].reshape(64, 32).astype(bf),
        "bsi": bias(p["spp_in"][1]),
        "wsot": wso[:32].astype(bf),
        "wsop": wso[32:64].astype(bf),
        "wsog": (wso[64:96] + wso[96:128]).astype(bf),   # p9 + p13 branches
        "bso": bias(p["spp_out"][1]),
        "apan": jnp.asarray(_sel_matrices(4, 4, 4, 4, 1, 1), dtype=bf),
        "wpan": tapw(p["pan"][0]), "bpan": bias(p["pan"][1]),
        "whd": whd, "bhd": bias(p["head"][1], HEAD_PAD),
    }


# ---------------------------------------------------------------------------
# Yolov4.forward: backbone -> spp -> neck(pan) -> head (one fused kernel)
# ---------------------------------------------------------------------------
def yolov4_forward(x_nchw, packed):
    n, c, h, w = x_nchw.shape
    # SPP global-max shortcut + fused tail hard-code the 4x4 feature map.
    assert c == 3 and h == 32 and w == 32, (n, c, h, w)

    # b1 im2col (the only XLA prep): K = 27 real channels padded to 32.
    xh = jnp.transpose(x_nchw, (0, 2, 3, 1))                       # NCHW->NHWC
    xp = jnp.pad(xh, ((0, 0), (1, 1), (1, 1), (0, 0)))
    taps = [xp[:, i:i + h:2, j:j + w:2, :] for i in range(3) for j in range(3)]
    col1 = jnp.concatenate(taps, axis=-1).reshape(n, (h // 2) * (w // 2), 27)
    col1 = jnp.pad(col1, ((0, 0), (0, 0), (0, 5))).astype(jnp.bfloat16)

    out = _fused_forward(col1, packed)                 # (n, 16, 128) f32
    o = out[..., :HEAD_OUT].reshape(n, 4, 4, HEAD_OUT)
    return jnp.transpose(o, (0, 3, 1, 2))              # NHWC->NCHW
    # TODO(synk): multi-scale YOLO heads / decode layers are model-config
    # specific and not part of this generic container's forward.


# ---------------------------------------------------------------------------
# Pure-JAX f32 reference (sanity check; kernel matmuls run in bf16)
# ---------------------------------------------------------------------------
def _conv_ref(x, wb, stride, pad):
    w, b = wb
    out = jax.lax.conv_general_dilated(
        x, w, window_strides=(stride, stride),
        padding=((pad, pad), (pad, pad)),
        dimension_numbers=("NHWC", "HWIO", "NHWC"))
    return out + b


def _leaky_ref(x):
    return jnp.where(x > 0, x, LEAKY * x)


def _pool_ref(x, k):
    p = k // 2
    return jax.lax.reduce_window(
        x, -jnp.inf, jax.lax.max, window_dimensions=(1, k, k, 1),
        window_strides=(1, 1, 1, 1),
        padding=((0, 0), (p, p), (p, p), (0, 0)))


def yolov4_reference(x_nchw, p):
    x = jnp.transpose(x_nchw, (0, 2, 3, 1))
    x = _leaky_ref(_conv_ref(x, p["b1"], 2, 1))
    x = _leaky_ref(_conv_ref(x, p["b2"], 2, 1))
    x = _leaky_ref(_conv_ref(x, p["b3"], 2, 1))
    t = _leaky_ref(_conv_ref(x, p["spp_in"], 1, 0))
    cat = jnp.concatenate(
        [t, _pool_ref(t, 5), _pool_ref(t, 9), _pool_ref(t, 13)], axis=-1)
    u = _leaky_ref(_conv_ref(cat, p["spp_out"], 1, 0))
    v = _leaky_ref(_conv_ref(u, p["pan"], 1, 1))
    o = _conv_ref(v, p["head"], 1, 0)
    return jnp.transpose(o, (0, 3, 1, 2))


if __name__ == "__main__":
    key = jax.random.PRNGKey(0)
    k_in, k_par = jax.random.split(key)
    x = jax.random.normal(k_in, (2, 3, 32, 32), jnp.float32)   # NCHW like torch
    params = make_params(k_par)
    packed = pack_params(params)                               # one-time prep

    out = jax.jit(yolov4_forward)(x, packed)
    out = jax.block_until_ready(out)

    assert out.shape == (2, HEAD_OUT, 4, 4), out.shape
    assert bool(jnp.all(jnp.isfinite(out)))

    # sanity check vs f32 reference (kernel matmuls run in bf16)
    ref = jax.jit(yolov4_reference)(x, params)
    rel = float(jnp.linalg.norm(out - ref) / (jnp.linalg.norm(ref) + 1e-8))
    assert rel < 0.1, rel

    print("KERNEL_OK")
</pallas_src>

<mosaic_0001>
module attributes {stable_mosaic.version = 11 : i64} {
  func.func @_yolo_kernel(%arg0: i32, %arg1: memref<1x256x32xbf16, #tpu.memory_space<vmem>>, %arg2: memref<32x16xbf16, #tpu.memory_space<vmem>>, %arg3: memref<1x16xf32, #tpu.memory_space<vmem>>, %arg4: memref<9x64x256xbf16, #tpu.memory_space<vmem>>, %arg5: memref<9x16x32xbf16, #tpu.memory_space<vmem>>, %arg6: memref<1x32xf32, #tpu.memory_space<vmem>>, %arg7: memref<9x16x64xbf16, #tpu.memory_space<vmem>>, %arg8: memref<9x32x64xbf16, #tpu.memory_space<vmem>>, %arg9: memref<1x64xf32, #tpu.memory_space<vmem>>, %arg10: memref<64x32xbf16, #tpu.memory_space<vmem>>, %arg11: memref<1x32xf32, #tpu.memory_space<vmem>>, %arg12: memref<32x64xbf16, #tpu.memory_space<vmem>>, %arg13: memref<32x64xbf16, #tpu.memory_space<vmem>>, %arg14: memref<32x64xbf16, #tpu.memory_space<vmem>>, %arg15: memref<1x64xf32, #tpu.memory_space<vmem>>, %arg16: memref<9x16x16xbf16, #tpu.memory_space<vmem>>, %arg17: memref<9x64x64xbf16, #tpu.memory_space<vmem>>, %arg18: memref<1x64xf32, #tpu.memory_space<vmem>>, %arg19: memref<64x128xbf16, #tpu.memory_space<vmem>>, %arg20: memref<1x128xf32, #tpu.memory_space<vmem>>, %arg21: memref<1x16x128xf32, #tpu.memory_space<vmem>>) attributes {dimension_semantics = [#tpu.dimension_semantics<parallel>], iteration_bounds = array<i64: 2>, scalar_prefetch = 0 : i64, scratch_operands = 0 : i64, tpu.core_type = #tpu.core_type<tc>, window_params = [{transform_indices = @transform_0, window_bounds = array<i64: 1, 256, 32>}, {pipeline_mode = #tpu.pipeline_mode<synchronous>, transform_indices = @transform_1, window_bounds = array<i64: 32, 16>}, {pipeline_mode = #tpu.pipeline_mode<synchronous>, transform_indices = @transform_2, window_bounds = array<i64: 1, 16>}, {pipeline_mode = #tpu.pipeline_mode<synchronous>, transform_indices = @transform_3, window_bounds = array<i64: 9, 64, 256>}, {pipeline_mode = #tpu.pipeline_mode<synchronous>, transform_indices = @transform_4, window_bounds = array<i64: 9, 16, 32>}, {pipeline_mode = #tpu.pipeline_mode<synchronous>, transform_indices = @transform_5, window_bounds = array<i64: 1, 32>}, {pipeline_mode = #tpu.pipeline_mode<synchronous>, transform_indices = @transform_6, window_bounds = array<i64: 9, 16, 64>}, {pipeline_mode = #tpu.pipeline_mode<synchronous>, transform_indices = @transform_7, window_bounds = array<i64: 9, 32, 64>}, {pipeline_mode = #tpu.pipeline_mode<synchronous>, transform_indices = @transform_8, window_bounds = array<i64: 1, 64>}, {pipeline_mode = #tpu.pipeline_mode<synchronous>, transform_indices = @transform_9, window_bounds = array<i64: 64, 32>}, {pipeline_mode = #tpu.pipeline_mode<synchronous>, transform_indices = @transform_10, window_bounds = array<i64: 1, 32>}, {pipeline_mode = #tpu.pipeline_mode<synchronous>, transform_indices = @transform_11, window_bounds = array<i64: 32, 64>}, {pipeline_mode = #tpu.pipeline_mode<synchronous>, transform_indices = @transform_12, window_bounds = array<i64: 32, 64>}, {pipeline_mode = #tpu.pipeline_mode<synchronous>, transform_indices = @transform_13, window_bounds = array<i64: 32, 64>}, {pipeline_mode = #tpu.pipeline_mode<synchronous>, transform_indices = @transform_14, window_bounds = array<i64: 1, 64>}, {pipeline_mode = #tpu.pipeline_mode<synchronous>, transform_indices = @transform_15, window_bounds = array<i64: 9, 16, 16>}, {pipeline_mode = #tpu.pipeline_mode<synchronous>, transform_indices = @transform_16, window_bounds = array<i64: 9, 64, 64>}, {pipeline_mode = #tpu.pipeline_mode<synchronous>, transform_indices = @transform_17, window_bounds = array<i64: 1, 64>}, {pipeline_mode = #tpu.pipeline_mode<synchronous>, transform_indices = @transform_18, window_bounds = array<i64: 64, 128>}, {pipeline_mode = #tpu.pipeline_mode<synchronous>, transform_indices = @transform_19, window_bounds = array<i64: 1, 128>}, {transform_indices = @transform_20, window_bounds = array<i64: 1, 16, 128>}]} {
    %c0 = arith.constant 0 : index
    %c0_0 = arith.constant 0 : index
    %c0_1 = arith.constant 0 : index
    %0 = vector.load %arg1[%c0, %c0_0, %c0_1] : memref<1x256x32xbf16, #tpu.memory_space<vmem>>, vector<1x256x32xbf16>
    %1 = vector.shape_cast %0 : vector<1x256x32xbf16> to vector<256x32xbf16>
    %c0_2 = arith.constant 0 : index
    %c0_3 = arith.constant 0 : index
    %2 = vector.load %arg2[%c0_2, %c0_3] : memref<32x16xbf16, #tpu.memory_space<vmem>>, vector<32x16xbf16>
    %cst = arith.constant dense<0.000000e+00> : vector<256x16xf32>
    %3 = tpu.matmul %1, %2, %cst {dimension_numbers = #tpu.dot_dimension_numbers<[1], [0], [0], [1], [0, 0, 1, 1], [], []>} : vector<256x32xbf16>, vector<32x16xbf16>, vector<256x16xf32> -> vector<256x16xf32>
    %c0_4 = arith.constant 0 : index
    %c0_5 = arith.constant 0 : index
    %4 = vector.load %arg3[%c0_4, %c0_5] : memref<1x16xf32, #tpu.memory_space<vmem>>, vector<1x16xf32>
    %5 = vector.broadcast %4 : vector<1x16xf32> to vector<256x16xf32>
    %6 = arith.addf %3, %5 : vector<256x16xf32>
    %cst_6 = arith.constant 1.000000e-01 : f32
    %7 = vector.broadcast %cst_6 : f32 to vector<256x16xf32>
    %8 = arith.mulf %7, %6 : vector<256x16xf32>
    %9 = arith.maximumf %6, %8 : vector<256x16xf32>
    %10 = arith.truncf %9 : vector<256x16xf32> to vector<256x16xbf16>
    %c0_7 = arith.constant 0 : index
    %c0_8 = arith.constant 0 : index
    %11 = vector.load %arg6[%c0_7, %c0_8] : memref<1x32xf32, #tpu.memory_space<vmem>>, vector<1x32xf32>
    %12 = vector.shape_cast %11 : vector<1x32xf32> to vector<1x32xf32>
    %13 = vector.broadcast %12 : vector<1x32xf32> to vector<64x32xf32>
    %c0_9 = arith.constant 0 : index
    %c0_10 = arith.constant 0 : index
    %c0_11 = arith.constant 0 : index
    %14 = vector.load %arg4[%c0_9, %c0_10, %c0_11] : memref<9x64x256xbf16, #tpu.memory_space<vmem>>, vector<1x64x256xbf16>
    %15 = vector.shape_cast %14 : vector<1x64x256xbf16> to vector<64x256xbf16>
    %cst_12 = arith.constant dense<0.000000e+00> : vector<64x16xf32>
    %16 = tpu.matmul %15, %10, %cst_12 {dimension_numbers = #tpu.dot_dimension_numbers<[1], [0], [0], [1], [0, 0, 1, 1], [], []>} : vector<64x256xbf16>, vector<256x16xbf16>, vector<64x16xf32> -> vector<64x16xf32>
    %17 = arith.truncf %16 : vector<64x16xf32> to vector<64x16xbf16>
    %c0_13 = arith.constant 0 : index
    %c0_14 = arith.constant 0 : index
    %c0_15 = arith.constant 0 : index
    %18 = vector.load %arg5[%c0_13, %c0_14, %c0_15] : memref<9x16x32xbf16, #tpu.memory_space<vmem>>, vector<1x16x32xbf16>
    %19 = vector.shape_cast %18 : vector<1x16x32xbf16> to vector<16x32xbf16>
    %cst_16 = arith.constant dense<0.000000e+00> : vector<64x32xf32>
    %20 = tpu.matmul %17, %19, %cst_16 {dimension_numbers = #tpu.dot_dimension_numbers<[1], [0], [0], [1], [0, 0, 1, 1], [], []>} : vector<64x16xbf16>, vector<16x32xbf16>, vector<64x32xf32> -> vector<64x32xf32>
    %21 = arith.addf %13, %20 : vector<64x32xf32>
    %c1 = arith.constant 1 : index
    %c0_17 = arith.constant 0 : index
    %c0_18 = arith.constant 0 : index
    %22 = vector.load %arg4[%c1, %c0_17, %c0_18] : memref<9x64x256xbf16, #tpu.memory_space<vmem>>, vector<1x64x256xbf16>
    %23 = vector.shape_cast %22 : vector<1x64x256xbf16> to vector<64x256xbf16>
    %cst_19 = arith.constant dense<0.000000e+00> : vector<64x16xf32>
    %24 = tpu.matmul %23, %10, %cst_19 {dimension_numbers = #tpu.dot_dimension_numbers<[1], [0], [0], [1], [0, 0, 1, 1], [], []>} : vector<64x256xbf16>, vector<256x16xbf16>, vector<64x16xf32> -> vector<64x16xf32>
    %25 = arith.truncf %24 : vector<64x16xf32> to vector<64x16xbf16>
    %c1_20 = arith.constant 1 : index
    %c0_21 = arith.constant 0 : index
    %c0_22 = arith.constant 0 : index
    %26 = vector.load %arg5[%c1_20, %c0_21, %c0_22] : memref<9x16x32xbf16, #tpu.memory_space<vmem>>, vector<1x16x32xbf16>
    %27 = vector.shape_cast %26 : vector<1x16x32xbf16> to vector<16x32xbf16>
    %cst_23 = arith.constant dense<0.000000e+00> : vector<64x32xf32>
    %28 = tpu.matmul %25, %27, %cst_23 {dimension_numbers = #tpu.dot_dimension_numbers<[1], [0], [0], [1], [0, 0, 1, 1], [], []>} : vector<64x16xbf16>, vector<16x32xbf16>, vector<64x32xf32> -> vector<64x32xf32>
    %29 = arith.addf %21, %28 : vector<64x32xf32>
    %c2 = arith.constant 2 : index
    %c0_24 = arith.constant 0 : index
    %c0_25 = arith.constant 0 : index
    %30 = vector.load %arg4[%c2, %c0_24, %c0_25] : memref<9x64x256xbf16, #tpu.memory_space<vmem>>, vector<1x64x256xbf16>
    %31 = vector.shape_cast %30 : vector<1x64x256xbf16> to vector<64x256xbf16>
    %cst_26 = arith.constant dense<0.000000e+00> : vector<64x16xf32>
    %32 = tpu.matmul %31, %10, %cst_26 {dimension_numbers = #tpu.dot_dimension_numbers<[1], [0], [0], [1], [0, 0, 1, 1], [], []>} : vector<64x256xbf16>, vector<256x16xbf16>, vector<64x16xf32> -> vector<64x16xf32>
    %33 = arith.truncf %32 : vector<64x16xf32> to vector<64x16xbf16>
    %c2_27 = arith.constant 2 : index
    %c0_28 = arith.constant 0 : index
    %c0_29 = arith.constant 0 : index
    %34 = vector.load %arg5[%c2_27, %c0_28, %c0_29] : memref<9x16x32xbf16, #tpu.memory_space<vmem>>, vector<1x16x32xbf16>
    %35 = vector.shape_cast %34 : vector<1x16x32xbf16> to vector<16x32xbf16>
    %cst_30 = arith.constant dense<0.000000e+00> : vector<64x32xf32>
    %36 = tpu.matmul %33, %35, %cst_30 {dimension_numbers = #tpu.dot_dimension_numbers<[1], [0], [0], [1], [0, 0, 1, 1], [], []>} : vector<64x16xbf16>, vector<16x32xbf16>, vector<64x32xf32> -> vector<64x32xf32>
    %37 = arith.addf %29, %36 : vector<64x32xf32>
    %c3 = arith.constant 3 : index
    %c0_31 = arith.constant 0 : index
    %c0_32 = arith.constant 0 : index
    %38 = vector.load %arg4[%c3, %c0_31, %c0_32] : memref<9x64x256xbf16, #tpu.memory_space<vmem>>, vector<1x64x256xbf16>
    %39 = vector.shape_cast %38 : vector<1x64x256xbf16> to vector<64x256xbf16>
    %cst_33 = arith.constant dense<0.000000e+00> : vector<64x16xf32>
    %40 = tpu.matmul %39, %10, %cst_33 {dimension_numbers = #tpu.dot_dimension_numbers<[1], [0], [0], [1], [0, 0, 1, 1], [], []>} : vector<64x256xbf16>, vector<256x16xbf16>, vector<64x16xf32> -> vector<64x16xf32>
    %41 = arith.truncf %40 : vector<64x16xf32> to vector<64x16xbf16>
    %c3_34 = arith.constant 3 : index
    %c0_35 = arith.constant 0 : index
    %c0_36 = arith.constant 0 : index
    %42 = vector.load %arg5[%c3_34, %c0_35, %c0_36] : memref<9x16x32xbf16, #tpu.memory_space<vmem>>, vector<1x16x32xbf16>
    %43 = vector.shape_cast %42 : vector<1x16x32xbf16> to vector<16x32xbf16>
    %cst_37 = arith.constant dense<0.000000e+00> : vector<64x32xf32>
    %44 = tpu.matmul %41, %43, %cst_37 {dimension_numbers = #tpu.dot_dimension_numbers<[1], [0], [0], [1], [0, 0, 1, 1], [], []>} : vector<64x16xbf16>, vector<16x32xbf16>, vector<64x32xf32> -> vector<64x32xf32>
    %45 = arith.addf %37, %44 : vector<64x32xf32>
    %c4 = arith.constant 4 : index
    %c0_38 = arith.constant 0 : index
    %c0_39 = arith.constant 0 : index
    %46 = vector.load %arg4[%c4, %c0_38, %c0_39] : memref<9x64x256xbf16, #tpu.memory_space<vmem>>, vector<1x64x256xbf16>
    %47 = vector.shape_cast %46 : vector<1x64x256xbf16> to vector<64x256xbf16>
    %cst_40 = arith.constant dense<0.000000e+00> : vector<64x16xf32>
    %48 = tpu.matmul %47, %10, %cst_40 {dimension_numbers = #tpu.dot_dimension_numbers<[1], [0], [0], [1], [0, 0, 1, 1], [], []>} : vector<64x256xbf16>, vector<256x16xbf16>, vector<64x16xf32> -> vector<64x16xf32>
    %49 = arith.truncf %48 : vector<64x16xf32> to vector<64x16xbf16>
    %c4_41 = arith.constant 4 : index
    %c0_42 = arith.constant 0 : index
    %c0_43 = arith.constant 0 : index
    %50 = vector.load %arg5[%c4_41, %c0_42, %c0_43] : memref<9x16x32xbf16, #tpu.memory_space<vmem>>, vector<1x16x32xbf16>
    %51 = vector.shape_cast %50 : vector<1x16x32xbf16> to vector<16x32xbf16>
    %cst_44 = arith.constant dense<0.000000e+00> : vector<64x32xf32>
    %52 = tpu.matmul %49, %51, %cst_44 {dimension_numbers = #tpu.dot_dimension_numbers<[1], [0], [0], [1], [0, 0, 1, 1], [], []>} : vector<64x16xbf16>, vector<16x32xbf16>, vector<64x32xf32> -> vector<64x32xf32>
    %53 = arith.addf %45, %52 : vector<64x32xf32>
    %c5 = arith.constant 5 : index
    %c0_45 = arith.constant 0 : index
    %c0_46 = arith.constant 0 : index
    %54 = vector.load %arg4[%c5, %c0_45, %c0_46] : memref<9x64x256xbf16, #tpu.memory_space<vmem>>, vector<1x64x256xbf16>
    %55 = vector.shape_cast %54 : vector<1x64x256xbf16> to vector<64x256xbf16>
    %cst_47 = arith.constant dense<0.000000e+00> : vector<64x16xf32>
    %56 = tpu.matmul %55, %10, %cst_47 {dimension_numbers = #tpu.dot_dimension_numbers<[1], [0], [0], [1], [0, 0, 1, 1], [], []>} : vector<64x256xbf16>, vector<256x16xbf16>, vector<64x16xf32> -> vector<64x16xf32>
    %57 = arith.truncf %56 : vector<64x16xf32> to vector<64x16xbf16>
    %c5_48 = arith.constant 5 : index
    %c0_49 = arith.constant 0 : index
    %c0_50 = arith.constant 0 : index
    %58 = vector.load %arg5[%c5_48, %c0_49, %c0_50] : memref<9x16x32xbf16, #tpu.memory_space<vmem>>, vector<1x16x32xbf16>
    %59 = vector.shape_cast %58 : vector<1x16x32xbf16> to vector<16x32xbf16>
    %cst_51 = arith.constant dense<0.000000e+00> : vector<64x32xf32>
    %60 = tpu.matmul %57, %59, %cst_51 {dimension_numbers = #tpu.dot_dimension_numbers<[1], [0], [0], [1], [0, 0, 1, 1], [], []>} : vector<64x16xbf16>, vector<16x32xbf16>, vector<64x32xf32> -> vector<64x32xf32>
    %61 = arith.addf %53, %60 : vector<64x32xf32>
    %c6 = arith.constant 6 : index
    %c0_52 = arith.constant 0 : index
    %c0_53 = arith.constant 0 : index
    %62 = vector.load %arg4[%c6, %c0_52, %c0_53] : memref<9x64x256xbf16, #tpu.memory_space<vmem>>, vector<1x64x256xbf16>
    %63 = vector.shape_cast %62 : vector<1x64x256xbf16> to vector<64x256xbf16>
    %cst_54 = arith.constant dense<0.000000e+00> : vector<64x16xf32>
    %64 = tpu.matmul %63, %10, %cst_54 {dimension_numbers = #tpu.dot_dimension_numbers<[1], [0], [0], [1], [0, 0, 1, 1], [], []>} : vector<64x256xbf16>, vector<256x16xbf16>, vector<64x16xf32> -> vector<64x16xf32>
    %65 = arith.truncf %64 : vector<64x16xf32> to vector<64x16xbf16>
    %c6_55 = arith.constant 6 : index
    %c0_56 = arith.constant 0 : index
    %c0_57 = arith.constant 0 : index
    %66 = vector.load %arg5[%c6_55, %c0_56, %c0_57] : memref<9x16x32xbf16, #tpu.memory_space<vmem>>, vector<1x16x32xbf16>
    %67 = vector.shape_cast %66 : vector<1x16x32xbf16> to vector<16x32xbf16>
    %cst_58 = arith.constant dense<0.000000e+00> : vector<64x32xf32>
    %68 = tpu.matmul %65, %67, %cst_58 {dimension_numbers = #tpu.dot_dimension_numbers<[1], [0], [0], [1], [0, 0, 1, 1], [], []>} : vector<64x16xbf16>, vector<16x32xbf16>, vector<64x32xf32> -> vector<64x32xf32>
    %69 = arith.addf %61, %68 : vector<64x32xf32>
    %c7 = arith.constant 7 : index
    %c0_59 = arith.constant 0 : index
    %c0_60 = arith.constant 0 : index
    %70 = vector.load %arg4[%c7, %c0_59, %c0_60] : memref<9x64x256xbf16, #tpu.memory_space<vmem>>, vector<1x64x256xbf16>
    %71 = vector.shape_cast %70 : vector<1x64x256xbf16> to vector<64x256xbf16>
    %cst_61 = arith.constant dense<0.000000e+00> : vector<64x16xf32>
    %72 = tpu.matmul %71, %10, %cst_61 {dimension_numbers = #tpu.dot_dimension_numbers<[1], [0], [0], [1], [0, 0, 1, 1], [], []>} : vector<64x256xbf16>, vector<256x16xbf16>, vector<64x16xf32> -> vector<64x16xf32>
    %73 = arith.truncf %72 : vector<64x16xf32> to vector<64x16xbf16>
    %c7_62 = arith.constant 7 : index
    %c0_63 = arith.constant 0 : index
    %c0_64 = arith.constant 0 : index
    %74 = vector.load %arg5[%c7_62, %c0_63, %c0_64] : memref<9x16x32xbf16, #tpu.memory_space<vmem>>, vector<1x16x32xbf16>
    %75 = vector.shape_cast %74 : vector<1x16x32xbf16> to vector<16x32xbf16>
    %cst_65 = arith.constant dense<0.000000e+00> : vector<64x32xf32>
    %76 = tpu.matmul %73, %75, %cst_65 {dimension_numbers = #tpu.dot_dimension_numbers<[1], [0], [0], [1], [0, 0, 1, 1], [], []>} : vector<64x16xbf16>, vector<16x32xbf16>, vector<64x32xf32> -> vector<64x32xf32>
    %77 = arith.addf %69, %76 : vector<64x32xf32>
    %c8 = arith.constant 8 : index
    %c0_66 = arith.constant 0 : index
    %c0_67 = arith.constant 0 : index
    %78 = vector.load %arg4[%c8, %c0_66, %c0_67] : memref<9x64x256xbf16, #tpu.memory_space<vmem>>, vector<1x64x256xbf16>
    %79 = vector.shape_cast %78 : vector<1x64x256xbf16> to vector<64x256xbf16>
    %cst_68 = arith.constant dense<0.000000e+00> : vector<64x16xf32>
    %80 = tpu.matmul %79, %10, %cst_68 {dimension_numbers = #tpu.dot_dimension_numbers<[1], [0], [0], [1], [0, 0, 1, 1], [], []>} : vector<64x256xbf16>, vector<256x16xbf16>, vector<64x16xf32> -> vector<64x16xf32>
    %81 = arith.truncf %80 : vector<64x16xf32> to vector<64x16xbf16>
    %c8_69 = arith.constant 8 : index
    %c0_70 = arith.constant 0 : index
    %c0_71 = arith.constant 0 : index
    %82 = vector.load %arg5[%c8_69, %c0_70, %c0_71] : memref<9x16x32xbf16, #tpu.memory_space<vmem>>, vector<1x16x32xbf16>
    %83 = vector.shape_cast %82 : vector<1x16x32xbf16> to vector<16x32xbf16>
    %cst_72 = arith.constant dense<0.000000e+00> : vector<64x32xf32>
    %84 = tpu.matmul %81, %83, %cst_72 {dimension_numbers = #tpu.dot_dimension_numbers<[1], [0], [0], [1], [0, 0, 1, 1], [], []>} : vector<64x16xbf16>, vector<16x32xbf16>, vector<64x32xf32> -> vector<64x32xf32>
    %85 = arith.addf %77, %84 : vector<64x32xf32>
    %cst_73 = arith.constant 1.000000e-01 : f32
    %86 = vector.broadcast %cst_73 : f32 to vector<64x32xf32>
    %87 = arith.mulf %86, %85 : vector<64x32xf32>
    %88 = arith.maximumf %85, %87 : vector<64x32xf32>
    %89 = arith.truncf %88 : vector<64x32xf32> to vector<64x32xbf16>
    %c0_74 = arith.constant 0 : index
    %c0_75 = arith.constant 0 : index
    %90 = vector.load %arg9[%c0_74, %c0_75] : memref<1x64xf32, #tpu.memory_space<vmem>>, vector<1x64xf32>
    %91 = vector.shape_cast %90 : vector<1x64xf32> to vector<1x64xf32>
    %92 = vector.broadcast %91 : vector<1x64xf32> to vector<16x64xf32>
    %c0_76 = arith.constant 0 : index
    %c0_77 = arith.constant 0 : index
    %c0_78 = arith.constant 0 : index
    %93 = vector.load %arg7[%c0_76, %c0_77, %c0_78] : memref<9x16x64xbf16, #tpu.memory_space<vmem>>, vector<1x16x64xbf16>
    %94 = vector.shape_cast %93 : vector<1x16x64xbf16> to vector<16x64xbf16>
    %cst_79 = arith.constant dense<0.000000e+00> : vector<16x32xf32>
    %95 = tpu.matmul %94, %89, %cst_79 {dimension_numbers = #tpu.dot_dimension_numbers<[1], [0], [0], [1], [0, 0, 1, 1], [], []>} : vector<16x64xbf16>, vector<64x32xbf16>, vector<16x32xf32> -> vector<16x32xf32>
    %96 = arith.truncf %95 : vector<16x32xf32> to vector<16x32xbf16>
    %c0_80 = arith.constant 0 : index
    %c0_81 = arith.constant 0 : index
    %c0_82 = arith.constant 0 : index
    %97 = vector.load %arg8[%c0_80, %c0_81, %c0_82] : memref<9x32x64xbf16, #tpu.memory_space<vmem>>, vector<1x32x64xbf16>
    %98 = vector.shape_cast %97 : vector<1x32x64xbf16> to vector<32x64xbf16>
    %cst_83 = arith.constant dense<0.000000e+00> : vector<16x64xf32>
    %99 = tpu.matmul %96, %98, %cst_83 {dimension_numbers = #tpu.dot_dimension_numbers<[1], [0], [0], [1], [0, 0, 1, 1], [], []>} : vector<16x32xbf16>, vector<32x64xbf16>, vector<16x64xf32> -> vector<16x64xf32>
    %100 = arith.addf %92, %99 : vector<16x64xf32>
    %c1_84 = arith.constant 1 : index
    %c0_85 = arith.constant 0 : index
    %c0_86 = arith.constant 0 : index
    %101 = vector.load %arg7[%c1_84, %c0_85, %c0_86] : memref<9x16x64xbf16, #tpu.memory_space<vmem>>, vector<1x16x64xbf16>
    %102 = vector.shape_cast %101 : vector<1x16x64xbf16> to vector<16x64xbf16>
    %cst_87 = arith.constant dense<0.000000e+00> : vector<16x32xf32>
    %103 = tpu.matmul %102, %89, %cst_87 {dimension_numbers = #tpu.dot_dimension_numbers<[1], [0], [0], [1], [0, 0, 1, 1], [], []>} : vector<16x64xbf16>, vector<64x32xbf16>, vector<16x32xf32> -> vector<16x32xf32>
    %104 = arith.truncf %103 : vector<16x32xf32> to vector<16x32xbf16>
    %c1_88 = arith.constant 1 : index
    %c0_89 = arith.constant 0 : index
    %c0_90 = arith.constant 0 : index
    %105 = vector.load %arg8[%c1_88, %c0_89, %c0_90] : memref<9x32x64xbf16, #tpu.memory_space<vmem>>, vector<1x32x64xbf16>
    %106 = vector.shape_cast %105 : vector<1x32x64xbf16> to vector<32x64xbf16>
    %cst_91 = arith.constant dense<0.000000e+00> : vector<16x64xf32>
    %107 = tpu.matmul %104, %106, %cst_91 {dimension_numbers = #tpu.dot_dimension_numbers<[1], [0], [0], [1], [0, 0, 1, 1], [], []>} : vector<16x32xbf16>, vector<32x64xbf16>, vector<16x64xf32> -> vector<16x64xf32>
    %108 = arith.addf %100, %107 : vector<16x64xf32>
    %c2_92 = arith.constant 2 : index
    %c0_93 = arith.constant 0 : index
    %c0_94 = arith.constant 0 : index
    %109 = vector.load %arg7[%c2_92, %c0_93, %c0_94] : memref<9x16x64xbf16, #tpu.memory_space<vmem>>, vector<1x16x64xbf16>
    %110 = vector.shape_cast %109 : vector<1x16x64xbf16> to vector<16x64xbf16>
    %cst_95 = arith.constant dense<0.000000e+00> : vector<16x32xf32>
    %111 = tpu.matmul %110, %89, %cst_95 {dimension_numbers = #tpu.dot_dimension_numbers<[1], [0], [0], [1], [0, 0, 1, 1], [], []>} : vector<16x64xbf16>, vector<64x32xbf16>, vector<16x32xf32> -> vector<16x32xf32>
    %112 = arith.truncf %111 : vector<16x32xf32> to vector<16x32xbf16>
    %c2_96 = arith.constant 2 : index
    %c0_97 = arith.constant 0 : index
    %c0_98 = arith.constant 0 : index
    %113 = vector.load %arg8[%c2_96, %c0_97, %c0_98] : memref<9x32x64xbf16, #tpu.memory_space<vmem>>, vector<1x32x64xbf16>
    %114 = vector.shape_cast %113 : vector<1x32x64xbf16> to vector<32x64xbf16>
    %cst_99 = arith.constant dense<0.000000e+00> : vector<16x64xf32>
    %115 = tpu.matmul %112, %114, %cst_99 {dimension_numbers = #tpu.dot_dimension_numbers<[1], [0], [0], [1], [0, 0, 1, 1], [], []>} : vector<16x32xbf16>, vector<32x64xbf16>, vector<16x64xf32> -> vector<16x64xf32>
    %116 = arith.addf %108, %115 : vector<16x64xf32>
    %c3_100 = arith.constant 3 : index
    %c0_101 = arith.constant 0 : index
    %c0_102 = arith.constant 0 : index
    %117 = vector.load %arg7[%c3_100, %c0_101, %c0_102] : memref<9x16x64xbf16, #tpu.memory_space<vmem>>, vector<1x16x64xbf16>
    %118 = vector.shape_cast %117 : vector<1x16x64xbf16> to vector<16x64xbf16>
    %cst_103 = arith.constant dense<0.000000e+00> : vector<16x32xf32>
    %119 = tpu.matmul %118, %89, %cst_103 {dimension_numbers = #tpu.dot_dimension_numbers<[1], [0], [0], [1], [0, 0, 1, 1], [], []>} : vector<16x64xbf16>, vector<64x32xbf16>, vector<16x32xf32> -> vector<16x32xf32>
    %120 = arith.truncf %119 : vector<16x32xf32> to vector<16x32xbf16>
    %c3_104 = arith.constant 3 : index
    %c0_105 = arith.constant 0 : index
    %c0_106 = arith.constant 0 : index
    %121 = vector.load %arg8[%c3_104, %c0_105, %c0_106] : memref<9x32x64xbf16, #tpu.memory_space<vmem>>, vector<1x32x64xbf16>
    %122 = vector.shape_cast %121 : vector<1x32x64xbf16> to vector<32x64xbf16>
    %cst_107 = arith.constant dense<0.000000e+00> : vector<16x64xf32>
    %123 = tpu.matmul %120, %122, %cst_107 {dimension_numbers = #tpu.dot_dimension_numbers<[1], [0], [0], [1], [0, 0, 1, 1], [], []>} : vector<16x32xbf16>, vector<32x64xbf16>, vector<16x64xf32> -> vector<16x64xf32>
    %124 = arith.addf %116, %123 : vector<16x64xf32>
    %c4_108 = arith.constant 4 : index
    %c0_109 = arith.constant 0 : index
    %c0_110 = arith.constant 0 : index
    %125 = vector.load %arg7[%c4_108, %c0_109, %c0_110] : memref<9x16x64xbf16, #tpu.memory_space<vmem>>, vector<1x16x64xbf16>
    %126 = vector.shape_cast %125 : vector<1x16x64xbf16> to vector<16x64xbf16>
    %cst_111 = arith.constant dense<0.000000e+00> : vector<16x32xf32>
    %127 = tpu.matmul %126, %89, %cst_111 {dimension_numbers = #tpu.dot_dimension_numbers<[1], [0], [0], [1], [0, 0, 1, 1], [], []>} : vector<16x64xbf16>, vector<64x32xbf16>, vector<16x32xf32> -> vector<16x32xf32>
    %128 = arith.truncf %127 : vector<16x32xf32> to vector<16x32xbf16>
    %c4_112 = arith.constant 4 : index
    %c0_113 = arith.constant 0 : index
    %c0_114 = arith.constant 0 : index
    %129 = vector.load %arg8[%c4_112, %c0_113, %c0_114] : memref<9x32x64xbf16, #tpu.memory_space<vmem>>, vector<1x32x64xbf16>
    %130 = vector.shape_cast %129 : vector<1x32x64xbf16> to vector<32x64xbf16>
    %cst_115 = arith.constant dense<0.000000e+00> : vector<16x64xf32>
    %131 = tpu.matmul %128, %130, %cst_115 {dimension_numbers = #tpu.dot_dimension_numbers<[1], [0], [0], [1], [0, 0, 1, 1], [], []>} : vector<16x32xbf16>, vector<32x64xbf16>, vector<16x64xf32> -> vector<16x64xf32>
    %132 = arith.addf %124, %131 : vector<16x64xf32>
    %c5_116 = arith.constant 5 : index
    %c0_117 = arith.constant 0 : index
    %c0_118 = arith.constant 0 : index
    %133 = vector.load %arg7[%c5_116, %c0_117, %c0_118] : memref<9x16x64xbf16, #tpu.memory_space<vmem>>, vector<1x16x64xbf16>
    %134 = vector.shape_cast %133 : vector<1x16x64xbf16> to vector<16x64xbf16>
    %cst_119 = arith.constant dense<0.000000e+00> : vector<16x32xf32>
    %135 = tpu.matmul %134, %89, %cst_119 {dimension_numbers = #tpu.dot_dimension_numbers<[1], [0], [0], [1], [0, 0, 1, 1], [], []>} : vector<16x64xbf16>, vector<64x32xbf16>, vector<16x32xf32> -> vector<16x32xf32>
    %136 = arith.truncf %135 : vector<16x32xf32> to vector<16x32xbf16>
    %c5_120 = arith.constant 5 : index
    %c0_121 = arith.constant 0 : index
    %c0_122 = arith.constant 0 : index
    %137 = vector.load %arg8[%c5_120, %c0_121, %c0_122] : memref<9x32x64xbf16, #tpu.memory_space<vmem>>, vector<1x32x64xbf16>
    %138 = vector.shape_cast %137 : vector<1x32x64xbf16> to vector<32x64xbf16>
    %cst_123 = arith.constant dense<0.000000e+00> : vector<16x64xf32>
    %139 = tpu.matmul %136, %138, %cst_123 {dimension_numbers = #tpu.dot_dimension_numbers<[1], [0], [0], [1], [0, 0, 1, 1], [], []>} : vector<16x32xbf16>, vector<32x64xbf16>, vector<16x64xf32> -> vector<16x64xf32>
    %140 = arith.addf %132, %139 : vector<16x64xf32>
    %c6_124 = arith.constant 6 : index
    %c0_125 = arith.constant 0 : index
    %c0_126 = arith.constant 0 : index
    %141 = vector.load %arg7[%c6_124, %c0_125, %c0_126] : memref<9x16x64xbf16, #tpu.memory_space<vmem>>, vector<1x16x64xbf16>
    %142 = vector.shape_cast %141 : vector<1x16x64xbf16> to vector<16x64xbf16>
    %cst_127 = arith.constant dense<0.000000e+00> : vector<16x32xf32>
    %143 = tpu.matmul %142, %89, %cst_127 {dimension_numbers = #tpu.dot_dimension_numbers<[1], [0], [0], [1], [0, 0, 1, 1], [], []>} : vector<16x64xbf16>, vector<64x32xbf16>, vector<16x32xf32> -> vector<16x32xf32>
    %144 = arith.truncf %143 : vector<16x32xf32> to vector<16x32xbf16>
    %c6_128 = arith.constant 6 : index
    %c0_129 = arith.constant 0 : index
    %c0_130 = arith.constant 0 : index
    %145 = vector.load %arg8[%c6_128, %c0_129, %c0_130] : memref<9x32x64xbf16, #tpu.memory_space<vmem>>, vector<1x32x64xbf16>
    %146 = vector.shape_cast %145 : vector<1x32x64xbf16> to vector<32x64xbf16>
    %cst_131 = arith.constant dense<0.000000e+00> : vector<16x64xf32>
    %147 = tpu.matmul %144, %146, %cst_131 {dimension_numbers = #tpu.dot_dimension_numbers<[1], [0], [0], [1], [0, 0, 1, 1], [], []>} : vector<16x32xbf16>, vector<32x64xbf16>, vector<16x64xf32> -> vector<16x64xf32>
    %148 = arith.addf %140, %147 : vector<16x64xf32>
    %c7_132 = arith.constant 7 : index
    %c0_133 = arith.constant 0 : index
    %c0_134 = arith.constant 0 : index
    %149 = vector.load %arg7[%c7_132, %c0_133, %c0_134] : memref<9x16x64xbf16, #tpu.memory_space<vmem>>, vector<1x16x64xbf16>
    %150 = vector.shape_cast %149 : vector<1x16x64xbf16> to vector<16x64xbf16>
    %cst_135 = arith.constant dense<0.000000e+00> : vector<16x32xf32>
    %151 = tpu.matmul %150, %89, %cst_135 {dimension_numbers = #tpu.dot_dimension_numbers<[1], [0], [0], [1], [0, 0, 1, 1], [], []>} : vector<16x64xbf16>, vector<64x32xbf16>, vector<16x32xf32> -> vector<16x32xf32>
    %152 = arith.truncf %151 : vector<16x32xf32> to vector<16x32xbf16>
    %c7_136 = arith.constant 7 : index
    %c0_137 = arith.constant 0 : index
    %c0_138 = arith.constant 0 : index
    %153 = vector.load %arg8[%c7_136, %c0_137, %c0_138] : memref<9x32x64xbf16, #tpu.memory_space<vmem>>, vector<1x32x64xbf16>
    %154 = vector.shape_cast %153 : vector<1x32x64xbf16> to vector<32x64xbf16>
    %cst_139 = arith.constant dense<0.000000e+00> : vector<16x64xf32>
    %155 = tpu.matmul %152, %154, %cst_139 {dimension_numbers = #tpu.dot_dimension_numbers<[1], [0], [0], [1], [0, 0, 1, 1], [], []>} : vector<16x32xbf16>, vector<32x64xbf16>, vector<16x64xf32> -> vector<16x64xf32>
    %156 = arith.addf %148, %155 : vector<16x64xf32>
    %c8_140 = arith.constant 8 : index
    %c0_141 = arith.constant 0 : index
    %c0_142 = arith.constant 0 : index
    %157 = vector.load %arg7[%c8_140, %c0_141, %c0_142] : memref<9x16x64xbf16, #tpu.memory_space<vmem>>, vector<1x16x64xbf16>
    %158 = vector.shape_cast %157 : vector<1x16x64xbf16> to vector<16x64xbf16>
    %cst_143 = arith.constant dense<0.000000e+00> : vector<16x32xf32>
    %159 = tpu.matmul %158, %89, %cst_143 {dimension_numbers = #tpu.dot_dimension_numbers<[1], [0], [0], [1], [0, 0, 1, 1], [], []>} : vector<16x64xbf16>, vector<64x32xbf16>, vector<16x32xf32> -> vector<16x32xf32>
    %160 = arith.truncf %159 : vector<16x32xf32> to vector<16x32xbf16>
    %c8_144 = arith.constant 8 : index
    %c0_145 = arith.constant 0 : index
    %c0_146 = arith.constant 0 : index
    %161 = vector.load %arg8[%c8_144, %c0_145, %c0_146] : memref<9x32x64xbf16, #tpu.memory_space<vmem>>, vector<1x32x64xbf16>
    %162 = vector.shape_cast %161 : vector<1x32x64xbf16> to vector<32x64xbf16>
    %cst_147 = arith.constant dense<0.000000e+00> : vector<16x64xf32>
    %163 = tpu.matmul %160, %162, %cst_147 {dimension_numbers = #tpu.dot_dimension_numbers<[1], [0], [0], [1], [0, 0, 1, 1], [], []>} : vector<16x32xbf16>, vector<32x64xbf16>, vector<16x64xf32> -> vector<16x64xf32>
    %164 = arith.addf %156, %163 : vector<16x64xf32>
    %cst_148 = arith.constant 1.000000e-01 : f32
    %165 = vector.broadcast %cst_148 : f32 to vector<16x64xf32>
    %166 = arith.mulf %165, %164 : vector<16x64xf32>
    %167 = arith.maximumf %164, %166 : vector<16x64xf32>
    %168 = arith.truncf %167 : vector<16x64xf32> to vector<16x64xbf16>
    %c0_149 = arith.constant 0 : index
    %c0_150 = arith.constant 0 : index
    %169 = vector.load %arg10[%c0_149, %c0_150] : memref<64x32xbf16, #tpu.memory_space<vmem>>, vector<64x32xbf16>
    %cst_151 = arith.constant dense<0.000000e+00> : vector<16x32xf32>
    %170 = tpu.matmul %168, %169, %cst_151 {dimension_numbers = #tpu.dot_dimension_numbers<[1], [0], [0], [1], [0, 0, 1, 1], [], []>} : vector<16x64xbf16>, vector<64x32xbf16>, vector<16x32xf32> -> vector<16x32xf32>
    %c0_152 = arith.constant 0 : index
    %c0_153 = arith.constant 0 : index
    %171 = vector.load %arg11[%c0_152, %c0_153] : memref<1x32xf32, #tpu.memory_space<vmem>>, vector<1x32xf32>
    %172 = vector.broadcast %171 : vector<1x32xf32> to vector<16x32xf32>
    %173 = arith.addf %170, %172 : vector<16x32xf32>
    %cst_154 = arith.constant 1.000000e-01 : f32
    %174 = vector.broadcast %cst_154 : f32 to vector<16x32xf32>
    %175 = arith.mulf %174, %173 : vector<16x32xf32>
    %176 = arith.maximumf %173, %175 : vector<16x32xf32>
    %cst_155 = arith.constant dense<0xFF800000> : vector<32xf32>
    %177 = vector.multi_reduction <maximumf>, %176, %cst_155 [0] : vector<16x32xf32> to vector<32xf32>
    %178 = vector.shape_cast %177 : vector<32xf32> to vector<1x32xf32>
    %179 = vector.extract_strided_slice %176 {offsets = [0, 0], sizes = [4, 32], strides = [1, 1]} : vector<16x32xf32> to vector<4x32xf32>
    %180 = vector.extract_strided_slice %176 {offsets = [4, 0], sizes = [4, 32], strides = [1, 1]} : vector<16x32xf32> to vector<4x32xf32>
    %181 = vector.extract_strided_slice %176 {offsets = [8, 0], sizes = [4, 32], strides = [1, 1]} : vector<16x32xf32> to vector<4x32xf32>
    %182 = vector.extract_strided_slice %176 {offsets = [12, 0], sizes = [4, 32], strides = [1, 1]} : vector<16x32xf32> to vector<4x32xf32>
    %183 = arith.maximumf %179, %180 : vector<4x32xf32>
    %184 = arith.maximumf %183, %181 : vector<4x32xf32>
    %185 = arith.maximumf %180, %181 : vector<4x32xf32>
    %186 = arith.maximumf %185, %182 : vector<4x32xf32>
    %187 = arith.maximumf %184, %182 : vector<4x32xf32>
    %188 = vector.extract_strided_slice %187 {offsets = [0, 0], sizes = [1, 32], strides = [1, 1]} : vector<4x32xf32> to vector<1x32xf32>
    %189 = vector.extract_strided_slice %187 {offsets = [1, 0], sizes = [1, 32], strides = [1, 1]} : vector<4x32xf32> to vector<1x32xf32>
    %190 = vector.extract_strided_slice %187 {offsets = [2, 0], sizes = [1, 32], strides = [1, 1]} : vector<4x32xf32> to vector<1x32xf32>
    %191 = vector.extract_strided_slice %187 {offsets = [3, 0], sizes = [1, 32], strides = [1, 1]} : vector<4x32xf32> to vector<1x32xf32>
    %192 = arith.maximumf %188, %189 : vector<1x32xf32>
    %193 = arith.maximumf %192, %190 : vector<1x32xf32>
    %194 = arith.maximumf %189, %190 : vector<1x32xf32>
    %195 = arith.maximumf %194, %191 : vector<1x32xf32>
    %196 = arith.maximumf %193, %191 : vector<1x32xf32>
    %197 = tpu.concatenate %193, %196, %196, %195 in 0 : vector<1x32xf32>, vector<1x32xf32>, vector<1x32xf32>, vector<1x32xf32> -> vector<4x32xf32>
    %198 = vector.extract_strided_slice %184 {offsets = [0, 0], sizes = [1, 32], strides = [1, 1]} : vector<4x32xf32> to vector<1x32xf32>
    %199 = vector.extract_strided_slice %184 {offsets = [1, 0], sizes = [1, 32], strides = [1, 1]} : vector<4x32xf32> to vector<1x32xf32>
    %200 = vector.extract_strided_slice %184 {offsets = [2, 0], sizes = [1, 32], strides = [1, 1]} : vector<4x32xf32> to vector<1x32xf32>
    %201 = vector.extract_strided_slice %184 {offsets = [3, 0], sizes = [1, 32], strides = [1, 1]} : vector<4x32xf32> to vector<1x32xf32>
    %202 = arith.maximumf %198, %199 : vector<1x32xf32>
    %203 = arith.maximumf %202, %200 : vector<1x32xf32>
    %204 = arith.maximumf %199, %200 : vector<1x32xf32>
    %205 = arith.maximumf %204, %201 : vector<1x32xf32>
    %206 = arith.maximumf %203, %201 : vector<1x32xf32>
    %207 = tpu.concatenate %203, %206, %206, %205 in 0 : vector<1x32xf32>, vector<1x32xf32>, vector<1x32xf32>, vector<1x32xf32> -> vector<4x32xf32>
    %208 = vector.extract_strided_slice %186 {offsets = [0, 0], sizes = [1, 32], strides = [1, 1]} : vector<4x32xf32> to vector<1x32xf32>
    %209 = vector.extract_strided_slice %186 {offsets = [1, 0], sizes = [1, 32], strides = [1, 1]} : vector<4x32xf32> to vector<1x32xf32>
    %210 = vector.extract_strided_slice %186 {offsets = [2, 0], sizes = [1, 32], strides = [1, 1]} : vector<4x32xf32> to vector<1x32xf32>
    %211 = vector.extract_strided_slice %186 {offsets = [3, 0], sizes = [1, 32], strides = [1, 1]} : vector<4x32xf32> to vector<1x32xf32>
    %212 = arith.maximumf %208, %209 : vector<1x32xf32>
    %213 = arith.maximumf %212, %210 : vector<1x32xf32>
    %214 = arith.maximumf %209, %210 : vector<1x32xf32>
    %215 = arith.maximumf %214, %211 : vector<1x32xf32>
    %216 = arith.maximumf %213, %211 : vector<1x32xf32>
    %217 = tpu.concatenate %213, %216, %216, %215 in 0 : vector<1x32xf32>, vector<1x32xf32>, vector<1x32xf32>, vector<1x32xf32> -> vector<4x32xf32>
    %218 = tpu.concatenate %207, %197, %197, %217 in 0 : vector<4x32xf32>, vector<4x32xf32>, vector<4x32xf32>, vector<4x32xf32> -> vector<16x32xf32>
    %219 = arith.truncf %176 : vector<16x32xf32> to vector<16x32xbf16>
    %c0_156 = arith.constant 0 : index
    %c0_157 = arith.constant 0 : index
    %220 = vector.load %arg12[%c0_156, %c0_157] : memref<32x64xbf16, #tpu.memory_space<vmem>>, vector<32x64xbf16>
    %cst_158 = arith.constant dense<0.000000e+00> : vector<16x64xf32>
    %221 = tpu.matmul %219, %220, %cst_158 {dimension_numbers = #tpu.dot_dimension_numbers<[1], [0], [0], [1], [0, 0, 1, 1], [], []>} : vector<16x32xbf16>, vector<32x64xbf16>, vector<16x64xf32> -> vector<16x64xf32>
    %222 = arith.truncf %218 : vector<16x32xf32> to vector<16x32xbf16>
    %c0_159 = arith.constant 0 : index
    %c0_160 = arith.constant 0 : index
    %223 = vector.load %arg13[%c0_159, %c0_160] : memref<32x64xbf16, #tpu.memory_space<vmem>>, vector<32x64xbf16>
    %cst_161 = arith.constant dense<0.000000e+00> : vector<16x64xf32>
    %224 = tpu.matmul %222, %223, %cst_161 {dimension_numbers = #tpu.dot_dimension_numbers<[1], [0], [0], [1], [0, 0, 1, 1], [], []>} : vector<16x32xbf16>, vector<32x64xbf16>, vector<16x64xf32> -> vector<16x64xf32>
    %225 = arith.addf %221, %224 : vector<16x64xf32>
    %226 = vector.shape_cast %178 : vector<1x32xf32> to vector<1x32xf32>
    %227 = vector.broadcast %226 : vector<1x32xf32> to vector<16x32xf32>
    %228 = arith.truncf %227 : vector<16x32xf32> to vector<16x32xbf16>
    %c0_162 = arith.constant 0 : index
    %c0_163 = arith.constant 0 : index
    %229 = vector.load %arg14[%c0_162, %c0_163] : memref<32x64xbf16, #tpu.memory_space<vmem>>, vector<32x64xbf16>
    %cst_164 = arith.constant dense<0.000000e+00> : vector<16x64xf32>
    %230 = tpu.matmul %228, %229, %cst_164 {dimension_numbers = #tpu.dot_dimension_numbers<[1], [0], [0], [1], [0, 0, 1, 1], [], []>} : vector<16x32xbf16>, vector<32x64xbf16>, vector<16x64xf32> -> vector<16x64xf32>
    %231 = arith.addf %225, %230 : vector<16x64xf32>
    %c0_165 = arith.constant 0 : index
    %c0_166 = arith.constant 0 : index
    %232 = vector.load %arg15[%c0_165, %c0_166] : memref<1x64xf32, #tpu.memory_space<vmem>>, vector<1x64xf32>
    %233 = vector.broadcast %232 : vector<1x64xf32> to vector<16x64xf32>
    %234 = arith.addf %231, %233 : vector<16x64xf32>
    %cst_167 = arith.constant 1.000000e-01 : f32
    %235 = vector.broadcast %cst_167 : f32 to vector<16x64xf32>
    %236 = arith.mulf %235, %234 : vector<16x64xf32>
    %237 = arith.maximumf %234, %236 : vector<16x64xf32>
    %238 = arith.truncf %237 : vector<16x64xf32> to vector<16x64xbf16>
    %c0_168 = arith.constant 0 : index
    %c0_169 = arith.constant 0 : index
    %239 = vector.load %arg18[%c0_168, %c0_169] : memref<1x64xf32, #tpu.memory_space<vmem>>, vector<1x64xf32>
    %240 = vector.shape_cast %239 : vector<1x64xf32> to vector<1x64xf32>
    %241 = vector.broadcast %240 : vector<1x64xf32> to vector<16x64xf32>
    %c0_170 = arith.constant 0 : index
    %c0_171 = arith.constant 0 : index
    %c0_172 = arith.constant 0 : index
    %242 = vector.load %arg16[%c0_170, %c0_171, %c0_172] : memref<9x16x16xbf16, #tpu.memory_space<vmem>>, vector<1x16x16xbf16>
    %243 = vector.shape_cast %242 : vector<1x16x16xbf16> to vector<16x16xbf16>
    %cst_173 = arith.constant dense<0.000000e+00> : vector<16x64xf32>
    %244 = tpu.matmul %243, %238, %cst_173 {dimension_numbers = #tpu.dot_dimension_numbers<[1], [0], [0], [1], [0, 0, 1, 1], [], []>} : vector<16x16xbf16>, vector<16x64xbf16>, vector<16x64xf32> -> vector<16x64xf32>
    %245 = arith.truncf %244 : vector<16x64xf32> to vector<16x64xbf16>
    %c0_174 = arith.constant 0 : index
    %c0_175 = arith.constant 0 : index
    %c0_176 = arith.constant 0 : index
    %246 = vector.load %arg17[%c0_174, %c0_175, %c0_176] : memref<9x64x64xbf16, #tpu.memory_space<vmem>>, vector<1x64x64xbf16>
    %247 = vector.shape_cast %246 : vector<1x64x64xbf16> to vector<64x64xbf16>
    %cst_177 = arith.constant dense<0.000000e+00> : vector<16x64xf32>
    %248 = tpu.matmul %245, %247, %cst_177 {dimension_numbers = #tpu.dot_dimension_numbers<[1], [0], [0], [1], [0, 0, 1, 1], [], []>} : vector<16x64xbf16>, vector<64x64xbf16>, vector<16x64xf32> -> vector<16x64xf32>
    %249 = arith.addf %241, %248 : vector<16x64xf32>
    %c1_178 = arith.constant 1 : index
    %c0_179 = arith.constant 0 : index
    %c0_180 = arith.constant 0 : index
    %250 = vector.load %arg16[%c1_178, %c0_179, %c0_180] : memref<9x16x16xbf16, #tpu.memory_space<vmem>>, vector<1x16x16xbf16>
    %251 = vector.shape_cast %250 : vector<1x16x16xbf16> to vector<16x16xbf16>
    %cst_181 = arith.constant dense<0.000000e+00> : vector<16x64xf32>
    %252 = tpu.matmul %251, %238, %cst_181 {dimension_numbers = #tpu.dot_dimension_numbers<[1], [0], [0], [1], [0, 0, 1, 1], [], []>} : vector<16x16xbf16>, vector<16x64xbf16>, vector<16x64xf32> -> vector<16x64xf32>
    %253 = arith.truncf %252 : vector<16x64xf32> to vector<16x64xbf16>
    %c1_182 = arith.constant 1 : index
    %c0_183 = arith.constant 0 : index
    %c0_184 = arith.constant 0 : index
    %254 = vector.load %arg17[%c1_182, %c0_183, %c0_184] : memref<9x64x64xbf16, #tpu.memory_space<vmem>>, vector<1x64x64xbf16>
    %255 = vector.shape_cast %254 : vector<1x64x64xbf16> to vector<64x64xbf16>
    %cst_185 = arith.constant dense<0.000000e+00> : vector<16x64xf32>
    %256 = tpu.matmul %253, %255, %cst_185 {dimension_numbers = #tpu.dot_dimension_numbers<[1], [0], [0], [1], [0, 0, 1, 1], [], []>} : vector<16x64xbf16>, vector<64x64xbf16>, vector<16x64xf32> -> vector<16x64xf32>
    %257 = arith.addf %249, %256 : vector<16x64xf32>
    %c2_186 = arith.constant 2 : index
    %c0_187 = arith.constant 0 : index
    %c0_188 = arith.constant 0 : index
    %258 = vector.load %arg16[%c2_186, %c0_187, %c0_188] : memref<9x16x16xbf16, #tpu.memory_space<vmem>>, vector<1x16x16xbf16>
    %259 = vector.shape_cast %258 : vector<1x16x16xbf16> to vector<16x16xbf16>
    %cst_189 = arith.constant dense<0.000000e+00> : vector<16x64xf32>
    %260 = tpu.matmul %259, %238, %cst_189 {dimension_numbers = #tpu.dot_dimension_numbers<[1], [0], [0], [1], [0, 0, 1, 1], [], []>} : vector<16x16xbf16>, vector<16x64xbf16>, vector<16x64xf32> -> vector<16x64xf32>
    %261 = arith.truncf %260 : vector<16x64xf32> to vector<16x64xbf16>
    %c2_190 = arith.constant 2 : index
    %c0_191 = arith.constant 0 : index
    %c0_192 = arith.constant 0 : index
    %262 = vector.load %arg17[%c2_190, %c0_191, %c0_192] : memref<9x64x64xbf16, #tpu.memory_space<vmem>>, vector<1x64x64xbf16>
    %263 = vector.shape_cast %262 : vector<1x64x64xbf16> to vector<64x64xbf16>
    %cst_193 = arith.constant dense<0.000000e+00> : vector<16x64xf32>
    %264 = tpu.matmul %261, %263, %cst_193 {dimension_numbers = #tpu.dot_dimension_numbers<[1], [0], [0], [1], [0, 0, 1, 1], [], []>} : vector<16x64xbf16>, vector<64x64xbf16>, vector<16x64xf32> -> vector<16x64xf32>
    %265 = arith.addf %257, %264 : vector<16x64xf32>
    %c3_194 = arith.constant 3 : index
    %c0_195 = arith.constant 0 : index
    %c0_196 = arith.constant 0 : index
    %266 = vector.load %arg16[%c3_194, %c0_195, %c0_196] : memref<9x16x16xbf16, #tpu.memory_space<vmem>>, vector<1x16x16xbf16>
    %267 = vector.shape_cast %266 : vector<1x16x16xbf16> to vector<16x16xbf16>
    %cst_197 = arith.constant dense<0.000000e+00> : vector<16x64xf32>
    %268 = tpu.matmul %267, %238, %cst_197 {dimension_numbers = #tpu.dot_dimension_numbers<[1], [0], [0], [1], [0, 0, 1, 1], [], []>} : vector<16x16xbf16>, vector<16x64xbf16>, vector<16x64xf32> -> vector<16x64xf32>
    %269 = arith.truncf %268 : vector<16x64xf32> to vector<16x64xbf16>
    %c3_198 = arith.constant 3 : index
    %c0_199 = arith.constant 0 : index
    %c0_200 = arith.constant 0 : index
    %270 = vector.load %arg17[%c3_198, %c0_199, %c0_200] : memref<9x64x64xbf16, #tpu.memory_space<vmem>>, vector<1x64x64xbf16>
    %271 = vector.shape_cast %270 : vector<1x64x64xbf16> to vector<64x64xbf16>
    %cst_201 = arith.constant dense<0.000000e+00> : vector<16x64xf32>
    %272 = tpu.matmul %269, %271, %cst_201 {dimension_numbers = #tpu.dot_dimension_numbers<[1], [0], [0], [1], [0, 0, 1, 1], [], []>} : vector<16x64xbf16>, vector<64x64xbf16>, vector<16x64xf32> -> vector<16x64xf32>
    %273 = arith.addf %265, %272 : vector<16x64xf32>
    %c4_202 = arith.constant 4 : index
    %c0_203 = arith.constant 0 : index
    %c0_204 = arith.constant 0 : index
    %274 = vector.load %arg16[%c4_202, %c0_203, %c0_204] : memref<9x16x16xbf16, #tpu.memory_space<vmem>>, vector<1x16x16xbf16>
    %275 = vector.shape_cast %274 : vector<1x16x16xbf16> to vector<16x16xbf16>
    %cst_205 = arith.constant dense<0.000000e+00> : vector<16x64xf32>
    %276 = tpu.matmul %275, %238, %cst_205 {dimension_numbers = #tpu.dot_dimension_numbers<[1], [0], [0], [1], [0, 0, 1, 1], [], []>} : vector<16x16xbf16>, vector<16x64xbf16>, vector<16x64xf32> -> vector<16x64xf32>
    %277 = arith.truncf %276 : vector<16x64xf32> to vector<16x64xbf16>
    %c4_206 = arith.constant 4 : index
    %c0_207 = arith.constant 0 : index
    %c0_208 = arith.constant 0 : index
    %278 = vector.load %arg17[%c4_206, %c0_207, %c0_208] : memref<9x64x64xbf16, #tpu.memory_space<vmem>>, vector<1x64x64xbf16>
    %279 = vector.shape_cast %278 : vector<1x64x64xbf16> to vector<64x64xbf16>
    %cst_209 = arith.constant dense<0.000000e+00> : vector<16x64xf32>
    %280 = tpu.matmul %277, %279, %cst_209 {dimension_numbers = #tpu.dot_dimension_numbers<[1], [0], [0], [1], [0, 0, 1, 1], [], []>} : vector<16x64xbf16>, vector<64x64xbf16>, vector<16x64xf32> -> vector<16x64xf32>
    %281 = arith.addf %273, %280 : vector<16x64xf32>
    %c5_210 = arith.constant 5 : index
    %c0_211 = arith.constant 0 : index
    %c0_212 = arith.constant 0 : index
    %282 = vector.load %arg16[%c5_210, %c0_211, %c0_212] : memref<9x16x16xbf16, #tpu.memory_space<vmem>>, vector<1x16x16xbf16>
    %283 = vector.shape_cast %282 : vector<1x16x16xbf16> to vector<16x16xbf16>
    %cst_213 = arith.constant dense<0.000000e+00> : vector<16x64xf32>
    %284 = tpu.matmul %283, %238, %cst_213 {dimension_numbers = #tpu.dot_dimension_numbers<[1], [0], [0], [1], [0, 0, 1, 1], [], []>} : vector<16x16xbf16>, vector<16x64xbf16>, vector<16x64xf32> -> vector<16x64xf32>
    %285 = arith.truncf %284 : vector<16x64xf32> to vector<16x64xbf16>
    %c5_214 = arith.constant 5 : index
    %c0_215 = arith.constant 0 : index
    %c0_216 = arith.constant 0 : index
    %286 = vector.load %arg17[%c5_214, %c0_215, %c0_216] : memref<9x64x64xbf16, #tpu.memory_space<vmem>>, vector<1x64x64xbf16>
    %287 = vector.shape_cast %286 : vector<1x64x64xbf16> to vector<64x64xbf16>
    %cst_217 = arith.constant dense<0.000000e+00> : vector<16x64xf32>
    %288 = tpu.matmul %285, %287, %cst_217 {dimension_numbers = #tpu.dot_dimension_numbers<[1], [0], [0], [1], [0, 0, 1, 1], [], []>} : vector<16x64xbf16>, vector<64x64xbf16>, vector<16x64xf32> -> vector<16x64xf32>
    %289 = arith.addf %281, %288 : vector<16x64xf32>
    %c6_218 = arith.constant 6 : index
    %c0_219 = arith.constant 0 : index
    %c0_220 = arith.constant 0 : index
    %290 = vector.load %arg16[%c6_218, %c0_219, %c0_220] : memref<9x16x16xbf16, #tpu.memory_space<vmem>>, vector<1x16x16xbf16>
    %291 = vector.shape_cast %290 : vector<1x16x16xbf16> to vector<16x16xbf16>
    %cst_221 = arith.constant dense<0.000000e+00> : vector<16x64xf32>
    %292 = tpu.matmul %291, %238, %cst_221 {dimension_numbers = #tpu.dot_dimension_numbers<[1], [0], [0], [1], [0, 0, 1, 1], [], []>} : vector<16x16xbf16>, vector<16x64xbf16>, vector<16x64xf32> -> vector<16x64xf32>
    %293 = arith.truncf %292 : vector<16x64xf32> to vector<16x64xbf16>
    %c6_222 = arith.constant 6 : index
    %c0_223 = arith.constant 0 : index
    %c0_224 = arith.constant 0 : index
    %294 = vector.load %arg17[%c6_222, %c0_223, %c0_224] : memref<9x64x64xbf16, #tpu.memory_space<vmem>>, vector<1x64x64xbf16>
    %295 = vector.shape_cast %294 : vector<1x64x64xbf16> to vector<64x64xbf16>
    %cst_225 = arith.constant dense<0.000000e+00> : vector<16x64xf32>
    %296 = tpu.matmul %293, %295, %cst_225 {dimension_numbers = #tpu.dot_dimension_numbers<[1], [0], [0], [1], [0, 0, 1, 1], [], []>} : vector<16x64xbf16>, vector<64x64xbf16>, vector<16x64xf32> -> vector<16x64xf32>
    %297 = arith.addf %289, %296 : vector<16x64xf32>
    %c7_226 = arith.constant 7 : index
    %c0_227 = arith.constant 0 : index
    %c0_228 = arith.constant 0 : index
    %298 = vector.load %arg16[%c7_226, %c0_227, %c0_228] : memref<9x16x16xbf16, #tpu.memory_space<vmem>>, vector<1x16x16xbf16>
    %299 = vector.shape_cast %298 : vector<1x16x16xbf16> to vector<16x16xbf16>
    %cst_229 = arith.constant dense<0.000000e+00> : vector<16x64xf32>
    %300 = tpu.matmul %299, %238, %cst_229 {dimension_numbers = #tpu.dot_dimension_numbers<[1], [0], [0], [1], [0, 0, 1, 1], [], []>} : vector<16x16xbf16>, vector<16x64xbf16>, vector<16x64xf32> -> vector<16x64xf32>
    %301 = arith.truncf %300 : vector<16x64xf32> to vector<16x64xbf16>
    %c7_230 = arith.constant 7 : index
    %c0_231 = arith.constant 0 : index
    %c0_232 = arith.constant 0 : index
    %302 = vector.load %arg17[%c7_230, %c0_231, %c0_232] : memref<9x64x64xbf16, #tpu.memory_space<vmem>>, vector<1x64x64xbf16>
    %303 = vector.shape_cast %302 : vector<1x64x64xbf16> to vector<64x64xbf16>
    %cst_233 = arith.constant dense<0.000000e+00> : vector<16x64xf32>
    %304 = tpu.matmul %301, %303, %cst_233 {dimension_numbers = #tpu.dot_dimension_numbers<[1], [0], [0], [1], [0, 0, 1, 1], [], []>} : vector<16x64xbf16>, vector<64x64xbf16>, vector<16x64xf32> -> vector<16x64xf32>
    %305 = arith.addf %297, %304 : vector<16x64xf32>
    %c8_234 = arith.constant 8 : index
    %c0_235 = arith.constant 0 : index
    %c0_236 = arith.constant 0 : index
    %306 = vector.load %arg16[%c8_234, %c0_235, %c0_236] : memref<9x16x16xbf16, #tpu.memory_space<vmem>>, vector<1x16x16xbf16>
    %307 = vector.shape_cast %306 : vector<1x16x16xbf16> to vector<16x16xbf16>
    %cst_237 = arith.constant dense<0.000000e+00> : vector<16x64xf32>
    %308 = tpu.matmul %307, %238, %cst_237 {dimension_numbers = #tpu.dot_dimension_numbers<[1], [0], [0], [1], [0, 0, 1, 1], [], []>} : vector<16x16xbf16>, vector<16x64xbf16>, vector<16x64xf32> -> vector<16x64xf32>
    %309 = arith.truncf %308 : vector<16x64xf32> to vector<16x64xbf16>
    %c8_238 = arith.constant 8 : index
    %c0_239 = arith.constant 0 : index
    %c0_240 = arith.constant 0 : index
    %310 = vector.load %arg17[%c8_238, %c0_239, %c0_240] : memref<9x64x64xbf16, #tpu.memory_space<vmem>>, vector<1x64x64xbf16>
    %311 = vector.shape_cast %310 : vector<1x64x64xbf16> to vector<64x64xbf16>
    %cst_241 = arith.constant dense<0.000000e+00> : vector<16x64xf32>
    %312 = tpu.matmul %309, %311, %cst_241 {dimension_numbers = #tpu.dot_dimension_numbers<[1], [0], [0], [1], [0, 0, 1, 1], [], []>} : vector<16x64xbf16>, vector<64x64xbf16>, vector<16x64xf32> -> vector<16x64xf32>
    %313 = arith.addf %305, %312 : vector<16x64xf32>
    %cst_242 = arith.constant 1.000000e-01 : f32
    %314 = vector.broadcast %cst_242 : f32 to vector<16x64xf32>
    %315 = arith.mulf %314, %313 : vector<16x64xf32>
    %316 = arith.maximumf %313, %315 : vector<16x64xf32>
    %317 = arith.truncf %316 : vector<16x64xf32> to vector<16x64xbf16>
    %c0_243 = arith.constant 0 : index
    %c0_244 = arith.constant 0 : index
    %318 = vector.load %arg19[%c0_243, %c0_244] : memref<64x128xbf16, #tpu.memory_space<vmem>>, vector<64x128xbf16>
    %cst_245 = arith.constant dense<0.000000e+00> : vector<16x128xf32>
    %319 = tpu.matmul %317, %318, %cst_245 {dimension_numbers = #tpu.dot_dimension_numbers<[1], [0], [0], [1], [0, 0, 1, 1], [], []>} : vector<16x64xbf16>, vector<64x128xbf16>, vector<16x128xf32> -> vector<16x128xf32>
    %c0_246 = arith.constant 0 : index
    %c0_247 = arith.constant 0 : index
    %320 = vector.load %arg20[%c0_246, %c0_247] : memref<1x128xf32, #tpu.memory_space<vmem>>, vector<1x128xf32>
    %321 = vector.broadcast %320 : vector<1x128xf32> to vector<16x128xf32>
    %322 = arith.addf %319, %321 : vector<16x128xf32>
    %c0_248 = arith.constant 0 : index
    %c0_249 = arith.constant 0 : index
    %c0_250 = arith.constant 0 : index
    %323 = vector.load %arg21[%c0_248, %c0_249, %c0_250] : memref<1x16x128xf32, #tpu.memory_space<vmem>>, vector<1x16x128xf32>
    %324 = vector.shape_cast %323 : vector<1x16x128xf32> to vector<16x128xf32>
    %325 = vector.shape_cast %322 : vector<16x128xf32> to vector<1x16x128xf32>
    tpu.vector_store %arg21[%c0_248, %c0_249, %c0_250], %325 {strides = array<i32>} : memref<1x16x128xf32, #tpu.memory_space<vmem>>, vector<1x16x128xf32>,
    return
  }
  func.func @transform_0(%arg0: i32) -> (i32, i32, i32) {
    %c0_i32 = arith.constant 0 : i32
    %c0_i32_0 = arith.constant 0 : i32
    %c0_i32_1 = arith.constant 0 : i32
    return %arg0, %c0_i32, %c0_i32_0 : i32, i32, i32
  }
  func.func @transform_1(%arg0: i32) -> (i32, i32) {
    %c0_i32 = arith.constant 0 : i32
    %c0_i32_0 = arith.constant 0 : i32
    %c0_i32_1 = arith.constant 0 : i32
    return %c0_i32, %c0_i32_0 : i32, i32
  }
  func.func @transform_2(%arg0: i32) -> (i32, i32) {
    %c0_i32 = arith.constant 0 : i32
    %c0_i32_0 = arith.constant 0 : i32
    %c0_i32_1 = arith.constant 0 : i32
    return %c0_i32, %c0_i32_0 : i32, i32
  }
  func.func @transform_3(%arg0: i32) -> (i32, i32, i32) {
    %c0_i32 = arith.constant 0 : i32
    %c0_i32_0 = arith.constant 0 : i32
    %c0_i32_1 = arith.constant 0 : i32
    %c0_i32_2 = arith.constant 0 : i32
    return %c0_i32, %c0_i32_0, %c0_i32_1 : i32, i32, i32
  }
  func.func @transform_4(%arg0: i32) -> (i32, i32, i32) {
    %c0_i32 = arith.constant 0 : i32
    %c0_i32_0 = arith.constant 0 : i32
    %c0_i32_1 = arith.constant 0 : i32
    %c0_i32_2 = arith.constant 0 : i32
    return %c0_i32, %c0_i32_0, %c0_i32_1 : i32, i32, i32
  }
  func.func @transform_5(%arg0: i32) -> (i32, i32) {
    %c0_i32 = arith.constant 0 : i32
    %c0_i32_0 = arith.constant 0 : i32
    %c0_i32_1 = arith.constant 0 : i32
    return %c0_i32, %c0_i32_0 : i32, i32
  }
  func.func @transform_6(%arg0: i32) -> (i32, i32, i32) {
    %c0_i32 = arith.constant 0 : i32
    %c0_i32_0 = arith.constant 0 : i32
    %c0_i32_1 = arith.constant 0 : i32
    %c0_i32_2 = arith.constant 0 : i32
    return %c0_i32, %c0_i32_0, %c0_i32_1 : i32, i32, i32
  }
  func.func @transform_7(%arg0: i32) -> (i32, i32, i32) {
    %c0_i32 = arith.constant 0 : i32
    %c0_i32_0 = arith.constant 0 : i32
    %c0_i32_1 = arith.constant 0 : i32
    %c0_i32_2 = arith.constant 0 : i32
    return %c0_i32, %c0_i32_0, %c0_i32_1 : i32, i32, i32
  }
  func.func @transform_8(%arg0: i32) -> (i32, i32) {
    %c0_i32 = arith.constant 0 : i32
    %c0_i32_0 = arith.constant 0 : i32
    %c0_i32_1 = arith.constant 0 : i32
    return %c0_i32, %c0_i32_0 : i32, i32
  }
  func.func @transform_9(%arg0: i32) -> (i32, i32) {
    %c0_i32 = arith.constant 0 : i32
    %c0_i32_0 = arith.constant 0 : i32
    %c0_i32_1 = arith.constant 0 : i32
    return %c0_i32, %c0_i32_0 : i32, i32
  }
  func.func @transform_10(%arg0: i32) -> (i32, i32) {
    %c0_i32 = arith.constant 0 : i32
    %c0_i32_0 = arith.constant 0 : i32
    %c0_i32_1 = arith.constant 0 : i32
    return %c0_i32, %c0_i32_0 : i32, i32
  }
  func.func @transform_11(%arg0: i32) -> (i32, i32) {
    %c0_i32 = arith.constant 0 : i32
    %c0_i32_0 = arith.constant 0 : i32
    %c0_i32_1 = arith.constant 0 : i32
    return %c0_i32, %c0_i32_0 : i32, i32
  }
  func.func @transform_12(%arg0: i32) -> (i32, i32) {
    %c0_i32 = arith.constant 0 : i32
    %c0_i32_0 = arith.constant 0 : i32
    %c0_i32_1 = arith.constant 0 : i32
    return %c0_i32, %c0_i32_0 : i32, i32
  }
  func.func @transform_13(%arg0: i32) -> (i32, i32) {
    %c0_i32 = arith.constant 0 : i32
    %c0_i32_0 = arith.constant 0 : i32
    %c0_i32_1 = arith.constant 0 : i32
    return %c0_i32, %c0_i32_0 : i32, i32
  }
  func.func @transform_14(%arg0: i32) -> (i32, i32) {
    %c0_i32 = arith.constant 0 : i32
    %c0_i32_0 = arith.constant 0 : i32
    %c0_i32_1 = arith.constant 0 : i32
    return %c0_i32, %c0_i32_0 : i32, i32
  }
  func.func @transform_15(%arg0: i32) -> (i32, i32, i32) {
    %c0_i32 = arith.constant 0 : i32
    %c0_i32_0 = arith.constant 0 : i32
    %c0_i32_1 = arith.constant 0 : i32
    %c0_i32_2 = arith.constant 0 : i32
    return %c0_i32, %c0_i32_0, %c0_i32_1 : i32, i32, i32
  }
  func.func @transform_16(%arg0: i32) -> (i32, i32, i32) {
    %c0_i32 = arith.constant 0 : i32
    %c0_i32_0 = arith.constant 0 : i32
    %c0_i32_1 = arith.constant 0 : i32
    %c0_i32_2 = arith.constant 0 : i32
    return %c0_i32, %c0_i32_0, %c0_i32_1 : i32, i32, i32
  }
  func.func @transform_17(%arg0: i32) -> (i32, i32) {
    %c0_i32 = arith.constant 0 : i32
    %c0_i32_0 = arith.constant 0 : i32
    %c0_i32_1 = arith.constant 0 : i32
    return %c0_i32, %c0_i32_0 : i32, i32
  }
  func.func @transform_18(%arg0: i32) -> (i32, i32) {
    %c0_i32 = arith.constant 0 : i32
    %c0_i32_0 = arith.constant 0 : i32
    %c0_i32_1 = arith.constant 0 : i32
    return %c0_i32, %c0_i32_0 : i32, i32
  }
  func.func @transform_19(%arg0: i32) -> (i32, i32) {
    %c0_i32 = arith.constant 0 : i32
    %c0_i32_0 = arith.constant 0 : i32
    %c0_i32_1 = arith.constant 0 : i32
    return %c0_i32, %c0_i32_0 : i32, i32
  }
  func.func @transform_20(%arg0: i32) -> (i32, i32, i32) {
    %c0_i32 = arith.constant 0 : i32
    %c0_i32_0 = arith.constant 0 : i32
    %c0_i32_1 = arith.constant 0 : i32
    return %arg0, %c0_i32, %c0_i32_0 : i32, i32, i32
  }
}

</mosaic_0001>

<bundles_post_ra>
// kernel: yolov4_forward.1
= control target key start
LH: loop header
LB: loop body
LE: loop exit
PB: predicated region body
PF: predicated region fallthrough
CT: control target
= control target key end

     0   :  { %s9330_s0 = inlined_call_operand.vmem [shape: bf16[2,256,32], index: 0, kind: input, shape index: {}]   ;;  %s9331_s1 = inlined_call_operand.vmem [shape: bf16[32,16], index: 1, kind: input, shape index: {}]   ;;  %s9332_s2 = inlined_call_operand.vmem [shape: f32[1,16], index: 2, kind: input, shape index: {}]   ;;  %s9333_s3 = inlined_call_operand.vmem [shape: bf16[9,64,256], index: 3, kind: input, shape index: {}]   ;;  %s9334_s4 = inlined_call_operand.vmem [shape: bf16[9,16,32], index: 4, kind: input, shape index: {}]   ;;  %s9335_s5 = inlined_call_operand.vmem [shape: f32[1,32], index: 5, kind: input, shape index: {}]   ;;  %s9336_s6 = inlined_call_operand.vmem [shape: bf16[9,16,64], index: 6, kind: input, shape index: {}]   ;;  %s9337_s7 = inlined_call_operand.vmem [shape: bf16[9,32,64], index: 7, kind: input, shape index: {}]   ;;  %s9338_s8 = inlined_call_operand.vmem [shape: f32[1,64], index: 8, kind: input, shape index: {}]   ;;  %s9339_s9 = inlined_call_operand.vmem [shape: bf16[64,32], index: 9, kind: input, shape index: {}]   ;;  %s9340_s10 = inlined_call_operand.vmem [shape: f32[1,32], index: 10, kind: input, shape index: {}]   ;;  %s9341_s11 = inlined_call_operand.vmem [shape: bf16[32,64], index: 11, kind: input, shape index: {}]   ;;  %s9342_s12 = inlined_call_operand.vmem [shape: bf16[32,64], index: 12, kind: input, shape index: {}]   ;;  %s9343_s13 = inlined_call_operand.vmem [shape: bf16[32,64], index: 13, kind: input, shape index: {}]   ;;  %s9344_s14 = inlined_call_operand.vmem [shape: f32[1,64], index: 14, kind: input, shape index: {}]   ;;  %s9345_s15 = inlined_call_operand.vmem [shape: bf16[9,16,16], index: 15, kind: input, shape index: {}]   ;;  %s9346_s16 = inlined_call_operand.vmem [shape: bf16[9,64,64], index: 16, kind: input, shape index: {}]   ;;  %s9347_s17 = inlined_call_operand.vmem [shape: f32[1,64], index: 17, kind: input, shape index: {}]   ;;  %s9348_s18 = inlined_call_operand.vmem [shape: bf16[64,128], index: 18, kind: input, shape index: {}]   ;;  %s9349_s19 = inlined_call_operand.vmem [shape: f32[1,128], index: 19, kind: input, shape index: {}]   ;;  %s9350_s20 = inlined_call_operand.hbm [shape: f32[2,16,128], index: 20, kind: output, shape index: {}]  }
   0x1   :  { %9363 = sst [smem:[#allocation12_spill]] %s9330_s0 }
   0x2   :  { %9364 = sst [smem:[#allocation13_spill]] %s9331_s1 }
   0x3   :  { %9365 = sst [smem:[#allocation14_spill]] %s9332_s2 }
   0x4   :  { %9366 = sst [smem:[#allocation15_spill]] %s9333_s3 }
   0x5   :  { %9367 = sst [smem:[#allocation16_spill]] %s9334_s4 }
   0x6   :  { %25 = vsyncpa [#allocation3], 0 }
   0x7   :  { %27 = vsyncpa [#allocation3 + $0x1], 0  ;;  %s7967_s1 = smov 0   ;;  %s7969_s22 = smov 0  }
   0x8   :  { %s7971_s23 = smov 0   ;;  %s7973_s24 = smov 0  }
   0x9 LB: > { %9368 = sst [smem:[#allocation5_spill]] %s7843_s1  ;;  %s7988_s2 = sadd.s32 4294967295, %s7855_s24   ;;  %s7855_s24 = sphi %s7973_s24, %s9402_s24   ;;  %s7851_s23 = sphi %s7971_s23, %s9404_s23   ;;  %s7847_s22 = sphi %s7969_s22, %s9406_s22   ;;  %s7843_s1 = sphi %s7967_s1, %s9405_s1  }
   0xa   : > { %9369 = sst [smem:[#allocation6_spill]] %s7851_s23  ;;  %s5785_s25 = sadd.s32 4294967294, %s7855_s24  }
   0xb   : > { %9370 = sst [smem:[#allocation7_spill]] %s7855_s24  ;;  %s7992_s3 = sadd.s32 1, %s7855_s24  }
   0xc   : > { %9371 = sst [smem:[#allocation8_spill]] %s7992_s3  ;;  %s465_s26 = sadd.s32 1, %s7851_s23 }
   0xd   : > { %s462_s27 = ssub.s32 %s7855_s24, %s7992_s3  ;;  %p475_p0 = scmp.ne.s32.totalorder %s7851_s23, %s7847_s22 }
   0xe   : > { %p463_p1 = scmp.eq.s32.totalorder %s462_s27, 0  ;;  %p476_p2 = scmp.eq.s32.totalorder %s7988_s2, 1 }
   0xf   : > { %p481_p3 = scmp.ne.s32.totalorder %s7847_s22, %s7843_s1  ;;  %p482_p4 = scmp.eq.s32.totalorder %s5785_s25, 1 }
  0x10   : > { %s8003_s28 = scalar_select %p463_p1, %s7851_s23, %s465_s26  }
  0x11   : > { %p8005_p5 = por %p476_p2, %p475_p0  ;;  %p8009_p6 = por %p482_p4, %p481_p3 }
  0x12   : > { %9372 = sst [smem:[#allocation9_spill]] %s8003_s28  ;;  %p5788_p7 = scmp.ge.s32.totalorder %s7855_s24, 1 }
  0x13   : > { %s9374_s29 = scalar_select %p8009_p6, 1, 0 }
  0x14   : > { %p565_p8 = scmp.lt.s32.totalorder %s7855_s24, 3 }
  0x15   : > { %9375 = sst [smem:[#allocation10_spill]] %s9374_s29 }
  0x16   : > { %p566_p9 = pnand %p5788_p7, %p565_p8 }
  0x18   : > { %569 = sbr.rel (%p566_p9) target bundleno = 3874 (0xf22), region = 100 }
  0x1f   : > { %s9376_s21 = sld [smem:[#allocation13_spill]]  ;;  %p623_p10 = scmp.lt.s32.totalorder %s7988_s2, 1  ;;  %vm764_vm0 = vcmask 261120   ;;  %vm1186_vm1 = vcmask 130048   ;;  %vm7858_vm2 = vmmov 0   ;;  %vm3002_vm3 = vcmask 523264  }
  0x20   : > { %s9377_s29 = sld [smem:[#allocation12_spill]]  ;;  %s9381_s0 = sld [smem:[#allocation16_spill]]  ;;  %vm4168_vm4 = vcmask 1040384   ;;  %vm4170_vm5 = vcmask 1041408   ;;  %vm4172_vm6 = vcmask 1042432   ;;  %vm4224_vm7 = vcmask 1043456  }
  0x21   : > { %s624_s27 = scalar_select %p623_p10, %s7988_s2, 1 }
  0x22   : > { %s6291_s26 = sshll.u32 %s7988_s2, 8  ;;  %s7859_s23 = smov [#allocation2]  }
  0x23   : > { %s6290_s28 = sshll.u32 %s624_s27, 7  ;;  %s9379_s27 = sld [smem:[#allocation14_spill]] }
  0x24   : > { %s9287_s24 = scalar_lea.hbm %s9350_s20, %s6291_s26  ;;  %s7797_s3 = sshll.u32 %s7859_s23, 4  ;;  %s7798_s3 = int_to_ptr.vmem [resolvable:$false] %s7797_s3 }
  0x25   : > { %v7572_v0 = vld [vmem:[%s9376_s21] sm:$0xff]   ;;  %v7573_v1 = vld [vmem:[%s9376_s21 + $0x8] sm:$0xff]   ;;  %s620_s21 = sand.u32 1, %s7847_s22  }
  0x26   : > { %6869 = vmatprep.subr.bf16.mxu0 %v7572_v0  ;;  %7385 = vmatprep.subr.bf16.mxu1 %v7572_v0  ;;  %s8026_s30 = scalar_lea.vmem %s9377_s29, %s6290_s28  ;;  %s9378_s28 = sld [smem:[#allocation15_spill]] }
  0x27   : > { %6870 = vmatpush3.bf16.msra.mxu0 %v7572_v0  ;;  %7387 = vmatpush3.bf16.msra.mxu1 %v7572_v0  ;;  %v7574_v2 = vld [vmem:[%s8026_s30] sm:$0xff]   ;;  %v7576_v4 = vld [vmem:[%s8026_s30 + $0x8] sm:$0xff]   ;;  %v7578_v6 = vld [vmem:[%s8026_s30 + $0x10] sm:$0xff]  }
  0x28   : > { %6871 = vmatprep.subr.bf16.mxu0 %v7573_v1  ;;  %7386 = vmatprep.subr.bf16.mxu1 %v7573_v1  ;;  %v7575_v3 = vld [vmem:[%s8026_s30 + $0x40] sm:$0xff]   ;;  %v7577_v5 = vld [vmem:[%s8026_s30 + $0x48] sm:$0xff]   ;;  %v7579_v7 = vld [vmem:[%s8026_s30 + $0x50] sm:$0xff]  }
  0x29   : > { %6873 = vmatprep.mubr.msk.bf16.mxu0 %vm764_vm0, %v7574_v2  ;;  %6889 = vmatprep.mubr.msk.bf16.mxu1 %vm764_vm0, %v7575_v3  ;;  %v7580_v8 = vld [vmem:[%s8026_s30 + $0x18] sm:$0xff]   ;;  %v7582_v10 = vld [vmem:[%s8026_s30 + $0x20] sm:$0xff]   ;;  %v7584_v12 = vld [vmem:[%s8026_s30 + $0x28] sm:$0xff]  }
  0x2a   : > { %v7581_v9 = vld [vmem:[%s8026_s30 + $0x58] sm:$0xff]   ;;  %v7583_v11 = vld [vmem:[%s8026_s30 + $0x60] sm:$0xff]   ;;  %v7585_v13 = vld [vmem:[%s8026_s30 + $0x68] sm:$0xff]  }
  0x2b   : > { %6872 = vmatpush3.bf16.msra.mxu0 %v7573_v1  ;;  %7388 = vmatpush3.bf16.msra.mxu1 %v7573_v1  ;;  %v7586_v14 = vld [vmem:[%s8026_s30 + $0x30] sm:$0xff]   ;;  %v7588_v16 = vld [vmem:[%s8026_s30 + $0x38] sm:$0xff]   ;;  %v8069_v20 = vld [vmem:[%s9379_s27] ss:$0 sm:$0xff] }
  0x2c   : > { %v7587_v15 = vld [vmem:[%s8026_s30 + $0x70] sm:$0xff]   ;;  %v7589_v17 = vld [vmem:[%s8026_s30 + $0x78] sm:$0xff]   ;;  %v7592_v18 = vld [vmem:[%s9378_s28 + $0x4] ss:$8 sps:$4 sm:$0xff]   ;;  %s5789_s30 = sshll.u32 %s620_s21, 4 }
  0x2d   : > { %v7595_v19 = vld [vmem:[%s9378_s28 + $0x44] ss:$8 sps:$4 sm:$0xff]   ;;  %s622_s29 = scalar_lea.vmem [#allocation2], %s5789_s30  ;;  %s9289_s30 = scalar_lea.sflag [#allocation3], %s620_s21 }
  0x2e   : > { %6874 = vmatmul.mubr.msk.bf16.vlgmr.msra.gmra.mrb[0].mxu0 %vm764_vm0, %v7576_v4  ;;  %6890 = vmatmul.mubr.msk.bf16.vlgmr.msra.gmra.mrb[0].mxu1 %vm764_vm0, %v7577_v5  ;;  %s5723_s25 = sshll.u32 %s622_s29, 4  ;;  %s9282_s25 = int_to_ptr.vmem [resolvable:$true] %s5723_s25 }
  0x2f   : > { %6877 = vmatprep.mubr.msk.bf16.mxu0 %vm764_vm0, %v7578_v6  ;;  %6893 = vmatprep.mubr.msk.bf16.mxu1 %vm764_vm0, %v7579_v7  ;;  %s7793_s2 = scalar_lea.vmem %s9282_s25, 256  ;;  %p7800_p0 = scmp.lt.s32.totalorder %s9282_s25, %s7798_s3 }
  0x30   : > { %p7794_p11 = scmp.ne.s32.totalorder %s9282_s25, %s7793_s2 }
  0x32   : > { %p7795_p12 = pnand %p7794_p11, %p8005_p5 }
  0x34   : > { %p7796_p13 = pneg %p7795_p12 }
  0x36   : > { %6878 = vmatmul.mubr.msk.bf16.gmra.mrb[4].mxu0 %vm764_vm0, %v7580_v8  ;;  %6894 = vmatmul.mubr.msk.bf16.gmra.mrb[4].mxu1 %vm764_vm0, %v7581_v9 }
  0x37   : > { %6881 = vmatprep.mubr.msk.bf16.mxu0 %vm764_vm0, %v7582_v10  ;;  %6897 = vmatprep.mubr.msk.bf16.mxu1 %vm764_vm0, %v7583_v11 }
  0x3e   : > { %6882 = vmatmul.mubr.msk.bf16.gmra.mrb[8].mxu0 %vm764_vm0, %v7584_v12  ;;  %6898 = vmatmul.mubr.msk.bf16.gmra.mrb[8].mxu1 %vm764_vm0, %v7585_v13 }
  0x3f   : > { %6885 = vmatprep.mubr.msk.bf16.mxu0 %vm764_vm0, %v7586_v14  ;;  %6901 = vmatprep.mubr.msk.bf16.mxu1 %vm764_vm0, %v7587_v15 }
  0x46   : > { %6886 = vmatmul.mubr.msk.bf16.gmra.mrb[12].mxu0 %vm764_vm0, %v7588_v16  ;;  %6902 = vmatmul.mubr.msk.bf16.gmra.mrb[12].mxu1 %vm764_vm0, %v7589_v17 }
  0x47   : > { %1141 = vmatprep.mubr.bf16.mxu1 %v7592_v18  ;;  %1353 = vmatprep.mubr.bf16.mxu0 %v7595_v19 }
 0x101   : > { %v6875_v21 = vpop.f32.mrb[0].mxu0  ;;  %v6891_v23 = vpop.f32.mrb[0].mxu1 }
 0x102   : > { %v856_v22 = vadd.f32 %v6875_v21, %v8069_v20  ;;  %v847_v24 = vpop.f32.mrb[1].mxu0  ;;  %v920_v25 = vadd.f32 %v6891_v23, %v8069_v20  ;;  %v911_v27 = vpop.f32.mrb[1].mxu1 }
 0x103   : > { %v848_v26 = vadd.f32 %v8069_v20, %v847_v24  ;;  %v6876_v28 = vpop.f32.mrb[2].mxu0  ;;  %v912_v30 = vadd.f32 %v8069_v20, %v911_v27  ;;  %v6892_v32 = vpop.f32.mrb[2].mxu1 }
 0x104   : > { %v976_v29 = vmul.f32 0.1, %v856_v22  ;;  %v859_v31 = vadd.f32 %v6876_v28, %v8069_v20  ;;  %v850_v33 = vpop.f32.mrb[3].mxu0  ;;  %v992_v34 = vmul.f32 0.1, %v920_v25  ;;  %v923_v36 = vadd.f32 %v6892_v32, %v8069_v20  ;;  %v914_v38 = vpop.f32.mrb[3].mxu1 }
 0x105   : > { %v974_v35 = vmul.f32 0.1, %v848_v26  ;;  %v851_v37 = vadd.f32 %v8069_v20, %v850_v33  ;;  %v990_v39 = vmul.f32 0.1, %v912_v30  ;;  %v915_v41 = vadd.f32 %v8069_v20, %v914_v38 }
 0x106   : > { %v977_v40 = vmul.f32 0.1, %v859_v31  ;;  %v993_v42 = vmul.f32 0.1, %v923_v36  ;;  %v1008_v44 = vmax.f32 %v856_v22, %v976_v29  ;;  %v1024_v47 = vmax.f32 %v920_v25, %v992_v34 }
 0x107   : > { %v975_v43 = vmul.f32 0.1, %v851_v37  ;;  %v991_v46 = vmul.f32 0.1, %v915_v41  ;;  %v1006_v48 = vmax.f32 %v848_v26, %v974_v35  ;;  %v1022_v52 = vmax.f32 %v912_v30, %v990_v39 }
 0x108   : > { %v1009_v45 = vmax.f32 %v859_v31, %v977_v40  ;;  %v1025_v49 = vmax.f32 %v923_v36, %v993_v42 }
 0x109   : > { %v1007_v50 = vmax.f32 %v851_v37, %v975_v43  ;;  %v6879_v51 = vpop.f32.mrb[4].mxu0  ;;  %v1023_v54 = vmax.f32 %v915_v41, %v991_v46  ;;  %v6895_v56 = vpop.f32.mrb[4].mxu1 }
 0x10a   : > { %v8079_v53 = vpack.c.bf16 %v1009_v45, %v1008_v44  ;;  %v872_v55 = vadd.f32 %v6879_v51, %v8069_v20  ;;  %v863_v57 = vpop.f32.mrb[5].mxu0  ;;  %v8082_v58 = vpack.c.bf16 %v1025_v49, %v1024_v47  ;;  %v936_v60 = vadd.f32 %v6895_v56, %v8069_v20  ;;  %v927_v62 = vpop.f32.mrb[5].mxu1 }
 0x10b   : > { %v8084_v59 = vpack.c.bf16 %v1007_v50, %v1006_v48  ;;  %v864_v61 = vadd.f32 %v8069_v20, %v863_v57  ;;  %v6880_v63 = vpop.f32.mrb[6].mxu0  ;;  %v8088_v0 = vpack.c.bf16 %v1023_v54, %v1022_v52  ;;  %v928_v2 = vadd.f32 %v8069_v20, %v927_v62  ;;  %v6896_v4 = vpop.f32.mrb[6].mxu1 }
 0x10c   : > { %v980_v1 = vmul.f32 0.1, %v872_v55  ;;  %v875_v3 = vadd.f32 %v6880_v63, %v8069_v20  ;;  %v866_v5 = vpop.f32.mrb[7].mxu0  ;;  %v996_v6 = vmul.f32 0.1, %v936_v60  ;;  %v939_v8 = vadd.f32 %v6896_v4, %v8069_v20  ;;  %v930_v10 = vpop.f32.mrb[7].mxu1 }
 0x10d   : > { %v978_v7 = vmul.f32 0.1, %v864_v61  ;;  %v867_v9 = vadd.f32 %v8069_v20, %v866_v5  ;;  %v994_v11 = vmul.f32 0.1, %v928_v2  ;;  %v931_v13 = vadd.f32 %v8069_v20, %v930_v10  ;;  %6310 = vmatprep.subr.bf16.mxu1 %v8088_v0  ;;  %6355 = vmatprep.subr.bf16.mxu0 %v8088_v0 }
 0x10e   : > { %v981_v12 = vmul.f32 0.1, %v875_v3  ;;  %v997_v14 = vmul.f32 0.1, %v939_v8  ;;  %6311 = vmatpush3.bf16.msra.mxu1 %v8084_v59  ;;  %6356 = vmatpush3.bf16.msra.mxu0 %v8084_v59  ;;  %v1012_v16 = vmax.f32 %v872_v55, %v980_v1  ;;  %v1028_v19 = vmax.f32 %v936_v60, %v996_v6 }
 0x10f   : > { %v979_v15 = vmul.f32 0.1, %v867_v9  ;;  %v995_v18 = vmul.f32 0.1, %v931_v13  ;;  %6312 = vmatprep.subr.bf16.mxu1 %v8082_v58  ;;  %6357 = vmatprep.subr.bf16.mxu0 %v8082_v58  ;;  %v1010_v21 = vmax.f32 %v864_v61, %v978_v7  ;;  %v1026_v25 = vmax.f32 %v928_v2, %v994_v11 }
 0x110   : > { %v1013_v17 = vmax.f32 %v875_v3, %v981_v12  ;;  %v1029_v22 = vmax.f32 %v939_v8, %v997_v14 }
 0x111   : > { %v1011_v23 = vmax.f32 %v867_v9, %v979_v15  ;;  %v6883_v24 = vpop.f32.mrb[8].mxu0  ;;  %v1027_v27 = vmax.f32 %v931_v13, %v995_v18  ;;  %v6899_v29 = vpop.f32.mrb[8].mxu1 }
 0x112   : > { %v8101_v26 = vpack.c.bf16 %v1013_v17, %v1012_v16  ;;  %v888_v28 = vadd.f32 %v6883_v24, %v8069_v20  ;;  %v879_v30 = vpop.f32.mrb[9].mxu0  ;;  %v8104_v31 = vpack.c.bf16 %v1029_v22, %v1028_v19  ;;  %v952_v33 = vadd.f32 %v6899_v29, %v8069_v20  ;;  %v943_v35 = vpop.f32.mrb[9].mxu1  ;;  %6313 = vmatpush3.bf16.msra.mxu1 %v8079_v53 }
 0x113   : > { %v8106_v32 = vpack.c.bf16 %v1011_v23, %v1010_v21  ;;  %v880_v34 = vadd.f32 %v8069_v20, %v879_v30  ;;  %v6884_v36 = vpop.f32.mrb[10].mxu0  ;;  %v8111_v37 = vpack.c.bf16 %v1027_v27, %v1026_v25  ;;  %v944_v39 = vadd.f32 %v8069_v20, %v943_v35  ;;  %6358 = vmatpush3.bf16.msra.mxu0 %v8079_v53  ;;  %v6900_v41 = vpop.f32.mrb[10].mxu1 }
 0x114   : > { %v984_v38 = vmul.f32 0.1, %v888_v28  ;;  %v891_v40 = vadd.f32 %v6884_v36, %v8069_v20  ;;  %v882_v42 = vpop.f32.mrb[11].mxu0  ;;  %v1000_v43 = vmul.f32 0.1, %v952_v33  ;;  %v955_v45 = vadd.f32 %v6900_v41, %v8069_v20  ;;  %v946_v47 = vpop.f32.mrb[11].mxu1 }
 0x115   : > { %v982_v44 = vmul.f32 0.1, %v880_v34  ;;  %v883_v46 = vadd.f32 %v8069_v20, %v882_v42  ;;  %v998_v48 = vmul.f32 0.1, %v944_v39  ;;  %v947_v50 = vadd.f32 %v8069_v20, %v946_v47  ;;  %6314 = vmatprep.subr.bf16.mxu1 %v8111_v37  ;;  %6359 = vmatprep.subr.bf16.mxu0 %v8111_v37  ;;  %v7593_v47 = vld [vmem:[%s9378_s28 + $0x40] ss:$8 sps:$4 sm:$0xff]  }
 0x116   : > { %v985_v49 = vmul.f32 0.1, %v891_v40  ;;  %v1001_v51 = vmul.f32 0.1, %v955_v45  ;;  %6315 = vmatpush3.bf16.msra.mxu1 %v8106_v32  ;;  %v1016_v54 = vmax.f32 %v888_v28, %v984_v38  ;;  %v1032_v57 = vmax.f32 %v952_v33, %v1000_v43 }
 0x117   : > { %v983_v52 = vmul.f32 0.1, %v883_v46  ;;  %v999_v56 = vmul.f32 0.1, %v947_v50  ;;  %6360 = vmatpush3.bf16.msra.mxu0 %v8106_v32  ;;  %6316 = vmatprep.subr.bf16.mxu1 %v8104_v31  ;;  %v1014_v60 = vmax.f32 %v880_v34, %v982_v44  ;;  %v1030_v1 = vmax.f32 %v944_v39, %v998_v48  ;;  %v7596_v48 = vld [vmem:[%s9378_s28 + $0x14] ss:$8 sps:$4 sm:$0xff]  }
 0x118   : > { %v1017_v55 = vmax.f32 %v891_v40, %v985_v49  ;;  %v1033_v61 = vmax.f32 %v955_v45, %v1001_v51  ;;  %6361 = vmatprep.subr.bf16.mxu0 %v8104_v31  ;;  %v7599_v49 = vld [vmem:[%s9378_s28 + $0x54] ss:$8 sps:$4 sm:$0xff]   ;;  %v7601_v51 = vld [vmem:[%s9378_s28 + $0x50] ss:$8 sps:$4 sm:$0xff]  }
 0x119   : > { %v1015_v62 = vmax.f32 %v883_v46, %v983_v52  ;;  %v6887_v63 = vpop.f32.mrb[12].mxu0  ;;  %v1031_v3 = vmax.f32 %v947_v50, %v999_v56  ;;  %v6903_v5 = vpop.f32.mrb[12].mxu1  ;;  %v7590_v46 = vld [vmem:[%s9378_s28] ss:$8 sps:$4 sm:$0xff]   ;;  %v7598_v50 = vld [vmem:[%s9378_s28 + $0x10] ss:$8 sps:$4 sm:$0xff]  }
 0x11a   : > { %v8125_v2 = vpack.c.bf16 %v1017_v55, %v1016_v54  ;;  %v904_v4 = vadd.f32 %v6887_v63, %v8069_v20  ;;  %v895_v6 = vpop.f32.mrb[13].mxu0  ;;  %v8128_v7 = vpack.c.bf16 %v1033_v61, %v1032_v57  ;;  %v968_v9 = vadd.f32 %v6903_v5, %v8069_v20  ;;  %v959_v11 = vpop.f32.mrb[13].mxu1  ;;  %6317 = vmatpush3.bf16.msra.mxu1 %v8101_v26  ;;  %v7602_v52 = vld [vmem:[%s9378_s28 + $0x24] ss:$8 sps:$4 sm:$0xff]   ;;  %v7604_v55 = vld [vmem:[%s9378_s28 + $0x20] ss:$8 sps:$4 sm:$0xff]  }
 0x11b   : > { %v8130_v8 = vpack.c.bf16 %v1015_v62, %v1014_v60  ;;  %v896_v10 = vadd.f32 %v8069_v20, %v895_v6  ;;  %v6888_v12 = vpop.f32.mrb[14].mxu0  ;;  %v8135_v13 = vpack.c.bf16 %v1031_v3, %v1030_v1  ;;  %v960_v15 = vadd.f32 %v8069_v20, %v959_v11  ;;  %6362 = vmatpush3.bf16.msra.mxu0 %v8101_v26  ;;  %v6904_v17 = vpop.f32.mrb[14].mxu1  ;;  %v7605_v54 = vld [vmem:[%s9378_s28 + $0x64] ss:$8 sps:$4 sm:$0xff]   ;;  %v7607_v56 = vld [vmem:[%s9378_s28 + $0x60] ss:$8 sps:$4 sm:$0xff]  }
 0x11c   : > { %v988_v14 = vmul.f32 0.1, %v904_v4  ;;  %v907_v16 = vadd.f32 %v6888_v12, %v8069_v20  ;;  %v898_v18 = vpop.f32.mrb[15].mxu0  ;;  %v1004_v19 = vmul.f32 0.1, %v968_v9  ;;  %v971_v22 = vadd.f32 %v6904_v17, %v8069_v20  ;;  %v962_v24 = vpop.f32.mrb[15].mxu1 }
 0x11d   : > { %v986_v21 = vmul.f32 0.1, %v896_v10  ;;  %v899_v23 = vadd.f32 %v8069_v20, %v898_v18  ;;  %v1002_v25 = vmul.f32 0.1, %v960_v15  ;;  %v963_v28 = vadd.f32 %v8069_v20, %v962_v24  ;;  %6318 = vmatprep.subr.bf16.mxu1 %v8135_v13  ;;  %6363 = vmatprep.subr.bf16.mxu0 %v8135_v13  ;;  %v7608_v57 = vld [vmem:[%s9378_s28 + $0x34] ss:$8 sps:$4 sm:$0xff]  }
 0x11e   : > { %v989_v27 = vmul.f32 0.1, %v907_v16  ;;  %v1005_v29 = vmul.f32 0.1, %v971_v22  ;;  %6319 = vmatpush3.bf16.msra.mxu1 %v8130_v8  ;;  %v1020_v33 = vmax.f32 %v904_v4, %v988_v14  ;;  %v1036_v36 = vmax.f32 %v968_v9, %v1004_v19  ;;  %v7611_v60 = vld [vmem:[%s9378_s28 + $0x74] ss:$8 sps:$4 sm:$0xff]  }
 0x11f   : > { %v987_v30 = vmul.f32 0.1, %v899_v23  ;;  %v1003_v35 = vmul.f32 0.1, %v963_v28  ;;  %6364 = vmatpush3.bf16.msra.mxu0 %v8130_v8  ;;  %6320 = vmatprep.subr.bf16.mxu1 %v8128_v7  ;;  %v1018_v38 = vmax.f32 %v896_v10, %v986_v21  ;;  %v1034_v20 = vmax.f32 %v960_v15, %v1002_v25  ;;  %v7610_v61 = vld [vmem:[%s9378_s28 + $0x30] ss:$8 sps:$4 sm:$0xff]  }
 0x120   : > { %v1021_v34 = vmax.f32 %v907_v16, %v989_v27  ;;  %v1037_v39 = vmax.f32 %v971_v22, %v1005_v29  ;;  %6365 = vmatprep.subr.bf16.mxu0 %v8128_v7  ;;  %v7613_v62 = vld [vmem:[%s9378_s28 + $0x70] ss:$8 sps:$4 sm:$0xff]   ;;  %v7616_v63 = vld [vmem:[%s9378_s28 + $0x84] ss:$8 sps:$4 sm:$0xff]   ;;  %v7614_v1 = vld [vmem:[%s9378_s28 + $0x80] ss:$8 sps:$4 sm:$0xff]  }
 0x121   : > { %v1019_v40 = vmax.f32 %v899_v23, %v987_v30  ;;  %v1035_v42 = vmax.f32 %v963_v28, %v1003_v35  ;;  %v7617_v3 = vld [vmem:[%s9378_s28 + $0x94] ss:$8 sps:$4 sm:$0xff]   ;;  %v7653_v4 = vld [vmem:[%s9381_s0] sm:$0xff]   ;;  %v7619_v5 = vld [vmem:[%s9378_s28 + $0x90] ss:$8 sps:$4 sm:$0xff]  }
 0x122   : > { %v8149_v41 = vpack.c.bf16 %v1021_v34, %v1020_v33  ;;  %v8151_v43 = vpack.c.bf16 %v1037_v39, %v1036_v36  ;;  %6321 = vmatpush3.bf16.msra.mxu1 %v8125_v2  ;;  %v7620_v6 = vld [vmem:[%s9378_s28 + $0xa4] ss:$8 sps:$4 sm:$0xff]   ;;  %v7622_v9 = vld [vmem:[%s9378_s28 + $0xa0] ss:$8 sps:$4 sm:$0xff]   ;;  %v7623_v10 = vld [vmem:[%s9378_s28 + $0xb4] ss:$8 sps:$4 sm:$0xff]  }
 0x123   : > { %v8153_v44 = vpack.c.bf16 %v1019_v40, %v1018_v38  ;;  %v8156_v45 = vpack.c.bf16 %v1035_v42, %v1034_v20  ;;  %6366 = vmatpush3.bf16.msra.mxu0 %v8125_v2  ;;  %v7625_v11 = vld [vmem:[%s9378_s28 + $0xb0] ss:$8 sps:$4 sm:$0xff]   ;;  %v7628_v12 = vld [vmem:[%s9378_s28 + $0x104] ss:$8 sps:$4 sm:$0xff]   ;;  %v7626_v14 = vld [vmem:[%s9378_s28 + $0x100] ss:$8 sps:$4 sm:$0xff]  }
 0x124   : > { %9380 = vst [vmem:[#allocation11_spill] sm:$0xff] %v8149_v41  ;;  %v7629_v15 = vld [vmem:[%s9378_s28 + $0x114] ss:$8 sps:$4 sm:$0xff]   ;;  %v7631_v16 = vld [vmem:[%s9378_s28 + $0x110] ss:$8 sps:$4 sm:$0xff]   ;;  %v8341_v30 = vld [vmem:[%s9381_s0 + $0x8] sm:$0xff]  }
 0x125   : > { %6322 = vmatprep.subr.bf16.mxu1 %v8156_v45  ;;  %6367 = vmatprep.subr.bf16.mxu0 %v8156_v45  ;;  %v7632_v17 = vld [vmem:[%s9378_s28 + $0x124] ss:$8 sps:$4 sm:$0xff]   ;;  %v7634_v18 = vld [vmem:[%s9378_s28 + $0x120] ss:$8 sps:$4 sm:$0xff]   ;;  %v7635_v19 = vld [vmem:[%s9378_s28 + $0x134] ss:$8 sps:$4 sm:$0xff]  }
 0x126   : > { %6323 = vmatpush3.bf16.msra.mxu1 %v8153_v44  ;;  %v7637_v21 = vld [vmem:[%s9378_s28 + $0x130] ss:$8 sps:$4 sm:$0xff]   ;;  %v7640_v22 = vld [vmem:[%s9378_s28 + $0x144] ss:$8 sps:$4 sm:$0xff]   ;;  %v7638_v23 = vld [vmem:[%s9378_s28 + $0x140] ss:$8 sps:$4 sm:$0xff]  }
 0x127   : > { %6368 = vmatpush3.bf16.msra.mxu0 %v8153_v44  ;;  %6324 = vmatprep.subr.bf16.mxu1 %v8151_v43  ;;  %v7641_v24 = vld [vmem:[%s9378_s28 + $0x154] ss:$8 sps:$4 sm:$0xff]   ;;  %v7643_v25 = vld [vmem:[%s9378_s28 + $0x150] ss:$8 sps:$4 sm:$0xff]   ;;  %v7644_v27 = vld [vmem:[%s9378_s28 + $0x164] ss:$8 sps:$4 sm:$0xff]  }
 0x128   : > { %6369 = vmatprep.subr.bf16.mxu0 %v8151_v43  ;;  %v7646_v28 = vld [vmem:[%s9378_s28 + $0x160] ss:$8 sps:$4 sm:$0xff]   ;;  %v7647_v29 = vld [vmem:[%s9378_s28 + $0x174] ss:$8 sps:$4 sm:$0xff]   ;;  %v7649_v33 = vld [vmem:[%s9378_s28 + $0x170] ss:$8 sps:$4 sm:$0xff]  }
 0x129   : > { %v7652_v34 = vld [vmem:[%s9378_s28 + $0x184] ss:$8 sps:$4 sm:$0xff]   ;;  %v7650_v35 = vld [vmem:[%s9378_s28 + $0x180] ss:$8 sps:$4 sm:$0xff]   ;;  %v7668_v36 = vld [vmem:[%s9378_s28 + $0x194] ss:$8 sps:$4 sm:$0xff]  }
 0x12a   : > { %6325 = vmatpush3.bf16.msra.mxu1 %v8149_v41  ;;  %v7670_v38 = vld [vmem:[%s9378_s28 + $0x190] ss:$8 sps:$4 sm:$0xff]   ;;  %v7671_v39 = vld [vmem:[%s9378_s28 + $0x1a4] ss:$8 sps:$4 sm:$0xff]   ;;  %v7673_v40 = vld [vmem:[%s9378_s28 + $0x1a0] ss:$8 sps:$4 sm:$0xff]  }
 0x12b   : > { %6370 = vmatpush3.bf16.msra.mxu0 %v8149_v41  ;;  %6905 = vmatprep.subr.bf16.mxu1 %v7653_v4  ;;  %v7674_v20 = vld [vmem:[%s9378_s28 + $0x1b4] ss:$8 sps:$4 sm:$0xff]   ;;  %v7676_v42 = vld [vmem:[%s9378_s28 + $0x1b0] ss:$8 sps:$4 sm:$0xff]  }
 0x12c   : > { %6400 = vmatprep.subr.bf16.mxu0 %v8088_v0 }
 0x12d   : > { %1142 = vmatmul.mubr.bf16.vlgmr.msra.gmra.mrb[16].mxu1 %v7590_v46 }
 0x12e   : > { %1354 = vmatmul.mubr.bf16.vlgmr.msra.gmra.mrb[16].mxu0 %v7593_v47  ;;  %1149 = vmatprep.mubr.bf16.mxu1 %v7596_v48  ;;  %v7679_v47 = vld [vmem:[%s9378_s28 + $0x1c4] ss:$8 sps:$4 sm:$0xff]  }
 0x12f   : > { %6401 = vmatpush3.bf16.msra.mxu0 %v8084_v59  ;;  %1361 = vmatprep.mubr.bf16.mxu0 %v7599_v49 }
 0x130   : > { %6402 = vmatprep.subr.bf16.mxu0 %v8082_v58  ;;  %6906 = vmatpush3.bf16.msra.mxu1 %v7653_v4  ;;  %v7680_v4 = vld [vmem:[%s9378_s28 + $0x1d4] ss:$8 sps:$4 sm:$0xff]  }
 0x131   : > { %6915 = vmatprep.subr.bf16.mxu1 %v8341_v30 }
 0x133   : > { %6403 = vmatpush3.bf16.msra.mxu0 %v8079_v53 }
 0x134   : > { %6404 = vmatprep.subr.bf16.mxu0 %v8111_v37 }
 0x135   : > { %1150 = vmatmul.mubr.bf16.gmra.mrb[20].mxu1 %v7598_v50 }
 0x136   : > { %1362 = vmatmul.mubr.bf16.gmra.mrb[20].mxu0 %v7601_v51  ;;  %1157 = vmatprep.mubr.bf16.mxu1 %v7602_v52 }
 0x137   : > { %6405 = vmatpush3.bf16.msra.mxu0 %v8106_v32  ;;  %1369 = vmatprep.mubr.bf16.mxu0 %v7605_v54 }
 0x138   : > { %6406 = vmatprep.subr.bf16.mxu0 %v8104_v31 }
 0x13b   : > { %6407 = vmatpush3.bf16.msra.mxu0 %v8101_v26 }
 0x13c   : > { %6408 = vmatprep.subr.bf16.mxu0 %v8135_v13 }
 0x13d   : > { %1158 = vmatmul.mubr.bf16.gmra.mrb[24].mxu1 %v7604_v55 }
 0x13e   : > { %1370 = vmatmul.mubr.bf16.gmra.mrb[24].mxu0 %v7607_v56  ;;  %1165 = vmatprep.mubr.bf16.mxu1 %v7608_v57 }
 0x13f   : > { %6409 = vmatpush3.bf16.msra.mxu0 %v8130_v8  ;;  %1377 = vmatprep.mubr.bf16.mxu0 %v7611_v60 }
 0x140   : > { %6410 = vmatprep.subr.bf16.mxu0 %v8128_v7 }
 0x143   : > { %6411 = vmatpush3.bf16.msra.mxu0 %v8125_v2 }
 0x144   : > { %6412 = vmatprep.subr.bf16.mxu0 %v8156_v45 }
 0x145   : > { %1166 = vmatmul.mubr.bf16.gmra.mrb[28].mxu1 %v7610_v61 }
 0x146   : > { %1378 = vmatmul.mubr.bf16.gmra.mrb[28].mxu0 %v7613_v62 }
 0x147   : > { %6413 = vmatpush3.bf16.msra.mxu0 %v8153_v44  ;;  %1565 = vmatprep.mubr.bf16.mxu0 %v7616_v63 }
 0x148   : > { %6414 = vmatprep.subr.bf16.mxu0 %v8151_v43 }
 0x14b   : > { %6415 = vmatpush3.bf16.msra.mxu0 %v8149_v41 }
 0x14c   : > { %6490 = vmatprep.subr.bf16.mxu0 %v8088_v0 }
 0x14e   : > { %1566 = vmatmul.mubr.bf16.vlgmr.msra.gmra.mrb[32].mxu0 %v7614_v1  ;;  %v7677_v1 = vld [vmem:[%s9378_s28 + $0x1c0] ss:$8 sps:$4 sm:$0xff]  }
 0x14f   : > { %6491 = vmatpush3.bf16.msra.mxu0 %v8084_v59  ;;  %1573 = vmatprep.mubr.bf16.mxu0 %v7617_v3 }
 0x150   : > { %6492 = vmatprep.subr.bf16.mxu0 %v8082_v58 }
 0x153   : > { %6493 = vmatpush3.bf16.msra.mxu0 %v8079_v53 }
 0x154   : > { %6494 = vmatprep.subr.bf16.mxu0 %v8111_v37 }
 0x156   : > { %1574 = vmatmul.mubr.bf16.gmra.mrb[36].mxu0 %v7619_v5 }
 0x157   : > { %6495 = vmatpush3.bf16.msra.mxu0 %v8106_v32  ;;  %1581 = vmatprep.mubr.bf16.mxu0 %v7620_v6 }
 0x158   : > { %6496 = vmatprep.subr.bf16.mxu0 %v8104_v31 }
 0x15b   : > { %6497 = vmatpush3.bf16.msra.mxu0 %v8101_v26 }
 0x15c   : > { %6498 = vmatprep.subr.bf16.mxu0 %v8135_v13 }
 0x15e   : > { %1582 = vmatmul.mubr.bf16.gmra.mrb[40].mxu0 %v7622_v9 }
 0x15f   : > { %6499 = vmatpush3.bf16.msra.mxu0 %v8130_v8  ;;  %1589 = vmatprep.mubr.bf16.mxu0 %v7623_v10 }
 0x160   : > { %6500 = vmatprep.subr.bf16.mxu0 %v8128_v7 }
 0x163   : > { %6501 = vmatpush3.bf16.msra.mxu0 %v8125_v2 }
 0x164   : > { %6502 = vmatprep.subr.bf16.mxu0 %v8156_v45 }
 0x166   : > { %1590 = vmatmul.mubr.bf16.gmra.mrb[44].mxu0 %v7625_v11 }
 0x167   : > { %6503 = vmatpush3.bf16.msra.mxu0 %v8153_v44  ;;  %1989 = vmatprep.mubr.bf16.mxu0 %v7628_v12 }
 0x168   : > { %6504 = vmatprep.subr.bf16.mxu0 %v8151_v43 }
 0x16b   : > { %6505 = vmatpush3.bf16.msra.mxu0 %v8149_v41 }
 0x16c   : > { %6535 = vmatprep.subr.bf16.mxu0 %v8088_v0 }
 0x16e   : > { %1990 = vmatmul.mubr.bf16.vlgmr.msra.gmra.mrb[48].mxu0 %v7626_v14 }
 0x16f   : > { %6536 = vmatpush3.bf16.msra.mxu0 %v8084_v59  ;;  %1997 = vmatprep.mubr.bf16.mxu0 %v7629_v15 }
 0x170   : > { %6537 = vmatprep.subr.bf16.mxu0 %v8082_v58 }
 0x173   : > { %6538 = vmatpush3.bf16.msra.mxu0 %v8079_v53 }
 0x174   : > { %6539 = vmatprep.subr.bf16.mxu0 %v8111_v37 }
 0x176   : > { %1998 = vmatmul.mubr.bf16.gmra.mrb[52].mxu0 %v7631_v16 }
 0x177   : > { %6540 = vmatpush3.bf16.msra.mxu0 %v8106_v32  ;;  %2005 = vmatprep.mubr.bf16.mxu0 %v7632_v17 }
 0x178   : > { %6541 = vmatprep.subr.bf16.mxu0 %v8104_v31 }
 0x17b   : > { %6542 = vmatpush3.bf16.msra.mxu0 %v8101_v26 }
 0x17c   : > { %6543 = vmatprep.subr.bf16.mxu0 %v8135_v13 }
 0x17e   : > { %2006 = vmatmul.mubr.bf16.gmra.mrb[56].mxu0 %v7634_v18 }
 0x17f   : > { %6544 = vmatpush3.bf16.msra.mxu0 %v8130_v8  ;;  %2013 = vmatprep.mubr.bf16.mxu0 %v7635_v19 }
 0x180   : > { %6545 = vmatprep.subr.bf16.mxu0 %v8128_v7 }
 0x183   : > { %6546 = vmatpush3.bf16.msra.mxu0 %v8125_v2 }
 0x184   : > { %6547 = vmatprep.subr.bf16.mxu0 %v8156_v45 }
 0x186   : > { %2014 = vmatmul.mubr.bf16.gmra.mrb[60].mxu0 %v7637_v21  ;;  %v7655_v21 = vld [vmem:[%s9381_s0 + $0x10] sm:$0xff]  }
 0x187   : > { %6548 = vmatpush3.bf16.msra.mxu0 %v8153_v44  ;;  %2201 = vmatprep.mubr.bf16.mxu0 %v7640_v22 }
 0x188   : > { %6549 = vmatprep.subr.bf16.mxu0 %v8151_v43 }
 0x18b   : > { %6550 = vmatpush3.bf16.msra.mxu0 %v8149_v41 }
 0x18c   : > { %6580 = vmatprep.subr.bf16.mxu0 %v8088_v0 }
 0x18e   : > { %2202 = vmatmul.mubr.bf16.vlgmr.msra.gmra.mrb[64].mxu0 %v7638_v23  ;;  %v7682_v23 = vld [vmem:[%s9378_s28 + $0x1d0] ss:$8 sps:$4 sm:$0xff]  }
 0x18f   : > { %6581 = vmatpush3.bf16.msra.mxu0 %v8084_v59  ;;  %2209 = vmatprep.mubr.bf16.mxu0 %v7641_v24 }
 0x190   : > { %6582 = vmatprep.subr.bf16.mxu0 %v8082_v58 }
 0x193   : > { %6583 = vmatpush3.bf16.msra.mxu0 %v8079_v53 }
 0x194   : > { %6584 = vmatprep.subr.bf16.mxu0 %v8111_v37 }
 0x196   : > { %2210 = vmatmul.mubr.bf16.gmra.mrb[68].mxu0 %v7643_v25  ;;  %v7683_v25 = vld [vmem:[%s9378_s28 + $0x1e4] ss:$8 sps:$4 sm:$0xff]  }
 0x197   : > { %6585 = vmatpush3.bf16.msra.mxu0 %v8106_v32  ;;  %2217 = vmatprep.mubr.bf16.mxu0 %v7644_v27 }
 0x198   : > { %6586 = vmatprep.subr.bf16.mxu0 %v8104_v31 }
 0x19b   : > { %6587 = vmatpush3.bf16.msra.mxu0 %v8101_v26 }
 0x19c   : > { %6588 = vmatprep.subr.bf16.mxu0 %v8135_v13 }
 0x19e   : > { %2218 = vmatmul.mubr.bf16.gmra.mrb[72].mxu0 %v7646_v28 }
 0x19f   : > { %6589 = vmatpush3.bf16.msra.mxu0 %v8130_v8  ;;  %2225 = vmatprep.mubr.bf16.mxu0 %v7647_v29 }
 0x1a0   : > { %6590 = vmatprep.subr.bf16.mxu0 %v8128_v7 }
 0x1a3   : > { %6591 = vmatpush3.bf16.msra.mxu0 %v8125_v2 }
 0x1a4   : > { %6592 = vmatprep.subr.bf16.mxu0 %v8156_v45 }
 0x1a6   : > { %2226 = vmatmul.mubr.bf16.gmra.mrb[76].mxu0 %v7649_v33 }
 0x1a7   : > { %6593 = vmatpush3.bf16.msra.mxu0 %v8153_v44  ;;  %2413 = vmatprep.mubr.bf16.mxu0 %v7652_v34 }
 0x1a8   : > { %6594 = vmatprep.subr.bf16.mxu0 %v8151_v43 }
 0x1ab   : > { %6595 = vmatpush3.bf16.msra.mxu0 %v8149_v41 }
 0x1ac   : > { %6625 = vmatprep.subr.bf16.mxu0 %v8088_v0 }
 0x1ae   : > { %2414 = vmatmul.mubr.bf16.vlgmr.msra.gmra.mrb[80].mxu0 %v7650_v35 }
 0x1af   : > { %6626 = vmatpush3.bf16.msra.mxu0 %v8084_v59  ;;  %2421 = vmatprep.mubr.bf16.mxu0 %v7668_v36 }
 0x1b0   : > { %6627 = vmatprep.subr.bf16.mxu0 %v8082_v58 }
 0x1b3   : > { %6628 = vmatpush3.bf16.msra.mxu0 %v8079_v53 }
 0x1b4   : > { %6629 = vmatprep.subr.bf16.mxu0 %v8111_v37 }
 0x1b6   : > { %2422 = vmatmul.mubr.bf16.gmra.mrb[84].mxu0 %v7670_v38 }
 0x1b7   : > { %6630 = vmatpush3.bf16.msra.mxu0 %v8106_v32  ;;  %2429 = vmatprep.mubr.bf16.mxu0 %v7671_v39 }
 0x1b8   : > { %6631 = vmatprep.subr.bf16.mxu0 %v8104_v31 }
 0x1bb   : > { %6632 = vmatpush3.bf16.msra.mxu0 %v8101_v26 }
 0x1bc   : > { %6633 = vmatprep.subr.bf16.mxu0 %v8135_v13 }
 0x1be   : > { %2430 = vmatmul.mubr.bf16.gmra.mrb[88].mxu0 %v7673_v40 }
 0x1bf   : > { %6634 = vmatpush3.bf16.msra.mxu0 %v8130_v8  ;;  %2437 = vmatprep.mubr.bf16.mxu0 %v7674_v20 }
 0x1c0   : > { %6635 = vmatprep.subr.bf16.mxu0 %v8128_v7 }
 0x1c3   : > { %6636 = vmatpush3.bf16.msra.mxu0 %v8125_v2 }
 0x1c4   : > { %6637 = vmatprep.subr.bf16.mxu0 %v8156_v45 }
 0x1c6   : > { %2438 = vmatmul.mubr.bf16.gmra.mrb[92].mxu0 %v7676_v42 }
 0x1c7   : > { %6638 = vmatpush3.bf16.msra.mxu0 %v8153_v44  ;;  %2625 = vmatprep.mubr.bf16.mxu0 %v7679_v47  ;;  %v7685_v47 = vld [vmem:[%s9378_s28 + $0x1e0] ss:$8 sps:$4 sm:$0xff]  }
 0x1c8   : > { %6639 = vmatprep.subr.bf16.mxu0 %v8151_v43 }
 0x1cb   : > { %6640 = vmatpush3.bf16.msra.mxu0 %v8149_v41 }
 0x1ce   : > { %2626 = vmatmul.mubr.bf16.vlgmr.msra.gmra.mrb[96].mxu0 %v7677_v1 }
 0x1cf   : > { %2633 = vmatprep.mubr.bf16.mxu0 %v7680_v4 }
 0x1d6   : > { %2634 = vmatmul.mubr.bf16.gmra.mrb[100].mxu0 %v7682_v23 }
 0x1d7   : > { %2641 = vmatprep.mubr.bf16.mxu0 %v7683_v25 }
 0x1de   : > { %2642 = vmatmul.mubr.bf16.gmra.mrb[104].mxu0 %v7685_v47 }
 0x200   : > { %v6326_v46 = vpop.f32.mrb[16].mxu1 }
 0x201   : > { %v6327_v48 = vpop.f32.mrb[17].mxu1  ;;  %v6371_v49 = vpop.f32.mrb[16].mxu0 }
 0x202   : > { %v6328_v50 = vadd.f32 %v6327_v48, %v6326_v46  ;;  %v6329_v51 = vpop.f32.mrb[18].mxu1  ;;  %v6372_v52 = vpop.f32.mrb[17].mxu0 }
 0x203   : > { %v6330_v54 = vpop.f32.mrb[19].mxu1  ;;  %v8397_v55 = vadd.f32 %v6372_v52, %v6371_v49  ;;  %v6374_v56 = vpop.f32.mrb[18].mxu0 }
 0x204   : > { %v6331_v57 = vadd.f32 %v6330_v54, %v6329_v51  ;;  %v6375_v60 = vpop.f32.mrb[19].mxu0 }
 0x205   : > { %v8399_v61 = vadd.f32 %v6375_v60, %v6374_v56 }
 0x206   : > { %v1174_v62 = vpack.c.bf16 %v6331_v57, %v6328_v50 }
 0x207   : > { %v1386_v63 = vpack.c.bf16 %v8399_v61, %v8397_v55 }
 0x208   : > { %v6332_v3 = vpop.f32.mrb[20].mxu1  ;;  %6907 = vmatprep.mubr.msk.bf16.mxu1 %vm1186_vm1, %v1174_v62 }
 0x209   : > { %v6333_v5 = vpop.f32.mrb[21].mxu1  ;;  %v6377_v6 = vpop.f32.mrb[20].mxu0 }
 0x20a   : > { %v6334_v9 = vadd.f32 %v6333_v5, %v6332_v3  ;;  %v6335_v10 = vpop.f32.mrb[22].mxu1  ;;  %v6378_v11 = vpop.f32.mrb[21].mxu0 }
 0x20b   : > { %v6336_v12 = vpop.f32.mrb[23].mxu1  ;;  %v6379_v14 = vadd.f32 %v6378_v11, %v6377_v6  ;;  %v6380_v15 = vpop.f32.mrb[22].mxu0  ;;  %v7688_v6 = vld [vmem:[%s9378_s28 + $0x1f0] ss:$8 sps:$4 sm:$0xff]  }
 0x20c   : > { %v6337_v16 = vadd.f32 %v6336_v12, %v6335_v10  ;;  %v6381_v17 = vpop.f32.mrb[23].mxu0 }
 0x20d   : > { %v6382_v18 = vadd.f32 %v6381_v17, %v6380_v15 }
 0x20e   : > { %v1175_v19 = vpack.c.bf16 %v6337_v16, %v6334_v9 }
 0x20f   : > { %v1387_v22 = vpack.c.bf16 %v6382_v18, %v6379_v14 }
 0x210   : > { %v6338_v24 = vpop.f32.mrb[24].mxu1  ;;  %6908 = vmatmul.mubr.msk.bf16.vlgmr.msra.gmra.mrb[32].mxu1 %vm1186_vm1, %v1175_v19 }
 0x211   : > { %v6339_v27 = vpop.f32.mrb[25].mxu1  ;;  %v6383_v28 = vpop.f32.mrb[24].mxu0  ;;  %6916 = vmatpush3.bf16.msra.mxu1 %v8341_v30  ;;  %v7686_v30 = vld [vmem:[%s9378_s28 + $0x1f4] ss:$8 sps:$4 sm:$0xff]  }
 0x212   : > { %v6340_v29 = vadd.f32 %v6339_v27, %v6338_v24  ;;  %v6341_v33 = vpop.f32.mrb[26].mxu1  ;;  %v6384_v34 = vpop.f32.mrb[25].mxu0  ;;  %6925 = vmatprep.subr.bf16.mxu1 %v7655_v21  ;;  %2649 = vmatprep.mubr.bf16.mxu0 %v7686_v30 }
 0x213   : > { %v6342_v35 = vpop.f32.mrb[27].mxu1  ;;  %v6385_v36 = vadd.f32 %v6384_v34, %v6383_v28  ;;  %v6386_v38 = vpop.f32.mrb[26].mxu0  ;;  %2650 = vmatmul.mubr.bf16.gmra.mrb[108].mxu0 %v7688_v6 }
 0x214   : > { %v6343_v39 = vadd.f32 %v6342_v35, %v6341_v33  ;;  %v6387_v40 = vpop.f32.mrb[27].mxu0 }
 0x215   : > { %v6388_v20 = vadd.f32 %v6387_v40, %v6386_v38 }
 0x216   : > { %v1176_v42 = vpack.c.bf16 %v6343_v39, %v6340_v29 }
 0x217   : > { %v1388_v46 = vpack.c.bf16 %v6388_v20, %v6385_v36  ;;  %v7658_v20 = vld [vmem:[%s9378_s28 + $0xc4] ss:$8 sps:$4 sm:$0xff]  }
 0x218   : > { %v6344_v48 = vpop.f32.mrb[28].mxu1  ;;  %6911 = vmatprep.mubr.msk.bf16.mxu1 %vm1186_vm1, %v1176_v42 }
 0x219   : > { %v6345_v49 = vpop.f32.mrb[29].mxu1  ;;  %v6389_v50 = vpop.f32.mrb[28].mxu0 }
 0x21a   : > { %v6346_v51 = vadd.f32 %v6345_v49, %v6344_v48  ;;  %v6347_v52 = vpop.f32.mrb[30].mxu1  ;;  %v6390_v54 = vpop.f32.mrb[29].mxu0 }
 0x21b   : > { %v6348_v56 = vpop.f32.mrb[31].mxu1  ;;  %v6391_v57 = vadd.f32 %v6390_v54, %v6389_v50  ;;  %v6392_v60 = vpop.f32.mrb[30].mxu0 }
 0x21c   : > { %v6349_v62 = vadd.f32 %v6348_v56, %v6347_v52  ;;  %v6393_v1 = vpop.f32.mrb[31].mxu0 }
 0x21d   : > { %v6394_v3 = vadd.f32 %v6393_v1, %v6392_v60 }
 0x21e   : > { %v1177_v4 = vpack.c.bf16 %v6349_v62, %v6346_v51 }
 0x21f   : > { %v1389_v5 = vpack.c.bf16 %v6394_v3, %v6391_v57 }
 0x220   : > { %6912 = vmatmul.mubr.msk.bf16.gmra.mrb[36].mxu1 %vm1186_vm1, %v1177_v4  ;;  %v7689_v4 = vld [vmem:[%s9381_s0 + $0x18] sm:$0xff]  }
 0x221   : > { %6917 = vmatprep.mubr.msk.bf16.mxu1 %vm1186_vm1, %v1386_v63  ;;  %v6416_v9 = vpop.f32.mrb[32].mxu0 }
 0x222   : > { %v6417_v10 = vpop.f32.mrb[33].mxu0 }
 0x223   : > { %v6418_v11 = vadd.f32 %v6417_v10, %v6416_v9  ;;  %v6419_v12 = vpop.f32.mrb[34].mxu0  ;;  %v7656_v9 = vld [vmem:[%s9378_s28 + $0xc0] ss:$8 sps:$4 sm:$0xff]  }
 0x224   : > { %v6420_v14 = vpop.f32.mrb[35].mxu0 }
 0x225   : > { %v6421_v15 = vadd.f32 %v6420_v14, %v6419_v12 }
 0x227   : > { %v1598_v16 = vpack.c.bf16 %v6421_v15, %v6418_v11  ;;  %v7659_v11 = vld [vmem:[%s9378_s28 + $0xd4] ss:$8 sps:$4 sm:$0xff]  }
 0x228   : > { %6918 = vmatmul.mubr.msk.bf16.vlgmr.msra.gmra.mrb[32].mxu1 %vm1186_vm1, %v1387_v22 }
 0x229   : > { %6926 = vmatpush3.bf16.msra.mxu1 %v7655_v21  ;;  %6921 = vmatprep.mubr.msk.bf16.mxu1 %vm1186_vm1, %v1388_v46  ;;  %v6422_v17 = vpop.f32.mrb[36].mxu0 }
 0x22a   : > { %6445 = vmatprep.subr.bf16.mxu1 %v8088_v0  ;;  %v6423_v18 = vpop.f32.mrb[37].mxu0 }
 0x22b   : > { %v6424_v55 = vadd.f32 %v6423_v18, %v6422_v17  ;;  %v6425_v61 = vpop.f32.mrb[38].mxu0 }
 0x22c   : > { %v6426_v63 = vpop.f32.mrb[39].mxu0 }
 0x22d   : > { %v6427_v19 = vadd.f32 %v6426_v63, %v6425_v61  ;;  %v7662_v61 = vld [vmem:[%s9378_s28 + $0xe4] ss:$8 sps:$4 sm:$0xff]   ;;  %v7664_v63 = vld [vmem:[%s9378_s28 + $0xe0] ss:$8 sps:$4 sm:$0xff]  }
 0x22f   : > { %v1599_v23 = vpack.c.bf16 %v6427_v19, %v6424_v55  ;;  %v7661_v55 = vld [vmem:[%s9378_s28 + $0xd0] ss:$8 sps:$4 sm:$0xff]   ;;  %v7665_v19 = vld [vmem:[%s9378_s28 + $0xf4] ss:$8 sps:$4 sm:$0xff]  }
 0x230   : > { %6922 = vmatmul.mubr.msk.bf16.gmra.mrb[36].mxu1 %vm1186_vm1, %v1389_v5 }
 0x231   : > { %6927 = vmatprep.mubr.msk.bf16.mxu1 %vm1186_vm1, %v1598_v16  ;;  %v6428_v24 = vpop.f32.mrb[40].mxu0 }
 0x232   : > { %v6429_v25 = vpop.f32.mrb[41].mxu0 }
 0x233   : > { %v6430_v27 = vadd.f32 %v6429_v25, %v6428_v24  ;;  %v6431_v22 = vpop.f32.mrb[42].mxu0 }
 0x234   : > { %v6432_v21 = vpop.f32.mrb[43].mxu0 }
 0x235   : > { %v6433_v28 = vadd.f32 %v6432_v21, %v6431_v22 }
 0x237   : > { %v1600_v29 = vpack.c.bf16 %v6433_v28, %v6430_v27 }
 0x238   : > { %6928 = vmatmul.mubr.msk.bf16.vlgmr.msra.gmra.mrb[32].mxu1 %vm1186_vm1, %v1599_v23  ;;  %v7667_v23 = vld [vmem:[%s9378_s28 + $0xf0] ss:$8 sps:$4 sm:$0xff]  }
 0x239   : > { %6446 = vmatpush3.bf16.msra.mxu1 %v8084_v59  ;;  %v6434_v33 = vpop.f32.mrb[44].mxu0  ;;  %6931 = vmatprep.mubr.msk.bf16.mxu1 %vm1186_vm1, %v1600_v29 }
 0x23a   : > { %6447 = vmatprep.subr.bf16.mxu1 %v8082_v58  ;;  %v6435_v34 = vpop.f32.mrb[45].mxu0 }
 0x23b   : > { %v6436_v35 = vadd.f32 %v6435_v34, %v6434_v33  ;;  %v6437_v36 = vpop.f32.mrb[46].mxu0 }
 0x23c   : > { %v6438_v38 = vpop.f32.mrb[47].mxu0 }
 0x23d   : > { %6448 = vmatpush3.bf16.msra.mxu1 %v8079_v53  ;;  %v6439_v39 = vadd.f32 %v6438_v38, %v6437_v36 }
 0x23e   : > { %6449 = vmatprep.subr.bf16.mxu1 %v8111_v37 }
 0x23f   : > { %v1601_v40 = vpack.c.bf16 %v6439_v39, %v6436_v35 }
 0x241   : > { %6450 = vmatpush3.bf16.msra.mxu1 %v8106_v32  ;;  %v6506_v42 = vpop.f32.mrb[48].mxu0 }
 0x242   : > { %6451 = vmatprep.subr.bf16.mxu1 %v8104_v31  ;;  %6932 = vmatmul.mubr.msk.bf16.gmra.mrb[36].mxu1 %vm1186_vm1, %v1601_v40  ;;  %v6507_v46 = vpop.f32.mrb[49].mxu0 }
 0x243   : > { %1777 = vmatprep.mubr.bf16.mxu1 %v7658_v20  ;;  %v8453_v47 = vadd.f32 %v6507_v46, %v6506_v42  ;;  %v6509_v48 = vpop.f32.mrb[50].mxu0 }
 0x244   : > { %v6510_v30 = vpop.f32.mrb[51].mxu0 }
 0x245   : > { %6452 = vmatpush3.bf16.msra.mxu1 %v8101_v26  ;;  %v8456_v49 = vadd.f32 %v6510_v30, %v6509_v48 }
 0x246   : > { %6453 = vmatprep.subr.bf16.mxu1 %v8135_v13 }
 0x249   : > { %6454 = vmatpush3.bf16.msra.mxu1 %v8130_v8  ;;  %v6512_v51 = vpop.f32.mrb[52].mxu0 }
 0x24a   : > { %6455 = vmatprep.subr.bf16.mxu1 %v8128_v7  ;;  %v6513_v52 = vpop.f32.mrb[53].mxu0 }
 0x24b   : > { %v8463_v54 = vadd.f32 %v6513_v52, %v6512_v51  ;;  %v6515_v56 = vpop.f32.mrb[54].mxu0 }
 0x24c   : > { %v6516_v57 = vpop.f32.mrb[55].mxu0 }
 0x24d   : > { %6456 = vmatpush3.bf16.msra.mxu1 %v8125_v2  ;;  %v8466_v60 = vadd.f32 %v6516_v57, %v6515_v56 }
 0x24e   : > { %6457 = vmatprep.subr.bf16.mxu1 %v8156_v45 }
 0x251   : > { %6458 = vmatpush3.bf16.msra.mxu1 %v8153_v44  ;;  %v6518_v1 = vpop.f32.mrb[56].mxu0 }
 0x252   : > { %6459 = vmatprep.subr.bf16.mxu1 %v8151_v43  ;;  %v6519_v3 = vpop.f32.mrb[57].mxu0 }
 0x253   : > { %v8476_v5 = vadd.f32 %v6519_v3, %v6518_v1  ;;  %v6521_v6 = vpop.f32.mrb[58].mxu0 }
 0x254   : > { %v6522_v10 = vpop.f32.mrb[59].mxu0 }
 0x255   : > { %6460 = vmatpush3.bf16.msra.mxu1 %v8149_v41  ;;  %v8485_v12 = vadd.f32 %v6522_v10, %v6521_v6 }
 0x256   : > { %6935 = vmatprep.subr.bf16.mxu1 %v7689_v4 }
 0x258   : > { %1778 = vmatmul.mubr.bf16.vlgmr.msra.gmra.mrb[40].mxu1 %v7656_v9 }
 0x259   : > { %1785 = vmatprep.mubr.bf16.mxu1 %v7659_v11  ;;  %6936 = vmatpush3.bf16.msra.mxu1 %v7689_v4  ;;  %v6524_v15 = vpop.f32.mrb[60].mxu0  ;;  %v8531_v4 = vld [vmem:[%s9381_s0 + $0x20] sm:$0xff]  }
 0x25a   : > { %v6525_v16 = vpop.f32.mrb[61].mxu0  ;;  %6945 = vmatprep.subr.bf16.mxu1 %v8531_v4 }
 0x25b   : > { %v8489_v17 = vadd.f32 %v6525_v16, %v6524_v15  ;;  %v6527_v18 = vpop.f32.mrb[62].mxu0 }
 0x25c   : > { %v6528_v24 = vpop.f32.mrb[63].mxu0 }
 0x25d   : > { %v8506_v25 = vadd.f32 %v6528_v24, %v6527_v18 }
 0x260   : > { %1786 = vmatmul.mubr.bf16.gmra.mrb[44].mxu1 %v7661_v55 }
 0x261   : > { %1793 = vmatprep.mubr.bf16.mxu1 %v7662_v61  ;;  %v6551_v22 = vpop.f32.mrb[64].mxu0 }
 0x262   : > { %v6552_v21 = vpop.f32.mrb[65].mxu0 }
 0x263   : > { %v8510_v28 = vadd.f32 %v6552_v21, %v6551_v22  ;;  %v6554_v29 = vpop.f32.mrb[66].mxu0 }
 0x264   : > { %v6555_v33 = vpop.f32.mrb[67].mxu0 }
 0x265   : > { %v8512_v34 = vadd.f32 %v6555_v33, %v6554_v29 }
 0x268   : > { %1794 = vmatmul.mubr.bf16.gmra.mrb[48].mxu1 %v7664_v63 }
 0x269   : > { %1801 = vmatprep.mubr.bf16.mxu1 %v7665_v19  ;;  %v6557_v36 = vpop.f32.mrb[68].mxu0 }
 0x26a   : > { %v6558_v38 = vpop.f32.mrb[69].mxu0 }
 0x26b   : > { %v8516_v39 = vadd.f32 %v6558_v38, %v6557_v36  ;;  %v6560_v40 = vpop.f32.mrb[70].mxu0 }
 0x26c   : > { %v6561_v20 = vpop.f32.mrb[71].mxu0 }
 0x26d   : > { %v8518_v42 = vadd.f32 %v6561_v20, %v6560_v40 }
 0x270   : > { %1802 = vmatmul.mubr.bf16.gmra.mrb[52].mxu1 %v7667_v23 }
 0x271   : > { %v6563_v48 = vpop.f32.mrb[72].mxu0 }
 0x272   : > { %v6564_v30 = vpop.f32.mrb[73].mxu0 }
 0x273   : > { %v8522_v51 = vadd.f32 %v6564_v30, %v6563_v48  ;;  %v6566_v52 = vpop.f32.mrb[74].mxu0 }
 0x274   : > { %v6567_v56 = vpop.f32.mrb[75].mxu0 }
 0x275   : > { %v8524_v57 = vadd.f32 %v6567_v56, %v6566_v52 }
 0x279   : > { %v6569_v3 = vpop.f32.mrb[76].mxu0 }
 0x27a   : > { %v6570_v6 = vpop.f32.mrb[77].mxu0 }
 0x27b   : > { %v8533_v9 = vadd.f32 %v6570_v6, %v6569_v3  ;;  %v6572_v10 = vpop.f32.mrb[78].mxu0 }
 0x27c   : > { %v6573_v11 = vpop.f32.mrb[79].mxu0 }
 0x27d   : > { %v8536_v15 = vadd.f32 %v6573_v11, %v6572_v10 }
 0x281   : > { %v6596_v16 = vpop.f32.mrb[80].mxu0 }
 0x282   : > { %v6597_v18 = vpop.f32.mrb[81].mxu0 }
 0x283   : > { %v8540_v61 = vadd.f32 %v6597_v18, %v6596_v16  ;;  %v6599_v63 = vpop.f32.mrb[82].mxu0 }
 0x284   : > { %v6600_v19 = vpop.f32.mrb[83].mxu0 }
 0x285   : > { %v8542_v23 = vadd.f32 %v6600_v19, %v6599_v63 }
 0x289   : > { %v6602_v24 = vpop.f32.mrb[84].mxu0 }
 0x28a   : > { %v6603_v22 = vpop.f32.mrb[85].mxu0 }
 0x28b   : > { %v8546_v29 = vadd.f32 %v6603_v22, %v6602_v24  ;;  %v6605_v33 = vpop.f32.mrb[86].mxu0 }
 0x28c   : > { %v6606_v36 = vpop.f32.mrb[87].mxu0 }
 0x28d   : > { %v8548_v38 = vadd.f32 %v6606_v36, %v6605_v33 }
 0x291   : > { %v6608_v40 = vpop.f32.mrb[88].mxu0 }
 0x292   : > { %v6609_v20 = vpop.f32.mrb[89].mxu0 }
 0x293   : > { %v8552_v30 = vadd.f32 %v6609_v20, %v6608_v40  ;;  %v6611_v52 = vpop.f32.mrb[90].mxu0 }
 0x294   : > { %v6612_v56 = vpop.f32.mrb[91].mxu0 }
 0x295   : > { %v8554_v3 = vadd.f32 %v6612_v56, %v6611_v52 }
 0x299   : > { %v6614_v6 = vpop.f32.mrb[92].mxu0 }
 0x29a   : > { %v6615_v10 = vpop.f32.mrb[93].mxu0 }
 0x29b   : > { %v8558_v16 = vadd.f32 %v6615_v10, %v6614_v6  ;;  %v6617_v18 = vpop.f32.mrb[94].mxu0 }
 0x29c   : > { %v6618_v63 = vpop.f32.mrb[95].mxu0 }
 0x29d   : > { %v8560_v19 = vadd.f32 %v6618_v63, %v6617_v18 }
 0x2a1   : > { %v6641_v24 = vpop.f32.mrb[96].mxu0 }
 0x2a2   : > { %v6642_v22 = vpop.f32.mrb[97].mxu0 }
 0x2a3   : > { %v8564_v36 = vadd.f32 %v6642_v22, %v6641_v24  ;;  %v6644_v40 = vpop.f32.mrb[98].mxu0 }
 0x2a4   : > { %v6645_v20 = vpop.f32.mrb[99].mxu0 }
 0x2a5   : > { %v8566_v52 = vadd.f32 %v6645_v20, %v6644_v40 }
 0x2a9   : > { %v6647_v56 = vpop.f32.mrb[100].mxu0 }
 0x2aa   : > { %v6648_v10 = vpop.f32.mrb[101].mxu0 }
 0x2ab   : > { %v8570_v11 = vadd.f32 %v6648_v10, %v6647_v56  ;;  %v6650_v18 = vpop.f32.mrb[102].mxu0 }
 0x2ac   : > { %v6651_v63 = vpop.f32.mrb[103].mxu0 }
 0x2ad   : > { %v8572_v48 = vadd.f32 %v6651_v63, %v6650_v18 }
 0x2b1   : > { %v6653_v24 = vpop.f32.mrb[104].mxu0 }
 0x2b2   : > { %v6654_v22 = vpop.f32.mrb[105].mxu0 }
 0x2b3   : > { %v8576_v21 = vadd.f32 %v6654_v22, %v6653_v24  ;;  %v6656_v40 = vpop.f32.mrb[106].mxu0 }
 0x2b4   : > { %v6657_v20 = vpop.f32.mrb[107].mxu0 }
 0x2b5   : > { %v8578_v55 = vadd.f32 %v6657_v20, %v6656_v40 }
 0x2e6   : > { %v6659_v56 = vpop.f32.mrb[108].mxu0 }
 0x2e7   : > { %v6660_v10 = vpop.f32.mrb[109].mxu0 }
 0x2e8   : > { %v8582_v1 = vadd.f32 %v6660_v10, %v6659_v56  ;;  %v6662_v18 = vpop.f32.mrb[110].mxu0 }
 0x2e9   : > { %v6663_v63 = vpop.f32.mrb[111].mxu0 }
 0x2ea   : > { %v8584_v46 = vadd.f32 %v6663_v63, %v6662_v18  ;;  %v7691_v63 = vld [vmem:[%s9381_s0 + $0x28] sm:$0xff]  }
 0x32b   : > { %v6461_v24 = vpop.f32.mrb[40].mxu1 }
 0x32c   : > { %v6462_v22 = vpop.f32.mrb[41].mxu1 }
 0x32d   : > { %v6463_v35 = vadd.f32 %v6462_v22, %v6461_v24  ;;  %v6464_v27 = vpop.f32.mrb[42].mxu1 }
 0x32e   : > { %v6465_v40 = vpop.f32.mrb[43].mxu1 }
 0x32f   : > { %v6466_v20 = vadd.f32 %v6465_v40, %v6464_v27 }
 0x331   : > { %v1810_v14 = vpack.c.bf16 %v6466_v20, %v6463_v35 }
 0x333   : > { %v6467_v62 = vpop.f32.mrb[44].mxu1  ;;  %6937 = vmatprep.mubr.msk.bf16.mxu1 %vm1186_vm1, %v1810_v14 }
 0x334   : > { %v6468_v6 = vpop.f32.mrb[45].mxu1 }
 0x335   : > { %v6469_v56 = vadd.f32 %v6468_v6, %v6467_v62  ;;  %v6470_v10 = vpop.f32.mrb[46].mxu1 }
 0x336   : > { %v6471_v50 = vpop.f32.mrb[47].mxu1 }
 0x337   : > { %v6472_v41 = vadd.f32 %v6471_v50, %v6470_v10 }
 0x339   : > { %v1811_v18 = vpack.c.bf16 %v6472_v41, %v6469_v56 }
 0x33b   : > { %v6473_v33 = vpop.f32.mrb[48].mxu1  ;;  %6938 = vmatmul.mubr.msk.bf16.vlgmr.msra.gmra.mrb[32].mxu1 %vm1186_vm1, %v1811_v18  ;;  %v9383_v18 = vpack.c.bf16 %v8466_v60, %v8463_v54  ;;  %v7693_v54 = vld [vmem:[%s9381_s0 + $0x38] sm:$0xff]   ;;  %v9387_v60 = vpack.c.bf16 %v8518_v42, %v8516_v39  ;;  %v9394_v39 = vpack.c.bf16 %v8566_v52, %v8564_v36  ;;  %v9395_v42 = vpack.c.bf16 %v8572_v48, %v8570_v11 }
 0x33c   : > { %v6474_v24 = vpop.f32.mrb[49].mxu1  ;;  %6946 = vmatpush3.bf16.msra.mxu1 %v8531_v4  ;;  %v9382_v4 = vpack.c.bf16 %v8456_v49, %v8453_v47  ;;  %v9385_v47 = vpack.c.bf16 %v8506_v25, %v8489_v17  ;;  %v9386_v49 = vpack.c.bf16 %v8512_v34, %v8510_v28  ;;  %v9390_v17 = vpack.c.bf16 %v8542_v23, %v8540_v61 }
 0x33d   : > { %v6475_v27 = vadd.f32 %v6474_v24, %v6473_v33  ;;  %v6476_v35 = vpop.f32.mrb[50].mxu1  ;;  %6955 = vmatprep.subr.bf16.mxu1 %v7691_v63  ;;  %v7692_v33 = vld [vmem:[%s9381_s0 + $0x30] sm:$0xff]   ;;  %v9384_v24 = vpack.c.bf16 %v8485_v12, %v8476_v5  ;;  %v9388_v5 = vpack.c.bf16 %v8524_v57, %v8522_v51  ;;  %v9389_v12 = vpack.c.bf16 %v8536_v15, %v8533_v9  ;;  %v7696_v51 = vld [vmem:[%s9378_s28 + $0x204] ss:$8 sps:$4 sm:$0xff]  }
 0x33e   : > { %v6477_v14 = vpop.f32.mrb[51].mxu1  ;;  %v9391_v25 = vpack.c.bf16 %v8548_v38, %v8546_v29  ;;  %v9392_v28 = vpack.c.bf16 %v8554_v3, %v8552_v30  ;;  %v9393_v34 = vpack.c.bf16 %v8560_v19, %v8558_v16  ;;  %v9397_v57 = vpack.c.bf16 %v8584_v46, %v8582_v1 }
 0x33f   : > { %v6478_v22 = vadd.f32 %v6477_v14, %v6476_v35 }
 0x341   : > { %v1812_v62 = vpack.c.bf16 %v6478_v22, %v6475_v27 }
 0x343   : > { %v6479_v6 = vpop.f32.mrb[52].mxu1  ;;  %6941 = vmatprep.mubr.msk.bf16.mxu1 %vm1186_vm1, %v1812_v62  ;;  %v7857_v62 = vmov 0.0  }
 0x344   : > { %v6480_v41 = vpop.f32.mrb[53].mxu1  ;;  %7007 = vmatprep.subr.bf16.mxu0 %v7857_v62  ;;  %7011 = vmatprep.mubr.msk.bf16.mxu0 %vm7858_vm2, %v7857_v62 }
 0x345   : > { %v6481_v50 = vadd.f32 %v6480_v41, %v6479_v6  ;;  %v6482_v40 = vpop.f32.mrb[54].mxu1  ;;  %v7712_v6 = vld [vmem:[%s9337_s7] sm:$0xff]   ;;  %v7713_v41 = vld [vmem:[%s9337_s7 + $0x8] sm:$0xff]  }
 0x346   : > { %v6483_v20 = vpop.f32.mrb[55].mxu1  ;;  %7008 = vmatpush3.bf16.msra.mxu0 %v7712_v6  ;;  %v7718_v6 = vld [vmem:[%s9337_s7 + $0x28] sm:$0xff]  }
 0x347   : > { %v6484_v56 = vadd.f32 %v6483_v20, %v6482_v40  ;;  %7009 = vmatprep.subr.bf16.mxu0 %v7857_v62 }
 0x349   : > { %v1813_v10 = vpack.c.bf16 %v6484_v56, %v6481_v50  ;;  %v5827_v50 = vld [vmem:[%s9335_s5] ss:$0 sm:$0xff] }
 0x34a   : > { %7010 = vmatpush3.bf16.msra.mxu0 %v7713_v41  ;;  %v7719_v41 = vld [vmem:[%s9336_s6 + $0x18] sm:$0xff]  }
 0x34b   : > { %6942 = vmatmul.mubr.msk.bf16.gmra.mrb[36].mxu1 %vm1186_vm1, %v1813_v10  ;;  %7015 = vmatprep.subr.bf16.mxu0 %v7857_v62 }
 0x34c   : > { %6947 = vmatprep.mubr.msk.bf16.mxu1 %vm1186_vm1, %v9382_v4 }
 0x353   : > { %6948 = vmatmul.mubr.msk.bf16.vlgmr.msra.gmra.mrb[32].mxu1 %vm1186_vm1, %v9383_v18 }
 0x354   : > { %6951 = vmatprep.mubr.msk.bf16.mxu1 %vm1186_vm1, %v9384_v24  ;;  %6956 = vmatpush3.bf16.msra.mxu1 %v7691_v63 }
 0x355   : > { %6965 = vmatprep.subr.bf16.mxu1 %v7692_v33 }
 0x35b   : > { %6952 = vmatmul.mubr.msk.bf16.gmra.mrb[36].mxu1 %vm1186_vm1, %v9385_v47 }
 0x35c   : > { %6957 = vmatprep.mubr.msk.bf16.mxu1 %vm1186_vm1, %v9386_v49 }
 0x363   : > { %6958 = vmatmul.mubr.msk.bf16.vlgmr.msra.gmra.mrb[32].mxu1 %vm1186_vm1, %v9387_v60 }
 0x364   : > { %6961 = vmatprep.mubr.msk.bf16.mxu1 %vm1186_vm1, %v9388_v5  ;;  %6966 = vmatpush3.bf16.msra.mxu1 %v7692_v33 }
 0x365   : > { %6975 = vmatprep.subr.bf16.mxu1 %v7693_v54 }
 0x36b   : > { %6962 = vmatmul.mubr.msk.bf16.gmra.mrb[36].mxu1 %vm1186_vm1, %v9389_v12 }
 0x36c   : > { %6967 = vmatprep.mubr.msk.bf16.mxu1 %vm1186_vm1, %v9390_v17 }
 0x373   : > { %6968 = vmatmul.mubr.msk.bf16.vlgmr.msra.gmra.mrb[32].mxu1 %vm1186_vm1, %v9391_v25 }
 0x374   : > { %6976 = vmatpush3.bf16.msra.mxu1 %v7693_v54  ;;  %6971 = vmatprep.mubr.msk.bf16.mxu1 %vm1186_vm1, %v9392_v28 }
 0x375   : > { %6670 = vmatprep.subr.bf16.mxu1 %v8088_v0  ;;  %v9396_v0 = vpack.c.bf16 %v8578_v55, %v8576_v21 }
 0x37b   : > { %6972 = vmatmul.mubr.msk.bf16.gmra.mrb[36].mxu1 %vm1186_vm1, %v9393_v34 }
 0x37c   : > { %6977 = vmatprep.mubr.msk.bf16.mxu1 %vm1186_vm1, %v9394_v39 }
 0x383   : > { %6978 = vmatmul.mubr.msk.bf16.vlgmr.msra.gmra.mrb[32].mxu1 %vm1186_vm1, %v9395_v42 }
 0x384   : > { %6671 = vmatpush3.bf16.msra.mxu1 %v8084_v59  ;;  %6981 = vmatprep.mubr.msk.bf16.mxu1 %vm1186_vm1, %v9396_v0  ;;  %v9398_v59 = vld [vmem:[#allocation11_spill] sm:$0xff] }
 0x385   : > { %6672 = vmatprep.subr.bf16.mxu1 %v8082_v58  ;;  %v7694_v58 = vld [vmem:[%s9378_s28 + $0x200] ss:$8 sps:$4 sm:$0xff]  }
 0x388   : > { %6673 = vmatpush3.bf16.msra.mxu1 %v8079_v53  ;;  %v7706_v53 = vld [vmem:[%s9381_s0 + $0x40] sm:$0xff]   ;;  %s7799_s0 = scalar_lea.vmem %s7798_s3, 512 }
 0x389   : > { %6674 = vmatprep.subr.bf16.mxu1 %v8111_v37  ;;  %v7702_v37 = vld [vmem:[%s9378_s28 + $0x220] ss:$8 sps:$4 sm:$0xff]   ;;  %p7801_p1 = scmp.lt.s32.totalorder %s7799_s0, %s7793_s2 }
 0x38b   : > { %6982 = vmatmul.mubr.msk.bf16.gmra.mrb[36].mxu1 %vm1186_vm1, %v9397_v57  ;;  %p7802_p2 = por %p7801_p1, %p7800_p0 }
 0x38c   : > { %6675 = vmatpush3.bf16.msra.mxu1 %v8106_v32  ;;  %2837 = vmatprep.mubr.bf16.mxu1 %v7696_v51  ;;  %v7700_v32 = vld [vmem:[%s9378_s28 + $0x224] ss:$8 sps:$4 sm:$0xff]  }
 0x38d   : > { %6676 = vmatprep.subr.bf16.mxu1 %v8104_v31  ;;  %v7699_v31 = vld [vmem:[%s9378_s28 + $0x210] ss:$8 sps:$4 sm:$0xff]   ;;  %p7803_p3 = pnand %p7802_p2, %p7796_p13 }
 0x390   : > { %6677 = vmatpush3.bf16.msra.mxu1 %v8101_v26  ;;  %v7697_v26 = vld [vmem:[%s9378_s28 + $0x214] ss:$8 sps:$4 sm:$0xff]  }
 0x391   : > { %6678 = vmatprep.subr.bf16.mxu1 %v8135_v13 }
 0x394   : > { %6679 = vmatpush3.bf16.msra.mxu1 %v8130_v8 }
 0x395   : > { %6680 = vmatprep.subr.bf16.mxu1 %v8128_v7  ;;  %v7705_v7 = vld [vmem:[%s9378_s28 + $0x230] ss:$8 sps:$4 sm:$0xff]  }
 0x398   : > { %6681 = vmatpush3.bf16.msra.mxu1 %v8125_v2  ;;  %v7703_v2 = vld [vmem:[%s9378_s28 + $0x234] ss:$8 sps:$4 sm:$0xff]  }
 0x399   : > { %6682 = vmatprep.subr.bf16.mxu1 %v8156_v45 }
 0x39c   : > { %6683 = vmatpush3.bf16.msra.mxu1 %v8153_v44 }
 0x39d   : > { %6684 = vmatprep.subr.bf16.mxu1 %v8151_v43 }
 0x3a0   : > { %6685 = vmatpush3.bf16.msra.mxu1 %v9398_v59 }
 0x3a1   : > { %6985 = vmatprep.subr.bf16.mxu1 %v7706_v53 }
 0x3a3   : > { %2838 = vmatmul.mubr.bf16.vlgmr.msra.gmra.mrb[56].mxu1 %v7694_v58 }
 0x3a4   : > { %2845 = vmatprep.mubr.bf16.mxu1 %v7697_v26  ;;  %6986 = vmatpush3.bf16.msra.mxu1 %v7706_v53 }
 0x3a5   : > { %6995 = vmatprep.subr.bf16.mxu1 %v7857_v62 }
 0x3ab   : > { %2846 = vmatmul.mubr.bf16.gmra.mrb[60].mxu1 %v7699_v31 }
 0x3ac   : > { %2853 = vmatprep.mubr.bf16.mxu1 %v7700_v32 }
 0x3b3   : > { %2854 = vmatmul.mubr.bf16.gmra.mrb[64].mxu1 %v7702_v37 }
 0x3b4   : > { %2861 = vmatprep.mubr.bf16.mxu1 %v7703_v2 }
 0x3bb   : > { %2862 = vmatmul.mubr.bf16.gmra.mrb[68].mxu1 %v7705_v7 }
 0x476   : > { %v6686_v8 = vpop.f32.mrb[56].mxu1 }
 0x477   : > { %v6687_v13 = vpop.f32.mrb[57].mxu1 }
 0x478   : > { %v6688_v43 = vadd.f32 %v6687_v13, %v6686_v8  ;;  %v6689_v44 = vpop.f32.mrb[58].mxu1 }
 0x479   : > { %v6690_v45 = vpop.f32.mrb[59].mxu1 }
 0x47a   : > { %v6691_v46 = vadd.f32 %v6690_v45, %v6689_v44  ;;  %v7707_v45 = vld [vmem:[%s9336_s6] sm:$0xff]  }
 0x47c   : > { %v2870_v1 = vpack.c.bf16 %v6691_v46, %v6688_v43  ;;  %v7708_v46 = vld [vmem:[%s9336_s6 + $0x10] sm:$0xff]  }
 0x47e   : > { %v6692_v9 = vpop.f32.mrb[60].mxu1  ;;  %6987 = vmatprep.mubr.msk.bf16.mxu1 %vm1186_vm1, %v2870_v1  ;;  %v7709_v1 = vld [vmem:[%s9336_s6 + $0x20] sm:$0xff]  }
 0x47f   : > { %v6693_v15 = vpop.f32.mrb[61].mxu1 }
 0x480   : > { %v6694_v55 = vadd.f32 %v6693_v15, %v6692_v9  ;;  %v6695_v61 = vpop.f32.mrb[62].mxu1  ;;  %v7710_v9 = vld [vmem:[%s9336_s6 + $0x28] sm:$0xff]   ;;  %v7711_v15 = vld [vmem:[%s9336_s6 + $0x30] sm:$0xff]  }
 0x481   : > { %v6696_v23 = vpop.f32.mrb[63].mxu1 }
 0x482   : > { %v6697_v21 = vadd.f32 %v6696_v23, %v6695_v61 }
 0x484   : > { %v2871_v29 = vpack.c.bf16 %v6697_v21, %v6694_v55 }
 0x486   : > { %v6698_v38 = vpop.f32.mrb[64].mxu1  ;;  %6988 = vmatmul.mubr.msk.bf16.vlgmr.msra.gmra.mrb[32].mxu1 %vm1186_vm1, %v2871_v29 }
 0x487   : > { %v6699_v48 = vpop.f32.mrb[65].mxu1 }
 0x488   : > { %v6700_v30 = vadd.f32 %v6699_v48, %v6698_v38  ;;  %v6701_v3 = vpop.f32.mrb[66].mxu1  ;;  %v7714_v38 = vld [vmem:[%s9336_s6 + $0x8] sm:$0xff]   ;;  %v7715_v48 = vld [vmem:[%s9337_s7 + $0x10] sm:$0xff]  }
 0x489   : > { %v6702_v11 = vpop.f32.mrb[67].mxu1 }
 0x48a   : > { %v6703_v16 = vadd.f32 %v6702_v11, %v6701_v3 }
 0x48c   : > { %v2872_v19 = vpack.c.bf16 %v6703_v16, %v6700_v30  ;;  %v7716_v30 = vld [vmem:[%s9337_s7 + $0x18] sm:$0xff]  }
 0x48e   : > { %v6704_v36 = vpop.f32.mrb[68].mxu1  ;;  %6991 = vmatprep.mubr.msk.bf16.mxu1 %vm1186_vm1, %v2872_v19 }
 0x48f   : > { %v6705_v52 = vpop.f32.mrb[69].mxu1 }
 0x490   : > { %v6706_v63 = vadd.f32 %v6705_v52, %v6704_v36  ;;  %v6707_v27 = vpop.f32.mrb[70].mxu1 }
 0x491   : > { %v6708_v35 = vpop.f32.mrb[71].mxu1 }
 0x492   : > { %v6709_v14 = vadd.f32 %v6708_v35, %v6707_v27  ;;  %v7717_v35 = vld [vmem:[%s9337_s7 + $0x20] sm:$0xff]  }
 0x494   : > { %v2873_v22 = vpack.c.bf16 %v6709_v14, %v6706_v63 }
 0x496   : > { %6992 = vmatmul.mubr.msk.bf16.gmra.mrb[36].mxu1 %vm1186_vm1, %v2873_v22 }
 0x497   : > { %7003 = vmatprep.mubr.msk.bf16.mxu1 %vm7858_vm2, %v7857_v62 }
 0x559   : > { %v6989_v40 = vpop.f32.mrb[32].mxu1 }
 0x55a   : > { %v7389_v20 = vadd.f32 %v6989_v40, %v5827_v50  ;;  %v2929_v56 = vpop.f32.mrb[33].mxu1  ;;  %v7721_v40 = vld [vmem:[%s9337_s7 + $0x38] sm:$0xff]  }
 0x55b   : > { %v7390_v10 = vadd.f32 %v5827_v50, %v2929_v56  ;;  %v6990_v4 = vpop.f32.mrb[34].mxu1 }
 0x55c   : > { %v2970_v33 = vmul.f32 0.1, %v7389_v20  ;;  %v7391_v18 = vadd.f32 %v6990_v4, %v5827_v50  ;;  %v2932_v24 = vpop.f32.mrb[35].mxu1 }
 0x55d   : > { %v2968_v47 = vmul.f32 0.1, %v7390_v10  ;;  %v7392_v49 = vadd.f32 %v5827_v50, %v2932_v24 }
 0x55e   : > { %v2971_v54 = vmul.f32 0.1, %v7391_v18  ;;  %v2978_v5 = vmax.f32 %v7389_v20, %v2970_v33 }
 0x55f   : > { %v2969_v60 = vmul.f32 0.1, %v7392_v49  ;;  %v2976_v17 = vmax.f32 %v7390_v10, %v2968_v47 }
 0x560   : > { %v2979_v12 = vmax.f32 %v7391_v18, %v2971_v54 }
 0x561   : > { %v2977_v25 = vmax.f32 %v7392_v49, %v2969_v60 }
 0x562   : > { %v8730_v28 = vpack.c.bf16 %v2979_v12, %v2978_v5 }
 0x563   : > { %v8732_v34 = vpack.c.bf16 %v2977_v25, %v2976_v17 }
 0x565   : > { %6996 = vmatpush3.bf16.msra.mxu1 %v8732_v34 }
 0x566   : > { %6997 = vmatprep.subr.bf16.mxu1 %v7857_v62 }
 0x569   : > { %v6993_v39 = vpop.f32.mrb[36].mxu1  ;;  %6998 = vmatpush3.bf16.msra.mxu1 %v8730_v28 }
 0x56a   : > { %v7393_v42 = vadd.f32 %v6993_v39, %v5827_v50  ;;  %v2945_v0 = vpop.f32.mrb[37].mxu1  ;;  %6999 = vmatprep.subr.bf16.mxu1 %v7857_v62  ;;  %v7729_v39 = vld [vmem:[%s9336_s6 + $0x40] sm:$0xff]  }
 0x56b   : > { %v7394_v51 = vadd.f32 %v5827_v50, %v2945_v0  ;;  %v6994_v57 = vpop.f32.mrb[38].mxu1 }
 0x56c   : > { %v2974_v53 = vmul.f32 0.1, %v7393_v42  ;;  %v7395_v58 = vadd.f32 %v6994_v57, %v5827_v50  ;;  %v2948_v59 = vpop.f32.mrb[39].mxu1  ;;  %v7722_v57 = vld [vmem:[%s9337_s7 + $0x40] sm:$0xff]  }
 0x56d   : > { %v2972_v26 = vmul.f32 0.1, %v7394_v51  ;;  %v7396_v31 = vadd.f32 %v5827_v50, %v2948_v59  ;;  %v7720_v50 = vld [vmem:[%s9337_s7 + $0x30] sm:$0xff]   ;;  %v7723_v59 = vld [vmem:[%s9337_s7 + $0x48] sm:$0xff]  }
 0x56e   : > { %v2975_v32 = vmul.f32 0.1, %v7395_v58  ;;  %v2982_v2 = vmax.f32 %v7393_v42, %v2974_v53 }
 0x56f   : > { %v2973_v37 = vmul.f32 0.1, %v7396_v31  ;;  %v2980_v8 = vmax.f32 %v7394_v51, %v2972_v26  ;;  %v7724_v26 = vld [vmem:[%s9337_s7 + $0x50] sm:$0xff]  }
 0x570   : > { %v2983_v7 = vmax.f32 %v7395_v58, %v2975_v32  ;;  %v7726_v32 = vld [vmem:[%s9337_s7 + $0x60] sm:$0xff]  }
 0x571   : > { %v2981_v13 = vmax.f32 %v7396_v31, %v2973_v37  ;;  %v7725_v31 = vld [vmem:[%s9337_s7 + $0x58] sm:$0xff]   ;;  %v7727_v37 = vld [vmem:[%s9337_s7 + $0x68] sm:$0xff]  }
 0x572   : > { %v8738_v43 = vpack.c.bf16 %v2983_v7, %v2982_v2  ;;  %v7728_v2 = vld [vmem:[%s9336_s6 + $0x38] sm:$0xff]  }
 0x573   : > { %v8740_v44 = vpack.c.bf16 %v2981_v13, %v2980_v8 }
 0x575   : > { %7000 = vmatpush3.bf16.msra.mxu1 %v8740_v44 }
 0x576   : > { %7001 = vmatprep.subr.bf16.mxu1 %v7857_v62 }
 0x579   : > { %7002 = vmatpush3.bf16.msra.mxu1 %v8738_v43 }
 0x57a   : > { %7035 = vmatprep.subr.bf16.mxu1 %v7857_v62 }
 0x57c   : > { %7004 = vmatmul.mubr.msk.bf16.vlgmr.msra.gmra.mrb[72].mxu1 %vm3002_vm3, %v7707_v45  ;;  %v7734_v45 = vld [vmem:[%s9339_s9] sm:$0xff]  }
 0x57d   : > { %7036 = vmatpush3.bf16.msra.mxu1 %v8732_v34  ;;  %7043 = vmatprep.mubr.msk.bf16.mxu1 %vm7858_vm2, %v7857_v62 }
 0x57e   : > { %7037 = vmatprep.subr.bf16.mxu1 %v7857_v62 }
 0x581   : > { %7038 = vmatpush3.bf16.msra.mxu1 %v8730_v28 }
 0x582   : > { %7039 = vmatprep.subr.bf16.mxu1 %v7857_v62 }
 0x585   : > { %7040 = vmatpush3.bf16.msra.mxu1 %v8740_v44 }
 0x586   : > { %7041 = vmatprep.subr.bf16.mxu1 %v7857_v62 }
 0x589   : > { %7042 = vmatpush3.bf16.msra.mxu1 %v8738_v43 }
 0x58a   : > { %7075 = vmatprep.subr.bf16.mxu1 %v7857_v62 }
 0x58c   : > { %7044 = vmatmul.mubr.msk.bf16.vlgmr.msra.gmra.mrb[76].mxu1 %vm3002_vm3, %v7708_v46 }
 0x58d   : > { %7076 = vmatpush3.bf16.msra.mxu1 %v8732_v34  ;;  %7083 = vmatprep.mubr.msk.bf16.mxu1 %vm7858_vm2, %v7857_v62 }
 0x58e   : > { %7077 = vmatprep.subr.bf16.mxu1 %v7857_v62 }
 0x591   : > { %7078 = vmatpush3.bf16.msra.mxu1 %v8730_v28 }
 0x592   : > { %7079 = vmatprep.subr.bf16.mxu1 %v7857_v62 }
 0x595   : > { %7080 = vmatpush3.bf16.msra.mxu1 %v8740_v44 }
 0x596   : > { %7081 = vmatprep.subr.bf16.mxu1 %v7857_v62 }
 0x599   : > { %7082 = vmatpush3.bf16.msra.mxu1 %v8738_v43 }
 0x59a   : > { %7095 = vmatprep.subr.bf16.mxu1 %v7857_v62 }
 0x59c   : > { %7084 = vmatmul.mubr.msk.bf16.vlgmr.msra.gmra.mrb[80].mxu1 %vm3002_vm3, %v7709_v1 }
 0x59d   : > { %7096 = vmatpush3.bf16.msra.mxu1 %v8732_v34  ;;  %7103 = vmatprep.mubr.msk.bf16.mxu1 %vm7858_vm2, %v7857_v62 }
 0x59e   : > { %7097 = vmatprep.subr.bf16.mxu1 %v7857_v62 }
 0x5a1   : > { %7098 = vmatpush3.bf16.msra.mxu1 %v8730_v28 }
 0x5a2   : > { %7099 = vmatprep.subr.bf16.mxu1 %v7857_v62 }
 0x5a5   : > { %7100 = vmatpush3.bf16.msra.mxu1 %v8740_v44 }
 0x5a6   : > { %7101 = vmatprep.subr.bf16.mxu1 %v7857_v62 }
 0x5a9   : > { %7102 = vmatpush3.bf16.msra.mxu1 %v8738_v43 }
 0x5aa   : > { %7115 = vmatprep.subr.bf16.mxu1 %v7857_v62 }
 0x5ac   : > { %7104 = vmatmul.mubr.msk.bf16.vlgmr.msra.gmra.mrb[84].mxu1 %vm3002_vm3, %v7710_v9 }
 0x5ad   : > { %7116 = vmatpush3.bf16.msra.mxu1 %v8732_v34  ;;  %7123 = vmatprep.mubr.msk.bf16.mxu1 %vm7858_vm2, %v7857_v62 }
 0x5ae   : > { %7117 = vmatprep.subr.bf16.mxu1 %v7857_v62 }
 0x5b1   : > { %7118 = vmatpush3.bf16.msra.mxu1 %v8730_v28 }
 0x5b2   : > { %7119 = vmatprep.subr.bf16.mxu1 %v7857_v62 }
 0x5b5   : > { %7120 = vmatpush3.bf16.msra.mxu1 %v8740_v44 }
 0x5b6   : > { %7121 = vmatprep.subr.bf16.mxu1 %v7857_v62 }
 0x5b9   : > { %7122 = vmatpush3.bf16.msra.mxu1 %v8738_v43 }
 0x5ba   : > { %7155 = vmatprep.subr.bf16.mxu1 %v7857_v62 }
 0x5bc   : > { %7124 = vmatmul.mubr.msk.bf16.vlgmr.msra.gmra.mrb[88].mxu1 %vm3002_vm3, %v7711_v15  ;;  %v7732_v15 = vld [vmem:[%s9337_s7 + $0x80] sm:$0xff]  }
 0x5bd   : > { %7156 = vmatpush3.bf16.msra.mxu1 %v8732_v34  ;;  %7163 = vmatprep.mubr.msk.bf16.mxu1 %vm7858_vm2, %v7857_v62 }
 0x5be   : > { %7157 = vmatprep.subr.bf16.mxu1 %v7857_v62 }
 0x5c1   : > { %7158 = vmatpush3.bf16.msra.mxu1 %v8730_v28 }
 0x5c2   : > { %7159 = vmatprep.subr.bf16.mxu1 %v7857_v62 }
 0x5c5   : > { %7160 = vmatpush3.bf16.msra.mxu1 %v8740_v44 }
 0x5c6   : > { %7161 = vmatprep.subr.bf16.mxu1 %v7857_v62 }
 0x5c9   : > { %7162 = vmatpush3.bf16.msra.mxu1 %v8738_v43 }
 0x5ca   : > { %7175 = vmatprep.subr.bf16.mxu1 %v7857_v62 }
 0x5cc   : > { %7164 = vmatmul.mubr.msk.bf16.vlgmr.msra.gmra.mrb[92].mxu1 %vm3002_vm3, %v7729_v39 }
 0x5cd   : > { %7183 = vmatprep.mubr.msk.bf16.mxu1 %vm7858_vm2, %v7857_v62  ;;  %7176 = vmatpush3.bf16.msra.mxu1 %v7734_v45 }
 0x5ce   : > { %7177 = vmatprep.subr.bf16.mxu1 %v7857_v62 }
 0x64f   : > { %v3040_v55 = vpop.f32.mrb[72].mxu1 }
 0x650   : > { %v7005_v61 = vpop.f32.mrb[73].mxu1 }
 0x651   : > { %v3043_v23 = vpop.f32.mrb[74].mxu1 }
 0x652   : > { %v3047_v21 = vpack.c.bf16 %v3043_v23, %v3040_v55  ;;  %v7006_v29 = vpop.f32.mrb[75].mxu1  ;;  %v7733_v23 = vld [vmem:[%s9337_s7 + $0x88] sm:$0xff]  }
 0x653   : > { %v7736_v29 = vld [vmem:[%s9339_s9 + $0x10] sm:$0xff]  }
 0x654   : > { %7012 = vmatmul.mubr.msk.bf16.vlgmr.msra.gmra.mrb[112].mxu0 %vm764_vm0, %v3047_v21  ;;  %v7735_v21 = vld [vmem:[%s9339_s9 + $0x8] sm:$0xff]  }
 0x655   : > { %7016 = vmatpush3.bf16.msra.mxu0 %v8732_v34  ;;  %7023 = vmatprep.mubr.msk.bf16.mxu0 %vm7858_vm2, %v7857_v62 }
 0x656   : > { %7017 = vmatprep.subr.bf16.mxu0 %v7857_v62  ;;  %7178 = vmatpush3.bf16.msra.mxu1 %v7735_v21 }
 0x657   : > { %7179 = vmatprep.subr.bf16.mxu1 %v7857_v62 }
 0x659   : > { %7018 = vmatpush3.bf16.msra.mxu0 %v8730_v28 }
 0x65a   : > { %7019 = vmatprep.subr.bf16.mxu0 %v7857_v62  ;;  %7180 = vmatpush3.bf16.msra.mxu1 %v7736_v29 }
 0x65b   : > { %7181 = vmatprep.subr.bf16.mxu1 %v7857_v62 }
 0x65d   : > { %7020 = vmatpush3.bf16.msra.mxu0 %v8740_v44 }
 0x65e   : > { %7021 = vmatprep.subr.bf16.mxu0 %v7857_v62 }
 0x65f   : > { %v3271_v3 = vpop.f32.mrb[76].mxu1 }
 0x660   : > { %v7045_v11 = vpop.f32.mrb[77].mxu1 }
 0x661   : > { %7022 = vmatpush3.bf16.msra.mxu0 %v8738_v43  ;;  %v3274_v16 = vpop.f32.mrb[78].mxu1 }
 0x662   : > { %7027 = vmatprep.subr.bf16.mxu0 %v7857_v62  ;;  %v3278_v19 = vpack.c.bf16 %v3274_v16, %v3271_v3  ;;  %v7046_v36 = vpop.f32.mrb[79].mxu1 }
 0x664   : > { %7024 = vmatmul.mubr.msk.bf16.vlgmr.msra.gmra.mrb[116].mxu0 %vm3002_vm3, %v7714_v38  ;;  %v7737_v38 = vld [vmem:[%s9339_s9 + $0x18] sm:$0xff]  }
 0x665   : > { %7028 = vmatpush3.bf16.msra.mxu0 %v7715_v48  ;;  %7031 = vmatprep.mubr.msk.bf16.mxu0 %vm7858_vm2, %v7857_v62  ;;  %v6025_v48 = vld [vmem:[%s9338_s8] ss:$0 sm:$0xff] }
 0x666   : > { %7029 = vmatprep.subr.bf16.mxu0 %v7857_v62  ;;  %7182 = vmatpush3.bf16.msra.mxu1 %v7737_v38 }
 0x667   : > { %7195 = vmatprep.subr.bf16.mxu1 %v7857_v62 }
 0x669   : > { %7030 = vmatpush3.bf16.msra.mxu0 %v7716_v30 }
 0x66a   : > { %7047 = vmatprep.subr.bf16.mxu0 %v7857_v62 }
 0x66f   : > { %v3503_v20 = vpop.f32.mrb[80].mxu1 }
 0x670   : > { %v7085_v56 = vpop.f32.mrb[81].mxu1 }
 0x671   : > { %v3506_v10 = vpop.f32.mrb[82].mxu1 }
 0x672   : > { %v3510_v4 = vpack.c.bf16 %v3506_v10, %v3503_v20  ;;  %v7086_v33 = vpop.f32.mrb[83].mxu1 }
 0x67f   : > { %v3619_v18 = vpop.f32.mrb[84].mxu1 }
 0x680   : > { %v7105_v24 = vpop.f32.mrb[85].mxu1 }
 0x681   : > { %v3622_v47 = vpop.f32.mrb[86].mxu1 }
 0x682   : > { %v3626_v49 = vpack.c.bf16 %v3622_v47, %v3619_v18  ;;  %v7106_v54 = vpop.f32.mrb[87].mxu1 }
 0x68f   : > { %v3735_v60 = vpop.f32.mrb[88].mxu1 }
 0x690   : > { %v7125_v5 = vpop.f32.mrb[89].mxu1 }
 0x691   : > { %v3738_v12 = vpop.f32.mrb[90].mxu1 }
 0x692   : > { %v3742_v17 = vpack.c.bf16 %v3738_v12, %v3735_v60  ;;  %v7126_v25 = vpop.f32.mrb[91].mxu1 }
 0x69f   : > { %v3967_v7 = vpop.f32.mrb[92].mxu1 }
 0x6a0   : > { %v7165_v8 = vpop.f32.mrb[93].mxu1 }
 0x6a1   : > { %v3970_v13 = vpop.f32.mrb[94].mxu1 }
 0x737   : > { %v3155_v52 = vpop.f32.mrb[116].mxu0 }
 0x738   : > { %v7025_v63 = vpop.f32.mrb[117].mxu0 }
 0x739   : > { %v3158_v27 = vpop.f32.mrb[118].mxu0 }
 0x73a   : > { %v3162_v14 = vpack.c.bf16 %v3158_v27, %v3155_v52  ;;  %v7026_v22 = vpop.f32.mrb[119].mxu0 }
 0x73b   : > { %v7738_v22 = vld [vmem:[%s9341_s11] sm:$0xff]  }
 0x73c   : > { %7032 = vmatmul.mubr.msk.bf16.vlgmr.msra.gmra.mrb[112].mxu0 %vm764_vm0, %v3162_v14 }
 0x73d   : > { %7048 = vmatpush3.bf16.msra.mxu0 %v7717_v35  ;;  %7051 = vmatprep.mubr.msk.bf16.mxu0 %vm7858_vm2, %v7857_v62 }
 0x73e   : > { %7049 = vmatprep.subr.bf16.mxu0 %v7857_v62 }
 0x741   : > { %7050 = vmatpush3.bf16.msra.mxu0 %v7718_v6  ;;  %v7739_v6 = vld [vmem:[%s9341_s11 + $0x8] sm:$0xff]  }
 0x742   : > { %7055 = vmatprep.subr.bf16.mxu0 %v7857_v62 }
 0x748   : > { %7052 = vmatmul.mubr.msk.bf16.vlgmr.msra.gmra.mrb[112].mxu0 %vm764_vm0, %v3278_v19 }
 0x749   : > { %7056 = vmatpush3.bf16.msra.mxu0 %v8732_v34  ;;  %7063 = vmatprep.mubr.msk.bf16.mxu0 %vm7858_vm2, %v7857_v62 }
 0x74a   : > { %7057 = vmatprep.subr.bf16.mxu0 %v7857_v62 }
 0x74d   : > { %7058 = vmatpush3.bf16.msra.mxu0 %v8730_v28 }
 0x74e   : > { %7059 = vmatprep.subr.bf16.mxu0 %v7857_v62 }
 0x751   : > { %7060 = vmatpush3.bf16.msra.mxu0 %v8740_v44 }
 0x752   : > { %7061 = vmatprep.subr.bf16.mxu0 %v7857_v62 }
 0x755   : > { %7062 = vmatpush3.bf16.msra.mxu0 %v8738_v43 }
 0x756   : > { %7067 = vmatprep.subr.bf16.mxu0 %v7857_v62 }
 0x758   : > { %7064 = vmatmul.mubr.msk.bf16.vlgmr.msra.gmra.mrb[120].mxu0 %vm3002_vm3, %v7719_v41  ;;  %v7740_v41 = vld [vmem:[%s9342_s12] sm:$0xff]  }
 0x759   : > { %7068 = vmatpush3.bf16.msra.mxu0 %v7720_v50  ;;  %7071 = vmatprep.mubr.msk.bf16.mxu0 %vm7858_vm2, %v7857_v62  ;;  %v7741_v50 = vld [vmem:[%s9342_s12 + $0x8] sm:$0xff]  }
 0x75a   : > { %7069 = vmatprep.subr.bf16.mxu0 %v7857_v62 }
 0x75d   : > { %7070 = vmatpush3.bf16.msra.mxu0 %v7721_v40  ;;  %v6119_v40 = vld [vmem:[%s9340_s10] ss:$0 sm:$0xff] }
 0x75e   : > { %7087 = vmatprep.subr.bf16.mxu0 %v7857_v62 }
 0x82b   : > { %v3387_v42 = vpop.f32.mrb[120].mxu0 }
 0x82c   : > { %v7065_v0 = vpop.f32.mrb[121].mxu0 }
 0x82d   : > { %v3390_v51 = vpop.f32.mrb[122].mxu0 }
 0x82e   : > { %v3394_v53 = vpack.c.bf16 %v3390_v51, %v3387_v42  ;;  %v7066_v58 = vpop.f32.mrb[123].mxu0 }
 0x830   : > { %7072 = vmatmul.mubr.msk.bf16.vlgmr.msra.gmra.mrb[112].mxu0 %vm764_vm0, %v3394_v53 }
 0x831   : > { %7088 = vmatpush3.bf16.msra.mxu0 %v7722_v57  ;;  %7091 = vmatprep.mubr.msk.bf16.mxu0 %vm7858_vm2, %v7857_v62 }
 0x832   : > { %7089 = vmatprep.subr.bf16.mxu0 %v7857_v62 }
 0x835   : > { %7090 = vmatpush3.bf16.msra.mxu0 %v7723_v59 }
 0x836   : > { %7107 = vmatprep.subr.bf16.mxu0 %v7857_v62 }
 0x83c   : > { %7092 = vmatmul.mubr.msk.bf16.vlgmr.msra.gmra.mrb[112].mxu0 %vm764_vm0, %v3510_v4 }
 0x83d   : > { %7108 = vmatpush3.bf16.msra.mxu0 %v7724_v26  ;;  %7111 = vmatprep.mubr.msk.bf16.mxu0 %vm7858_vm2, %v7857_v62 }
 0x83e   : > { %7109 = vmatprep.subr.bf16.mxu0 %v7857_v62 }
 0x841   : > { %7110 = vmatpush3.bf16.msra.mxu0 %v7725_v31 }
 0x842   : > { %7127 = vmatprep.subr.bf16.mxu0 %v7857_v62 }
 0x848   : > { %7112 = vmatmul.mubr.msk.bf16.vlgmr.msra.gmra.mrb[112].mxu0 %vm764_vm0, %v3626_v49 }
 0x849   : > { %7128 = vmatpush3.bf16.msra.mxu0 %v7726_v32  ;;  %7131 = vmatprep.mubr.msk.bf16.mxu0 %vm7858_vm2, %v7857_v62 }
 0x84a   : > { %7129 = vmatprep.subr.bf16.mxu0 %v7857_v62 }
 0x84d   : > { %7130 = vmatpush3.bf16.msra.mxu0 %v7727_v37 }
 0x84e   : > { %7135 = vmatprep.subr.bf16.mxu0 %v7857_v62 }
 0x854   : > { %7132 = vmatmul.mubr.msk.bf16.vlgmr.msra.gmra.mrb[112].mxu0 %vm764_vm0, %v3742_v17 }
 0x855   : > { %7136 = vmatpush3.bf16.msra.mxu0 %v8732_v34  ;;  %7143 = vmatprep.mubr.msk.bf16.mxu0 %vm7858_vm2, %v7857_v62  ;;  %v7730_v34 = vld [vmem:[%s9337_s7 + $0x70] sm:$0xff]  }
 0x856   : > { %7137 = vmatprep.subr.bf16.mxu0 %v7857_v62 }
 0x859   : > { %7138 = vmatpush3.bf16.msra.mxu0 %v8730_v28  ;;  %v7731_v28 = vld [vmem:[%s9337_s7 + $0x78] sm:$0xff]  }
 0x85a   : > { %7139 = vmatprep.subr.bf16.mxu0 %v7857_v62 }
 0x85d   : > { %7140 = vmatpush3.bf16.msra.mxu0 %v8740_v44  ;;  %v7166_v44 = vpop.f32.mrb[95].mxu1 }
 0x85e   : > { %7141 = vmatprep.subr.bf16.mxu0 %v7857_v62 }
 0x861   : > { %7142 = vmatpush3.bf16.msra.mxu0 %v8738_v43  ;;  %v3974_v43 = vpack.c.bf16 %v3970_v13, %v3967_v7 }
 0x862   : > { %7147 = vmatprep.subr.bf16.mxu0 %v7857_v62 }
 0x864   : > { %7144 = vmatmul.mubr.msk.bf16.vlgmr.msra.gmra.mrb[124].mxu0 %vm3002_vm3, %v7728_v2 }
 0x865   : > { %7148 = vmatpush3.bf16.msra.mxu0 %v7730_v34  ;;  %7151 = vmatprep.mubr.msk.bf16.mxu0 %vm7858_vm2, %v7857_v62 }
 0x866   : > { %7149 = vmatprep.subr.bf16.mxu0 %v7857_v62 }
 0x869   : > { %7150 = vmatpush3.bf16.msra.mxu0 %v7731_v28 }
 0x86a   : > { %7167 = vmatprep.subr.bf16.mxu0 %v7857_v62 }
 0x937   : > { %v3851_v46 = vpop.f32.mrb[124].mxu0 }
 0x938   : > { %v7145_v1 = vpop.f32.mrb[125].mxu0 }
 0x939   : > { %v3854_v9 = vpop.f32.mrb[126].mxu0 }
 0x93a   : > { %v3858_v55 = vpack.c.bf16 %v3854_v9, %v3851_v46  ;;  %v7146_v61 = vpop.f32.mrb[127].mxu0 }
 0x93c   : > { %7152 = vmatmul.mubr.msk.bf16.vlgmr.msra.gmra.mrb[112].mxu0 %vm764_vm0, %v3858_v55 }
 0x93d   : > { %7168 = vmatpush3.bf16.msra.mxu0 %v7732_v15  ;;  %7171 = vmatprep.mubr.msk.bf16.mxu0 %vm7858_vm2, %v7857_v62 }
 0x93e   : > { %7169 = vmatprep.subr.bf16.mxu0 %v7857_v62 }
 0x941   : > { %7170 = vmatpush3.bf16.msra.mxu0 %v7733_v23 }
 0x942   : > { %7187 = vmatprep.subr.bf16.mxu0 %v7857_v62 }
 0x948   : > { %7172 = vmatmul.mubr.msk.bf16.vlgmr.msra.gmra.mrb[112].mxu0 %vm764_vm0, %v3974_v43 }
 0x949   : > { %7191 = vmatprep.mubr.msk.bf16.mxu0 %vm7858_vm2, %v7857_v62  ;;  %7188 = vmatpush3.bf16.msra.mxu0 %v7740_v41 }
 0x94a   : > { %7189 = vmatprep.subr.bf16.mxu0 %v7857_v62 }
 0x94d   : > { %7190 = vmatpush3.bf16.msra.mxu0 %v7741_v50 }
 0x94e   : > { %7203 = vmatprep.subr.bf16.mxu0 %v7857_v62 }
 0xa1b   : > { %v4029_v30 = vpop.f32.mrb[112].mxu0 }
 0xa1c   : > { %v7397_v3 = vadd.f32 %v6025_v48, %v4029_v30  ;;  %v7173_v11 = vpop.f32.mrb[113].mxu0 }
 0xa1d   : > { %v4032_v16 = vpop.f32.mrb[114].mxu0 }
 0xa1e   : > { %v4038_v19 = vmul.f32 0.1, %v7397_v3  ;;  %v7398_v36 = vadd.f32 %v6025_v48, %v4032_v16  ;;  %v7174_v52 = vpop.f32.mrb[115].mxu0 }
 0xa20   : > { %v4039_v63 = vmul.f32 0.1, %v7398_v36  ;;  %v4040_v27 = vmax.f32 %v7397_v3, %v4038_v19 }
 0xa22   : > { %v4041_v35 = vmax.f32 %v7398_v36, %v4039_v63 }
 0xa24   : > { %v4042_v14 = vpack.c.bf16 %v4041_v35, %v4040_v27 }
 0xa26   : > { %7184 = vmatmul.mubr.msk.bf16.vlgmr.msra.gmra.mrb[96].mxu1 %vm3002_vm3, %v4042_v14 }
 0xa27   : > { %7199 = vmatprep.mubr.msk.bf16.mxu1 %vm7858_vm2, %v7857_v62  ;;  %7196 = vmatpush3.bf16.msra.mxu1 %v7738_v22 }
 0xa28   : > { %7197 = vmatprep.subr.bf16.mxu1 %v7857_v62 }
 0xa2b   : > { %7198 = vmatpush3.bf16.msra.mxu1 %v7739_v6 }
 0xa2c   : > { %7211 = vmatprep.subr.bf16.mxu1 %v7857_v62 }
 0xaf9   : > { %v4119_v20 = vpop.f32.mrb[96].mxu1 }
 0xafa   : > { %v4120_v56 = vadd.f32 %v6119_v40, %v4119_v20  ;;  %v7185_v10 = vpop.f32.mrb[97].mxu1 }
 0xafb   : > { %v4122_v4 = vpop.f32.mrb[98].mxu1 }
 0xafc   : > { %v4126_v33 = vmul.f32 0.1, %v4120_v56  ;;  %v4123_v18 = vadd.f32 %v6119_v40, %v4122_v4  ;;  %v7186_v24 = vpop.f32.mrb[99].mxu1  ;;  %v7742_v4 = vld [vmem:[%s9343_s13] sm:$0xff]  }
 0xafd   : > { %v7743_v24 = vld [vmem:[%s9343_s13 + $0x8] sm:$0xff]  }
 0xafe   : > { %v4128_v47 = vmax.f32 %v4120_v56, %v4126_v33  ;;  %v4127_v49 = vmul.f32 0.1, %v4123_v18 }
 0xb00   : > { %v4140_v54 = vrot.slane %v4128_v47, 4  ;;  %v4129_v60 = vmax.f32 %v4123_v18, %v4127_v49  ;;  %v4130_v5 = vsel %vm764_vm0, %v4128_v47, -inf }
 0xb02   : > { %v4142_v12 = vmax.f32 %v4128_v47, %v4140_v54  ;;  %v4131_v17 = vsel %vm764_vm0, %v4129_v60, -inf  ;;  %v4145_v25 = vrot.slane %v4129_v60, 4  ;;  %v4227_v39 = vpack.c.bf16 %v4129_v60, %v4128_v47  ;;  %v7753_v54 = vld [vmem:[%s9346_s16] sm:$0xff]  }
 0xb03   : > { %v4132_v42 = vmax.f32 %v4130_v5, %v4131_v17  ;;  %v7755_v5 = vld [vmem:[%s9346_s16 + $0x10] sm:$0xff]  }
 0xb04   : > { %v4143_v0 = vmax.f32 %v4142_v12, %v4129_v60  ;;  %v4147_v51 = vmax.f32 %v4128_v47, %v4145_v25  ;;  %7200 = vmatmul.mubr.msk.bf16.vlgmr.msra.gmra.mrb[100].mxu1 %vm764_vm0, %v4227_v39 }
 0xb05   : > { %7213 = vmatprep.mubr.msk.bf16.mxu1 %vm7858_vm2, %v7857_v62  ;;  %v4133_v59 = vrot.slane %v4132_v42, 4 }
 0xb06   : > { %v4148_v57 = vmax.f32 %v4147_v51, %v4129_v60  ;;  %v4149_v53 = vmax.f32 %v4143_v0, %v4145_v25  ;;  %v4175_v58 = vrot.slane %v4143_v0, 1  ;;  %v4178_v37 = vrot.slane %v4143_v0, 2  ;;  %v7754_v60 = vld [vmem:[%s9346_s16 + $0x8] sm:$0xff]  }
 0xb07   : > { %v4181_v13 = vrot.slane %v4143_v0, 3  ;;  %v4134_v43 = vmax.f32 %v4132_v42, %v4133_v59 }
 0xb08   : > { %v4151_v26 = vrot.slane %v4149_v53, 1  ;;  %v4196_v31 = vrot.slane %v4148_v57, 1  ;;  %v4177_v32 = vmax.f32 %v4143_v0, %v4175_v58  ;;  %v4154_v34 = vrot.slane %v4149_v53, 2 }
 0xb09   : > { %v4199_v7 = vrot.slane %v4148_v57, 2  ;;  %v4157_v44 = vrot.slane %v4149_v53, 3  ;;  %v4202_v46 = vrot.slane %v4148_v57, 3  ;;  %v4135_v29 = vrot.slane %v4134_v43, 2 }
 0xb0a   : > { %v4153_v2 = vmax.f32 %v4149_v53, %v4151_v26  ;;  %v4198_v28 = vmax.f32 %v4148_v57, %v4196_v31  ;;  %v4180_v8 = vmax.f32 %v4177_v32, %v4178_v37  ;;  %v6134_v26 = vld [vmem:[%s9344_s14] ss:$0 sm:$0xff] }
 0xb0b   : > { %v4136_v41 = vmax.f32 %v4134_v43, %v4135_v29  ;;  %v7752_v29 = vld [vmem:[%s9345_s15 + $0x40] sm:$0xff]  }
 0xb0c   : > { %v4201_v45 = vmax.f32 %v4198_v28, %v4199_v7  ;;  %v4156_v1 = vmax.f32 %v4153_v2, %v4154_v34  ;;  %v4183_v9 = vmax.f32 %v4180_v8, %v4181_v13  ;;  %v4190_v22 = vrot.slane %v4180_v8, 6 }
 0xb0d   : > { %v4137_v18 = vrot.slane %v4136_v41, 1 }
 0xb0e   : > { %v4204_v15 = vmax.f32 %v4201_v45, %v4202_v46  ;;  %v4159_v55 = vmax.f32 %v4156_v1, %v4157_v44  ;;  %v4185_v61 = vrot.slane %v4183_v9, 7  ;;  %v4187_v23 = vrot.slane %v4183_v9, 6  ;;  %v7744_v46 = vld [vmem:[%s9345_s15] sm:$0xff]   ;;  %v7746_v9 = vld [vmem:[%s9345_s15 + $0x10] sm:$0xff]  }
 0xb0f   : > { %v4206_v21 = vrot.slane %v4201_v45, 4  ;;  %v4166_v16 = vrot.slane %v4156_v1, 6  ;;  %v4213_v36 = vrot.slane %v4201_v45, 2  ;;  %v4138_v47 = vmax.f32 %v4136_v41, %v4137_v18  ;;  %v7760_v41 = vld [vmem:[%s9346_s16 + $0x38] sm:$0xff]  }
 0xb10   : > { %v4161_v38 = vrot.slane %v4159_v55, 7  ;;  %v4163_v48 = vrot.slane %v4159_v55, 6  ;;  %v4209_v30 = vrot.slane %v4204_v15, 3  ;;  %v4211_v3 = vrot.slane %v4204_v15, 2  ;;  %v7747_v15 = vld [vmem:[%s9345_s15 + $0x18] sm:$0xff]   ;;  %v7748_v55 = vld [vmem:[%s9345_s15 + $0x20] sm:$0xff]  }
 0xb11   : > { %v4192_v11 = vsel %vm4168_vm4, %v4180_v8, %v4185_v61  ;;  %v4349_v49 = vpack.c.bf16 %v4138_v47, %v4138_v47  ;;  %v7749_v61 = vld [vmem:[%s9345_s15 + $0x28] sm:$0xff]   ;;  %v7763_v47 = vld [vmem:[%s9346_s16 + $0x50] sm:$0xff]  }
 0xb12   : > { %v4169_v19 = vsel %vm4168_vm4, %v4156_v1, %v4161_v38  ;;  %v4215_v52 = vsel %vm4168_vm4, %v4206_v21, %v4209_v30  ;;  %v4193_v27 = vsel %vm4170_vm5, %v4192_v11, %v4187_v23  ;;  %v7745_v1 = vld [vmem:[%s9345_s15 + $0x8] sm:$0xff]   ;;  %v7750_v23 = vld [vmem:[%s9345_s15 + $0x30] sm:$0xff]   ;;  %v7751_v21 = vld [vmem:[%s9345_s15 + $0x38] sm:$0xff]  }
 0xb13   : > { %v4171_v63 = vsel %vm4170_vm5, %v4169_v19, %v4163_v48  ;;  %v4216_v35 = vsel %vm4170_vm5, %v4215_v52, %v4211_v3  ;;  %v4194_v20 = vsel %vm4172_vm6, %v4193_v27, %v4190_v22  ;;  %v7756_v38 = vld [vmem:[%s9346_s16 + $0x18] sm:$0xff]   ;;  %v7757_v11 = vld [vmem:[%s9346_s16 + $0x20] sm:$0xff]   ;;  %v7758_v52 = vld [vmem:[%s9346_s16 + $0x28] sm:$0xff]  }
 0xb14   : > { %v4173_v14 = vsel %vm4172_vm6, %v4171_v63, %v4166_v16  ;;  %v4217_v6 = vsel %vm4172_vm6, %v4216_v35, %v4213_v36  ;;  %v7789_v36 = vld [vmem:[%s9348_s18] sm:$0xff]   ;;  %v7759_v35 = vld [vmem:[%s9346_s16 + $0x30] sm:$0xff]  }
 0xb15   : > { %v4219_v50 = vrot.slane %v4173_v14, 4  ;;  %v4222_v40 = vrot.slane %v4217_v6, 4 }
 0xb17   : > { %v4225_v56 = vsel %vm4224_vm7, %v4194_v20, %v4219_v50  ;;  %v4226_v10 = vsel %vm4224_vm7, %v4173_v14, %v4222_v40  ;;  %v7761_v20 = vld [vmem:[%s9346_s16 + $0x40] sm:$0xff]  }
 0xb18   : > { %v4232_v33 = vpack.c.bf16 %v4226_v10, %v4225_v56 }
 0xb1a   : > { %7192 = vmatmul.mubr.msk.bf16.vlgmr.msra.gmra.mrb[128].mxu0 %vm764_vm0, %v4232_v33  ;;  %v7762_v33 = vld [vmem:[%s9346_s16 + $0x48] sm:$0xff]  }
 0xb1b   : > { %7204 = vmatpush3.bf16.msra.mxu0 %v7742_v4  ;;  %7207 = vmatprep.mubr.msk.bf16.mxu0 %vm7858_vm2, %v7857_v62 }
 0xb1c   : > { %7205 = vmatprep.subr.bf16.mxu0 %v7857_v62 }
 0xb1f   : > { %7206 = vmatpush3.bf16.msra.mxu0 %v7743_v24 }
 0xb20   : > { %7217 = vmatprep.subr.bf16.mxu0 %v7857_v62 }
 0xb22   : > { %7208 = vmatmul.mubr.msk.bf16.vlgmr.msra.gmra.mrb[132].mxu0 %vm764_vm0, %v4349_v49 }
 0xb23   : > { %7225 = vmatprep.mubr.msk.bf16.mxu0 %vm7858_vm2, %v7857_v62  ;;  %7218 = vmatpush3.bf16.msra.mxu0 %v7753_v54 }
 0xb24   : > { %7219 = vmatprep.subr.bf16.mxu0 %v7857_v62 }
 0xb27   : > { %7220 = vmatpush3.bf16.msra.mxu0 %v7754_v60 }
 0xb28   : > { %7221 = vmatprep.subr.bf16.mxu0 %v7857_v62 }
 0xb2b   : > { %7222 = vmatpush3.bf16.msra.mxu0 %v7755_v5  ;;  %v7764_v5 = vld [vmem:[%s9346_s16 + $0x58] sm:$0xff]  }
 0xb2c   : > { %7223 = vmatprep.subr.bf16.mxu0 %v7857_v62 }
 0xb2f   : > { %7224 = vmatpush3.bf16.msra.mxu0 %v7756_v38 }
 0xb30   : > { %7235 = vmatprep.subr.bf16.mxu0 %v7857_v62 }
 0xbd7   : > { %v4342_v12 = vpop.f32.mrb[100].mxu1 }
 0xbd8   : > { %v7201_v17 = vpop.f32.mrb[101].mxu1 }
 0xbd9   : > { %v4345_v25 = vpop.f32.mrb[102].mxu1 }
 0xbda   : > { %v7202_v39 = vpop.f32.mrb[103].mxu1 }
 0xbed   : > { %v4286_v42 = vpop.f32.mrb[128].mxu0 }
 0xbee   : > { %v4343_v0 = vadd.f32 %v4342_v12, %v4286_v42  ;;  %v7193_v51 = vpop.f32.mrb[129].mxu0 }
 0xbef   : > { %v4289_v57 = vpop.f32.mrb[130].mxu0  ;;  %v7766_v51 = vld [vmem:[%s9346_s16 + $0x68] sm:$0xff]  }
 0xbf0   : > { %v4346_v53 = vadd.f32 %v4345_v25, %v4289_v57  ;;  %v7194_v58 = vpop.f32.mrb[131].mxu0  ;;  %v7765_v25 = vld [vmem:[%s9346_s16 + $0x60] sm:$0xff]  }
 0xbf1   : > { %v7767_v58 = vld [vmem:[%s9346_s16 + $0x70] sm:$0xff]  }
 0xbf5   : > { %v4403_v59 = vpop.f32.mrb[132].mxu0 }
 0xbf6   : > { %v4410_v31 = vadd.f32 %v4403_v59, %v4343_v0  ;;  %v7209_v32 = vpop.f32.mrb[133].mxu0 }
 0xbf7   : > { %v4406_v37 = vpop.f32.mrb[134].mxu0  ;;  %v7768_v32 = vld [vmem:[%s9346_s16 + $0x78] sm:$0xff]  }
 0xbf8   : > { %v4419_v2 = vadd.f32 %v6134_v26, %v4410_v31  ;;  %v4411_v34 = vadd.f32 %v4406_v37, %v4346_v53  ;;  %v7210_v28 = vpop.f32.mrb[135].mxu0 }
 0xbfa   : > { %v4421_v7 = vmul.f32 0.1, %v4419_v2  ;;  %v4420_v8 = vadd.f32 %v6134_v26, %v4411_v34  ;;  %v7769_v34 = vld [vmem:[%s9346_s16 + $0x80] sm:$0xff]  }
 0xbfc   : > { %v4422_v13 = vmul.f32 0.1, %v4420_v8  ;;  %v4423_v43 = vmax.f32 %v4419_v2, %v4421_v7 }
 0xbfe   : > { %v4424_v44 = vmax.f32 %v4420_v8, %v4422_v13  ;;  %v7770_v13 = vld [vmem:[%s9346_s16 + $0x88] sm:$0xff]  }
 0xc00   : > { %v4425_v45 = vpack.c.bf16 %v4424_v44, %v4423_v43 }
 0xc02   : > { %7212 = vmatpush3.bf16.msra.mxu1 %v4425_v45 }
 0xc03   : > { %7229 = vmatprep.subr.bf16.mxu1 %v7857_v62 }
 0xc05   : > { %7214 = vmatmul.mubr.msk.bf16.vlgmr.msra.gmra.mrb[104].mxu1 %vm1186_vm1, %v7744_v46 }
 0xc06   : > { %7230 = vmatpush3.bf16.msra.mxu1 %v4425_v45  ;;  %7231 = vmatprep.mubr.msk.bf16.mxu1 %vm7858_vm2, %v7857_v62 }
 0xc07   : > { %7247 = vmatprep.subr.bf16.mxu1 %v7857_v62 }
 0xc0d   : > { %7232 = vmatmul.mubr.msk.bf16.vlgmr.msra.gmra.mrb[108].mxu1 %vm1186_vm1, %v7745_v1 }
 0xc0e   : > { %7248 = vmatpush3.bf16.msra.mxu1 %v4425_v45  ;;  %7249 = vmatprep.mubr.msk.bf16.mxu1 %vm7858_vm2, %v7857_v62 }
 0xc0f   : > { %7265 = vmatprep.subr.bf16.mxu1 %v7857_v62 }
 0xc15   : > { %7250 = vmatmul.mubr.msk.bf16.vlgmr.msra.gmra.mrb[112].mxu1 %vm1186_vm1, %v7746_v9 }
 0xc16   : > { %7266 = vmatpush3.bf16.msra.mxu1 %v4425_v45  ;;  %7267 = vmatprep.mubr.msk.bf16.mxu1 %vm7858_vm2, %v7857_v62 }
 0xc17   : > { %7283 = vmatprep.subr.bf16.mxu1 %v7857_v62 }
 0xc1d   : > { %7268 = vmatmul.mubr.msk.bf16.vlgmr.msra.gmra.mrb[116].mxu1 %vm1186_vm1, %v7747_v15  ;;  %v7772_v15 = vld [vmem:[%s9346_s16 + $0x98] sm:$0xff]  }
 0xc1e   : > { %7284 = vmatpush3.bf16.msra.mxu1 %v4425_v45  ;;  %7285 = vmatprep.mubr.msk.bf16.mxu1 %vm7858_vm2, %v7857_v62 }
 0xc1f   : > { %7301 = vmatprep.subr.bf16.mxu1 %v7857_v62 }
 0xc25   : > { %7286 = vmatmul.mubr.msk.bf16.vlgmr.msra.gmra.mrb[120].mxu1 %vm1186_vm1, %v7748_v55 }
 0xc26   : > { %7302 = vmatpush3.bf16.msra.mxu1 %v4425_v45  ;;  %7303 = vmatprep.mubr.msk.bf16.mxu1 %vm7858_vm2, %v7857_v62 }
 0xc27   : > { %7319 = vmatprep.subr.bf16.mxu1 %v7857_v62 }
 0xc2d   : > { %7304 = vmatmul.mubr.msk.bf16.vlgmr.msra.gmra.mrb[124].mxu1 %vm1186_vm1, %v7749_v61 }
 0xc2e   : > { %7320 = vmatpush3.bf16.msra.mxu1 %v4425_v45  ;;  %7321 = vmatprep.mubr.msk.bf16.mxu1 %vm7858_vm2, %v7857_v62 }
 0xc2f   : > { %7337 = vmatprep.subr.bf16.mxu1 %v7857_v62 }
 0xc35   : > { %7322 = vmatmul.mubr.msk.bf16.vlgmr.msra.gmra.mrb[128].mxu1 %vm1186_vm1, %v7750_v23  ;;  %v7773_v23 = vld [vmem:[%s9346_s16 + $0xa0] sm:$0xff]  }
 0xc36   : > { %7338 = vmatpush3.bf16.msra.mxu1 %v4425_v45  ;;  %7339 = vmatprep.mubr.msk.bf16.mxu1 %vm7858_vm2, %v7857_v62 }
 0xc37   : > { %7355 = vmatprep.subr.bf16.mxu1 %v7857_v62 }
 0xc3d   : > { %7340 = vmatmul.mubr.msk.bf16.vlgmr.msra.gmra.mrb[132].mxu1 %vm1186_vm1, %v7751_v21 }
 0xc3e   : > { %7356 = vmatpush3.bf16.msra.mxu1 %v4425_v45  ;;  %7357 = vmatprep.mubr.msk.bf16.mxu1 %vm7858_vm2, %v7857_v62  ;;  %v7771_v45 = vld [vmem:[%s9346_s16 + $0x90] sm:$0xff]  }
 0xc3f   : > { %7373 = vmatprep.subr.bf16.mxu1 %v7857_v62 }
 0xc45   : > { %7358 = vmatmul.mubr.msk.bf16.vlgmr.msra.gmra.mrb[136].mxu1 %vm1186_vm1, %v7752_v29 }
 0xc46   : > { %7381 = vmatprep.mubr.msk.bf16.mxu1 %vm7858_vm2, %v7857_v62  ;;  %7374 = vmatpush3.bf16.msra.mxu1 %v7789_v36  ;;  %v7780_v36 = vld [vmem:[%s9346_s16 + $0xd8] sm:$0xff]  }
 0xc47   : > { %7375 = vmatprep.subr.bf16.mxu1 %v7857_v62 }
 0xcd8   : > { %v4477_v48 = vpop.f32.mrb[104].mxu1 }
 0xcd9   : > { %v7215_v30 = vpop.f32.mrb[105].mxu1 }
 0xcda   : > { %v4480_v3 = vpop.f32.mrb[106].mxu1  ;;  %v7775_v30 = vld [vmem:[%s9346_s16 + $0xb0] sm:$0xff]  }
 0xcdb   : > { %v4484_v16 = vpack.c.bf16 %v4480_v3, %v4477_v48  ;;  %v7216_v19 = vpop.f32.mrb[107].mxu1  ;;  %v7774_v48 = vld [vmem:[%s9346_s16 + $0xa8] sm:$0xff]   ;;  %v7776_v3 = vld [vmem:[%s9346_s16 + $0xb8] sm:$0xff]  }
 0xcdc   : > { %v7779_v19 = vld [vmem:[%s9346_s16 + $0xd0] sm:$0xff]  }
 0xcdd   : > { %7226 = vmatmul.mubr.msk.bf16.vlgmr.msra.gmra.mrb[136].mxu0 %vm3002_vm3, %v4484_v16  ;;  %v7778_v16 = vld [vmem:[%s9346_s16 + $0xc8] sm:$0xff]  }
 0xcde   : > { %7236 = vmatpush3.bf16.msra.mxu0 %v7757_v11  ;;  %7243 = vmatprep.mubr.msk.bf16.mxu0 %vm7858_vm2, %v7857_v62  ;;  %v7777_v11 = vld [vmem:[%s9346_s16 + $0xc0] sm:$0xff]  }
 0xcdf   : > { %7237 = vmatprep.subr.bf16.mxu0 %v7857_v62 }
 0xce0   : > { %v4608_v63 = vpop.f32.mrb[108].mxu1 }
 0xce1   : > { %v7233_v27 = vpop.f32.mrb[109].mxu1 }
 0xce2   : > { %7238 = vmatpush3.bf16.msra.mxu0 %v7758_v52  ;;  %v4611_v14 = vpop.f32.mrb[110].mxu1  ;;  %v7781_v52 = vld [vmem:[%s9346_s16 + $0xe0] sm:$0xff]   ;;  %v7783_v27 = vld [vmem:[%s9346_s16 + $0xf0] sm:$0xff]  }
 0xce3   : > { %7239 = vmatprep.subr.bf16.mxu0 %v7857_v62  ;;  %v4615_v22 = vpack.c.bf16 %v4611_v14, %v4608_v63  ;;  %v7234_v6 = vpop.f32.mrb[111].mxu1  ;;  %v7782_v63 = vld [vmem:[%s9346_s16 + $0xe8] sm:$0xff]   ;;  %v7785_v14 = vld [vmem:[%s9346_s16 + $0x100] sm:$0xff]  }
 0xce4   : > { %v7787_v6 = vld [vmem:[%s9346_s16 + $0x110] sm:$0xff]  }
 0xce6   : > { %7240 = vmatpush3.bf16.msra.mxu0 %v7759_v35  ;;  %v7784_v35 = vld [vmem:[%s9346_s16 + $0xf8] sm:$0xff]  }
 0xce7   : > { %7241 = vmatprep.subr.bf16.mxu0 %v7857_v62 }
 0xce8   : > { %v4740_v50 = vpop.f32.mrb[112].mxu1 }
 0xce9   : > { %v7251_v40 = vpop.f32.mrb[113].mxu1 }
 0xcea   : > { %7242 = vmatpush3.bf16.msra.mxu0 %v7760_v41  ;;  %v4743_v56 = vpop.f32.mrb[114].mxu1  ;;  %v7788_v41 = vld [vmem:[%s9346_s16 + $0x118] sm:$0xff]   ;;  %v7791_v40 = vld [vmem:[%s9348_s18 + $0x10] sm:$0xff]  }
 0xceb   : > { %7253 = vmatprep.subr.bf16.mxu0 %v7857_v62  ;;  %v4747_v10 = vpack.c.bf16 %v4743_v56, %v4740_v50  ;;  %v7252_v4 = vpop.f32.mrb[115].mxu1  ;;  %v7790_v50 = vld [vmem:[%s9348_s18 + $0x8] sm:$0xff]   ;;  %v6135_v56 = vld [vmem:[%s9347_s17] ss:$0 sm:$0xff] }
 0xcec   : > { %7376 = vmatpush3.bf16.msra.mxu1 %v7790_v50 }
 0xced   : > { %7244 = vmatmul.mubr.msk.bf16.vlgmr.msra.gmra.mrb[136].mxu0 %vm3002_vm3, %v4615_v22  ;;  %v7786_v22 = vld [vmem:[%s9346_s16 + $0x108] sm:$0xff]   ;;  %7377 = vmatprep.subr.bf16.mxu1 %v7857_v62 }
 0xcee   : > { %7254 = vmatpush3.bf16.msra.mxu0 %v7761_v20  ;;  %7261 = vmatprep.mubr.msk.bf16.mxu0 %vm7858_vm2, %v7857_v62  ;;  %v7792_v20 = vld [vmem:[%s9348_s18 + $0x18] sm:$0xff]  }
 0xcef   : > { %7255 = vmatprep.subr.bf16.mxu0 %v7857_v62 }
 0xcf0   : > { %v4872_v18 = vpop.f32.mrb[116].mxu1  ;;  %7378 = vmatpush3.bf16.msra.mxu1 %v7791_v40 }
 0xcf1   : > { %v7269_v24 = vpop.f32.mrb[117].mxu1  ;;  %7379 = vmatprep.subr.bf16.mxu1 %v7857_v62 }
 0xcf2   : > { %7256 = vmatpush3.bf16.msra.mxu0 %v7762_v33  ;;  %v4875_v49 = vpop.f32.mrb[118].mxu1 }
 0xcf3   : > { %7257 = vmatprep.subr.bf16.mxu0 %v7857_v62  ;;  %v4879_v54 = vpack.c.bf16 %v4875_v49, %v4872_v18  ;;  %v7270_v60 = vpop.f32.mrb[119].mxu1 }
 0xcf4   : > { %7380 = vmatpush3.bf16.msra.mxu1 %v7792_v20 }
 0xcf6   : > { %7258 = vmatpush3.bf16.msra.mxu0 %v7763_v47 }
 0xcf7   : > { %7259 = vmatprep.subr.bf16.mxu0 %v7857_v62 }
 0xcf8   : > { %v5004_v12 = vpop.f32.mrb[120].mxu1 }
 0xcf9   : > { %v7287_v17 = vpop.f32.mrb[121].mxu1 }
 0xcfa   : > { %7260 = vmatpush3.bf16.msra.mxu0 %v7764_v5  ;;  %v5007_v39 = vpop.f32.mrb[122].mxu1 }
 0xcfb   : > { %7271 = vmatprep.subr.bf16.mxu0 %v7857_v62  ;;  %v5011_v42 = vpack.c.bf16 %v5007_v39, %v5004_v12  ;;  %v7288_v0 = vpop.f32.mrb[123].mxu1  ;;  %v6279_v12 = vld [vmem:[%s9349_s19] ss:$0 sm:$0xff] }
 0xcfd   : > { %7262 = vmatmul.mubr.msk.bf16.vlgmr.msra.gmra.mrb[136].mxu0 %vm3002_vm3, %v4747_v10 }
 0xcfe   : > { %7272 = vmatpush3.bf16.msra.mxu0 %v7765_v25  ;;  %7279 = vmatprep.mubr.msk.bf16.mxu0 %vm7858_vm2, %v7857_v62 }
 0xcff   : > { %7273 = vmatprep.subr.bf16.mxu0 %v7857_v62 }
 0xd00   : > { %v5136_v57 = vpop.f32.mrb[124].mxu1 }
 0xd01   : > { %v7305_v53 = vpop.f32.mrb[125].mxu1 }
 0xd02   : > { %7274 = vmatpush3.bf16.msra.mxu0 %v7766_v51  ;;  %v5139_v59 = vpop.f32.mrb[126].mxu1 }
 0xd03   : > { %7275 = vmatprep.subr.bf16.mxu0 %v7857_v62  ;;  %v5143_v26 = vpack.c.bf16 %v5139_v59, %v5136_v57  ;;  %v7306_v31 = vpop.f32.mrb[127].mxu1 }
 0xd06   : > { %7276 = vmatpush3.bf16.msra.mxu0 %v7767_v58 }
 0xd07   : > { %7277 = vmatprep.subr.bf16.mxu0 %v7857_v62 }
 0xd08   : > { %v5268_v37 = vpop.f32.mrb[128].mxu1 }
 0xd09   : > { %v7323_v2 = vpop.f32.mrb[129].mxu1 }
 0xd0a   : > { %7278 = vmatpush3.bf16.msra.mxu0 %v7768_v32  ;;  %v5271_v28 = vpop.f32.mrb[130].mxu1 }
 0xd0b   : > { %7289 = vmatprep.subr.bf16.mxu0 %v7857_v62  ;;  %v5275_v7 = vpack.c.bf16 %v5271_v28, %v5268_v37  ;;  %v7324_v8 = vpop.f32.mrb[131].mxu1 }
 0xd0d   : > { %7280 = vmatmul.mubr.msk.bf16.vlgmr.msra.gmra.mrb[136].mxu0 %vm3002_vm3, %v4879_v54 }
 0xd0e   : > { %7290 = vmatpush3.bf16.msra.mxu0 %v7769_v34  ;;  %7297 = vmatprep.mubr.msk.bf16.mxu0 %vm7858_vm2, %v7857_v62 }
 0xd0f   : > { %7291 = vmatprep.subr.bf16.mxu0 %v7857_v62 }
 0xd10   : > { %v5400_v43 = vpop.f32.mrb[132].mxu1 }
 0xd11   : > { %v7341_v44 = vpop.f32.mrb[133].mxu1 }
 0xd12   : > { %7292 = vmatpush3.bf16.msra.mxu0 %v7770_v13  ;;  %v5403_v46 = vpop.f32.mrb[134].mxu1 }
 0xd13   : > { %7293 = vmatprep.subr.bf16.mxu0 %v7857_v62  ;;  %v5407_v1 = vpack.c.bf16 %v5403_v46, %v5400_v43  ;;  %v7342_v9 = vpop.f32.mrb[135].mxu1 }
 0xd16   : > { %7294 = vmatpush3.bf16.msra.mxu0 %v7771_v45 }
 0xd17   : > { %7295 = vmatprep.subr.bf16.mxu0 %v7857_v62 }
 0xd18   : > { %v9182_v55 = vpop.f32.mrb[136].mxu1 }
 0xd19   : > { %v7359_v61 = vpop.f32.mrb[137].mxu1 }
 0xd1a   : > { %7296 = vmatpush3.bf16.msra.mxu0 %v7772_v15  ;;  %v5535_v21 = vpop.f32.mrb[138].mxu1 }
 0xd1b   : > { %7307 = vmatprep.subr.bf16.mxu0 %v7857_v62  ;;  %v5539_v29 = vpack.c.bf16 %v5535_v21, %v9182_v55  ;;  %v7360_v38 = vpop.f32.mrb[139].mxu1 }
 0xd1d   : > { %7298 = vmatmul.mubr.msk.bf16.vlgmr.msra.gmra.mrb[136].mxu0 %vm3002_vm3, %v5011_v42 }
 0xd1e   : > { %7308 = vmatpush3.bf16.msra.mxu0 %v7773_v23  ;;  %7315 = vmatprep.mubr.msk.bf16.mxu0 %vm7858_vm2, %v7857_v62 }
 0xd1f   : > { %7309 = vmatprep.subr.bf16.mxu0 %v7857_v62 }
 0xd22   : > { %7310 = vmatpush3.bf16.msra.mxu0 %v7774_v48 }
 0xd23   : > { %7311 = vmatprep.subr.bf16.mxu0 %v7857_v62 }
 0xd26   : > { %7312 = vmatpush3.bf16.msra.mxu0 %v7775_v30 }
 0xd27   : > { %7313 = vmatprep.subr.bf16.mxu0 %v7857_v62 }
 0xd2a   : > { %7314 = vmatpush3.bf16.msra.mxu0 %v7776_v3 }
 0xd2b   : > { %7325 = vmatprep.subr.bf16.mxu0 %v7857_v62 }
 0xd2d   : > { %7316 = vmatmul.mubr.msk.bf16.vlgmr.msra.gmra.mrb[136].mxu0 %vm3002_vm3, %v5143_v26 }
 0xd2e   : > { %7326 = vmatpush3.bf16.msra.mxu0 %v7777_v11  ;;  %7333 = vmatprep.mubr.msk.bf16.mxu0 %vm7858_vm2, %v7857_v62 }
 0xd2f   : > { %7327 = vmatprep.subr.bf16.mxu0 %v7857_v62 }
 0xd32   : > { %7328 = vmatpush3.bf16.msra.mxu0 %v7778_v16 }
 0xd33   : > { %7329 = vmatprep.subr.bf16.mxu0 %v7857_v62 }
 0xd36   : > { %7330 = vmatpush3.bf16.msra.mxu0 %v7779_v19 }
 0xd37   : > { %7331 = vmatprep.subr.bf16.mxu0 %v7857_v62 }
 0xd3a   : > { %7332 = vmatpush3.bf16.msra.mxu0 %v7780_v36 }
 0xd3b   : > { %7343 = vmatprep.subr.bf16.mxu0 %v7857_v62 }
 0xd3d   : > { %7334 = vmatmul.mubr.msk.bf16.vlgmr.msra.gmra.mrb[136].mxu0 %vm3002_vm3, %v5275_v7 }
 0xd3e   : > { %7344 = vmatpush3.bf16.msra.mxu0 %v7781_v52  ;;  %7351 = vmatprep.mubr.msk.bf16.mxu0 %vm7858_vm2, %v7857_v62 }
 0xd3f   : > { %7345 = vmatprep.subr.bf16.mxu0 %v7857_v62 }
 0xd42   : > { %7346 = vmatpush3.bf16.msra.mxu0 %v7782_v63 }
 0xd43   : > { %7347 = vmatprep.subr.bf16.mxu0 %v7857_v62 }
 0xd46   : > { %7348 = vmatpush3.bf16.msra.mxu0 %v7783_v27 }
 0xd47   : > { %7349 = vmatprep.subr.bf16.mxu0 %v7857_v62 }
 0xd4a   : > { %7350 = vmatpush3.bf16.msra.mxu0 %v7784_v35 }
 0xd4b   : > { %7361 = vmatprep.subr.bf16.mxu0 %v7857_v62 }
 0xd4d   : > { %7352 = vmatmul.mubr.msk.bf16.vlgmr.msra.gmra.mrb[136].mxu0 %vm3002_vm3, %v5407_v1 }
 0xd4e   : > { %7362 = vmatpush3.bf16.msra.mxu0 %v7785_v14  ;;  %7369 = vmatprep.mubr.msk.bf16.mxu0 %vm7858_vm2, %v7857_v62 }
 0xd4f   : > { %7363 = vmatprep.subr.bf16.mxu0 %v7857_v62 }
 0xd52   : > { %7364 = vmatpush3.bf16.msra.mxu0 %v7786_v22 }
 0xd53   : > { %7365 = vmatprep.subr.bf16.mxu0 %v7857_v62 }
 0xd56   : > { %7366 = vmatpush3.bf16.msra.mxu0 %v7787_v6 }
 0xd57   : > { %7367 = vmatprep.subr.bf16.mxu0 %v7857_v62 }
 0xd5a   : > { %7368 = vmatpush3.bf16.msra.mxu0 %v7788_v41 }
 0xd5d   : > { %7370 = vmatmul.mubr.msk.bf16.vlgmr.msra.gmra.mrb[136].mxu0 %vm3002_vm3, %v5539_v29 }
 0xe30   : > { %v5610_v10 = vpop.f32.mrb[136].mxu0 }
 0xe31   : > { %v7399_v4 = vadd.f32 %v6135_v56, %v5610_v10  ;;  %v7371_v33 = vpop.f32.mrb[137].mxu0 }
 0xe32   : > { %v5613_v18 = vpop.f32.mrb[138].mxu0 }
 0xe33   : > { %v5619_v24 = vmul.f32 0.1, %v7399_v4  ;;  %v7400_v47 = vadd.f32 %v6135_v56, %v5613_v18  ;;  %v7372_v49 = vpop.f32.mrb[139].mxu0 }
 0xe35   : > { %v5620_v54 = vmul.f32 0.1, %v7400_v47  ;;  %v5621_v62 = vmax.f32 %v7399_v4, %v5619_v24 }
 0xe37   : > { %v5622_v60 = vmax.f32 %v7400_v47, %v5620_v54 }
 0xe39   : > { %v5623_v5 = vpack.c.bf16 %v5622_v60, %v5621_v62 }
 0xe3b   : > { %7382 = vmatmul.mubr.msk.bf16.vlgmr.msra.gmra.mrb[140].mxu1 %vm3002_vm3, %v5623_v5 }
 0xf0e   : > { %v5700_v17 = vpop.f32.mrb[140].mxu1 }
 0xf0f   : > { %v5701_v25 = vadd.f32 %v6279_v12, %v5700_v17  ;;  %v7383_v39 = vpop.f32.mrb[141].mxu1 }
 0xf10   : > { %v5703_v42 = vpop.f32.mrb[142].mxu1 }
 0xf11   : > { %5707 = vst [vmem:[%s622_s29] sm:$0xff] %v5701_v25  ;;  %v5704_v0 = vadd.f32 %v6279_v12, %v5703_v42  ;;  %v7384_v51 = vpop.f32.mrb[143].mxu1 }
 0xf13   : > { %5708 = vst [vmem:[%s622_s29 + $0x8] sm:$0xff] %v5704_v0 }
 0xf14   : > { %7806 = shalt.err (!%p7803_p3)
}
 0xf15   : > { %s7807_s21 = scalar_lea.hbm %s9287_s24, 256  ;;  %s7811_s27 = scalar_lea.hbm %s9350_s20, 512 }
 0xf16   : > { %p7808_p4 = scmp.ne.s32.totalorder %s9287_s24, %s7807_s21  ;;  %p7812_p9 = scmp.lt.u32.totalorder %s9287_s24, %s9350_s20 }
 0xf17   : > { %p7813_p10 = scmp.lt.u32.totalorder %s7811_s27, %s7807_s21  ;;  %p7815_p12 = scmp.lt.u32.totalorder %s7807_s21, %s9287_s24 }
 0xf18   : > { %p7809_p7 = pnand %p7808_p4, %p8005_p5 }
 0xf19   : > { %p7814_p11 = por %p7813_p10, %p7812_p9 }
 0xf1a   : > { %p7810_p8 = pneg %p7809_p7 }
 0xf1b   : > { %p7816_p13 = por %p7815_p12, %p7814_p11 }
 0xf1d   : > { %p7817_p0 = pnand %p7816_p13, %p7810_p8 }
 0xf1f   : > { %7820 = shalt.err (!%p7817_p0)
}
 0xf20   : > { %s7860_s0 = smov 128   ;;  %s7861_s2 = smov 8  }
 0xf21   : > { %7529 = dma.vmem_to_hbm [thread:$0]  (%p8005_p5), %s9282_s25, 256, %s9287_s24, %s9289_s30, %s7860_s0, %s7860_s0, %s7861_s2  }
 0xf22 PF: > { %s9399_s3 = sld [smem:[#allocation7_spill]]  ;;  %s9400_s29 = sld [smem:[#allocation5_spill]] }
 0xf28   : > { %p7535_p1 = scmp.ge.s32.totalorder %s9399_s3, 2  ;;  %s5738_s1 = sand.u32 1, %s9400_s29  }
 0xf29   : > { %s5739_s21 = scalar_lea.sflag [#allocation3], %s5738_s1 }
 0xf2a   : > { %p7532_p2 = pnand %p7535_p1, %p8009_p6 }
 0xf2c   : > { %7838 = dma.done.wait (!%p7532_p2), %s5739_s21, 256  }
 0xf2d   : > { %7840 = vsyncadd (!%p7532_p2), %s5739_s21, 4294967040  ;;  %s9402_s24 = sld [smem:[#allocation8_spill]]  ;;  %s9403_s27 = sld [smem:[#allocation6_spill]] }
 0xf2e   : > { %s9404_s23 = sld [smem:[#allocation9_spill]]  ;;  %s9405_s1 = smov %s7847_s22 }
 0xf33   : > { %p30_p3 = scmp.ge.s32.totalorder %s9402_s24, 4   ;;  %s9406_s22 = smov %s9403_s27 }
 0xf35   :  { %32 = sbr.rel (!%p30_p3) target bundleno = 9 (0x9), region = 183 }
 0xf3c   :  { %5744 = vsyncpa [#allocation3], 1 }
 0xf3d   :  { %5746 = vsyncpa [#allocation3 + $0x1], 1 }

</bundles_post_ra>
